<compile_context>
chip_gen: v6e
topology: v6e:2x2x1
jax: 0.10.0
libtpu: 0.0.40
codegen_flags: <defaults>
</compile_context>

<pallas_src>
import functools

import jax
import jax.numpy as jnp
from jax.experimental import pallas as pl
from jax.experimental.pallas import tpu as pltpu

ACT_DTYPE = jnp.bfloat16            # MXU operand dtype (accumulation stays f32)

# Architecture constants fixed by the PyTorch module.
K1, S1, C1OUT = 8, 4, 32
K2, S2, C2OUT = 4, 2, 64
K3, S3, C3OUT = 3, 1, 64
BLK = S1 * S2                        # 8 -- input super-block size (composed conv1/conv2 stride)
NQ2 = K2 // S2                       # 2x2 phase quotients for conv2
NQ3 = K3 // S3                       # 3x3 shifted windows for conv3
H1FC = 512                           # hidden width of each FC head


def _cdiv(a, b):
    return -(-a // b)


def conv_out_hw(h, w):
    h, w = (h - K1) // S1 + 1, (w - K1) // S1 + 1
    h, w = (h - K2) // S2 + 1, (w - K2) // S2 + 1
    h, w = (h - K3) // S3 + 1, (w - K3) // S3 + 1
    return h, w


def conv_geometry(H, W):
    """Static slab geometry for the fused conv kernel."""
    OH1, OW1 = (H - K1) // S1 + 1, (W - K1) // S1 + 1
    OH2, OW2 = (OH1 - K2) // S2 + 1, (OW1 - K2) // S2 + 1
    OH3, OW3 = OH2 - (K3 - 1), OW2 - (K3 - 1)
    # Super-block grid: wide/tall enough that every slab row read by a VALID output stays
    # inside one slab row (no column wrap) and every window slice stays in bounds.
    ws = max(_cdiv(W, BLK), OW2 + 2)
    hs = max(_cdiv(H, BLK), OH2 + 3)
    m1 = (OH2 + 1) * ws              # conv1 rows computed == slab2 rows conv2 reads
    m2 = OH2 * ws                    # conv2 rows computed
    m3 = OH3 * ws                    # conv3 rows computed (cols >= OW3 are wrap artifacts)
    return dict(OH1=OH1, OW1=OW1, OH2=OH2, OW2=OW2, OH3=OH3, OW3=OW3,
                hs=hs, ws=ws, m1=m1, m2=m2, m3=m3)


# ----------------------------------------------------------------------------
# Fused conv stack kernel: conv1 -> (phase slab) -> conv2 -> conv3, one batch element
# per grid step, all intermediate activations in VMEM scratch.
# ----------------------------------------------------------------------------
def _conv_stack_kernel(x_ref, w1_ref, b1_ref, w2_ref, b2_ref, w3_ref, b3_ref,
                       o_ref, slab2_ref, slab3_ref, *, ws, m1, m2, m3, oh3, ow3):
    # x_ref:   (1, L8, 64*Cin)   8x8 super-block slab of the padded NHWC input (bf16)
    # w1_ref:  (4, 64*Cin, 128)  conv1 window blocks (all taps x all 4 parities)  (bf16)
    # w2_ref:  (4*128, 64)       conv2 phase blocks, rows (iq,jq | p,q,cin)       (bf16)
    # w3_ref:  (9*64, 64)        conv3 phase blocks                               (bf16)
    # b*_ref:  (1, N) f32 biases;  o_ref: (1, OH3, OW3, 64) bf16
    # slab2_ref: (m1+1, 128) bf16 scratch -- conv2's stride-2 phase slab
    # slab3_ref: (m2+2, 64)  bf16 scratch -- conv3's stride-1 slab
    n1 = w1_ref.shape[2]             # 4*C1OUT = 128
    kq2 = w2_ref.shape[0] // (NQ2 * NQ2)
    n2 = w2_ref.shape[1]             # C2OUT = 64
    n3 = w3_ref.shape[1]             # C3OUT = 64

    # --- conv1 (k=8, s=4), written directly in conv2's phase-slab layout ----------------
    # slab2 row (i2, j2), lane (p, q, c) == relu(conv1)(2*i2+p, 2*j2+q, c).
    # NOTE: accumulators are (M, 128) / (M, 64) f32 with M <= a few hundred rows at DQN
    # sizes -> no spill.  TODO(synk): sub-tile M here for much larger input resolutions.
    acc1 = None
    for widx in range(4):
        au, av = divmod(widx, 2)
        start = au * ws + av
        d = jnp.dot(x_ref[0, start:start + m1, :], w1_ref[widx],
                    preferred_element_type=jnp.float32)
        acc1 = d if acc1 is None else acc1 + d
    slab2_ref[0:m1, :] = jnp.maximum(acc1 + b1_ref[...], 0.0).astype(slab2_ref.dtype)
    slab2_ref[m1:m1 + 1, :] = jnp.zeros((1, n1), slab2_ref.dtype)   # read by garbage rows only

    # --- conv2 (k=4, s=2): 2x2 phase windows of slab2, each K = 4*32 = 128 --------------
    acc2 = None
    for iq in range(NQ2):
        for jq in range(NQ2):
            start = iq * ws + jq
            blk_i = iq * NQ2 + jq
            wq = w2_ref[blk_i * kq2:(blk_i + 1) * kq2, :]
            d = jnp.dot(slab2_ref[start:start + m2, :], wq,
                        preferred_element_type=jnp.float32)
            acc2 = d if acc2 is None else acc2 + d
    slab3_ref[0:m2, :] = jnp.maximum(acc2 + b2_ref[...], 0.0).astype(slab3_ref.dtype)
    slab3_ref[m2:m2 + 2, :] = jnp.zeros((2, n2), slab3_ref.dtype)   # read by garbage rows only

    # --- conv3 (k=3, s=1): 3x3 shifted windows of slab3, each K = 64 --------------------
    acc3 = None
    for iq in range(NQ3):
        for jq in range(NQ3):
            start = iq * ws + jq
            blk_i = iq * NQ3 + jq
            wq = w3_ref[blk_i * n2:(blk_i + 1) * n2, :]
            d = jnp.dot(slab3_ref[start:start + m3, :], wq,
                        preferred_element_type=jnp.float32)
            acc3 = d if acc3 is None else acc3 + d
    y3 = jnp.maximum(acc3 + b3_ref[...], 0.0).astype(o_ref.dtype)
    # Keep only the valid output columns (slab columns ow >= OW3 are wrap artifacts).
    for oh in range(oh3):
        o_ref[0, oh, :, :] = y3[oh * ws:oh * ws + ow3, :]


def conv_stack(state_nchw, pp, g):
    """state NCHW -> flattened conv features (B, OH3*OW3*64) in (h, w, c) order (bf16)."""
    B, _, H, W = state_nchw.shape
    hs, ws = g["hs"], g["ws"]
    OH3, OW3, m1, m2, m3 = g["OH3"], g["OW3"], g["m1"], g["m2"], g["m3"]

    x = jnp.transpose(state_nchw, (0, 2, 3, 1)).astype(ACT_DTYPE)       # NCHW -> NHWC once
    x = jnp.pad(x, ((0, 0), (0, hs * BLK - H), (0, ws * BLK - W), (0, 0)))
    cin = x.shape[-1]
    # One input-sized rearrange: (B, hs*ws, 8*8*Cin) super-block slab.
    x = x.reshape(B, hs, BLK, ws, BLK, cin).transpose(0, 1, 3, 2, 4, 5)
    x = x.reshape(B, hs * ws, BLK * BLK * cin)
    L8, CP = x.shape[1], x.shape[2]

    w1, b1 = pp["c1_w"], pp["c1_b"]
    w2, b2 = pp["c2_w"], pp["c2_b"]
    w3, b3 = pp["c3_w"], pp["c3_b"]
    n1 = w1.shape[2]

    kernel = functools.partial(_conv_stack_kernel, ws=ws, m1=m1, m2=m2, m3=m3,
                               oh3=OH3, ow3=OW3)
    flops = 2 * B * (4 * m1 * CP * n1 + 4 * m2 * w2.shape[0] // 4 * C2OUT
                     + 9 * m3 * C2OUT * C3OUT)
    bytes_accessed = (x.size * x.dtype.itemsize
                      + sum(a.size * a.dtype.itemsize for a in (w1, b1, w2, b2, w3, b3))
                      + B * OH3 * OW3 * C3OUT * 2)

    y = pl.pallas_call(
        kernel,
        out_shape=jax.ShapeDtypeStruct((B, OH3, OW3, C3OUT), ACT_DTYPE),
        grid=(B,),
        in_specs=[
            pl.BlockSpec((1, L8, CP), lambda b: (b, 0, 0)),
            pl.BlockSpec(w1.shape, lambda b: (0, 0, 0)),   # grid-invariant weights
            pl.BlockSpec(b1.shape, lambda b: (0, 0)),
            pl.BlockSpec(w2.shape, lambda b: (0, 0)),
            pl.BlockSpec(b2.shape, lambda b: (0, 0)),
            pl.BlockSpec(w3.shape, lambda b: (0, 0)),
            pl.BlockSpec(b3.shape, lambda b: (0, 0)),
        ],
        out_specs=pl.BlockSpec((1, OH3, OW3, C3OUT), lambda b: (b, 0, 0, 0)),
        scratch_shapes=[pltpu.VMEM((m1 + 1, n1), ACT_DTYPE),
                        pltpu.VMEM((m2 + 2, C2OUT), ACT_DTYPE)],
        compiler_params=pltpu.CompilerParams(dimension_semantics=("parallel",)),
        cost_estimate=pl.CostEstimate(flops=int(flops), transcendentals=0,
                                      bytes_accessed=int(bytes_accessed)),
    )(x, w1, b1, w2, b2, w3, b3)
    return y.reshape(B, OH3 * OW3 * C3OUT)


# ----------------------------------------------------------------------------
# Fused FC tail + dueling combine: a1/v1 as one (F, 1024) matmul, a2/v2 as one
# block-diagonal (1024, A+1) matmul, value + advantage - advantage.mean() fused.
# ----------------------------------------------------------------------------
def _fc_dueling_kernel(x_ref, w1_ref, b1_ref, w2_ref, b2_ref, o_ref, *, n_actions):
    h = jnp.dot(x_ref[...], w1_ref[...], preferred_element_type=jnp.float32) + b1_ref[...]
    h = jnp.maximum(h, 0.0).astype(x_ref.dtype)             # bias+ReLU in f32, bf16 for MXU
    av = jnp.dot(h, w2_ref[...], preferred_element_type=jnp.float32) + b2_ref[...]
    adv = av[:, :n_actions]
    val = av[:, n_actions:]
    # torch .mean() with no dim: mean over ALL elements of advantage (batch AND actions)
    mean = jnp.sum(adv) * (1.0 / (adv.shape[0] * adv.shape[1]))
    o_ref[...] = val + adv - mean


def fc_dueling(x, w1, b1, w2, b2):
    B, F = x.shape
    H2 = w1.shape[1]
    AP1 = w2.shape[1]
    n_actions = AP1 - 1
    flops = 2 * B * (F * H2 + H2 * AP1)
    nbytes = (x.size * x.dtype.itemsize + w1.size * w1.dtype.itemsize
              + w2.size * w2.dtype.itemsize + b1.size * 4 + b2.size * 4 + B * n_actions * 4)
    # TODO(synk): K-tile w1 over a reduction grid axis (f32 hidden accumulator scratch)
    # once F or batch grows -- and quantize w1 (fp8 on v7x, int8 on v5e/v6e) since the w1
    # fetch dominates this call.  At DQN sizes the monolithic block fits comfortably.
    vmem_limit = int(min(max(2 * nbytes + (4 << 20), 16 << 20), 48 << 20))
    return pl.pallas_call(
        functools.partial(_fc_dueling_kernel, n_actions=n_actions),
        out_shape=jax.ShapeDtypeStruct((B, n_actions), jnp.float32),
        in_specs=[
            pl.BlockSpec((B, F), lambda: (0, 0)),
            pl.BlockSpec((F, H2), lambda: (0, 0)),
            pl.BlockSpec((1, H2), lambda: (0, 0)),
            pl.BlockSpec((H2, AP1), lambda: (0, 0)),
            pl.BlockSpec((1, AP1), lambda: (0, 0)),
        ],
        out_specs=pl.BlockSpec((B, n_actions), lambda: (0, 0)),
        compiler_params=pltpu.CompilerParams(vmem_limit_bytes=vmem_limit),
        cost_estimate=pl.CostEstimate(flops=int(flops), transcendentals=0,
                                      bytes_accessed=int(nbytes)),
    )(x, w1, b1, w2, b2)


# ----------------------------------------------------------------------------
# Parameters: PyTorch-layout logical params + one-time repack into kernel layout.
# ----------------------------------------------------------------------------
def init_logical_params(key, in_channels, n_actions, conv_hw):
    """PyTorch-layout parameters: Conv2d (out,in,kh,kw), Linear (out,in)."""
    Hc, Wc = conv_hw
    conv_out_size = C3OUT * Hc * Wc

    def u(k, shape, fan_in):
        s = 1.0 / (fan_in ** 0.5)
        return jax.random.uniform(k, shape, jnp.float32, -s, s)

    ks = jax.random.split(key, 14)
    return {
        "c1_w": u(ks[0], (C1OUT, in_channels, K1, K1), in_channels * K1 * K1),
        "c1_b": u(ks[1], (C1OUT,), in_channels * K1 * K1),
        "c2_w": u(ks[2], (C2OUT, C1OUT, K2, K2), C1OUT * K2 * K2),
        "c2_b": u(ks[3], (C2OUT,), C1OUT * K2 * K2),
        "c3_w": u(ks[4], (C3OUT, C2OUT, K3, K3), C2OUT * K3 * K3),
        "c3_b": u(ks[5], (C3OUT,), C2OUT * K3 * K3),
        "a1_w": u(ks[6], (H1FC, conv_out_size), conv_out_size),
        "a1_b": u(ks[7], (H1FC,), conv_out_size),
        "a2_w": u(ks[8], (n_actions, H1FC), H1FC),
        "a2_b": u(ks[9], (n_actions,), H1FC),
        "v1_w": u(ks[10], (H1FC, conv_out_size), conv_out_size),
        "v1_b": u(ks[11], (H1FC,), conv_out_size),
        "v2_w": u(ks[12], (1, H1FC), H1FC),
        "v2_b": u(ks[13], (1,), H1FC),
    }


def _pack_conv1_superblock(w, b, s1, s2):
    """torch conv1 weight (Cout, Cin, k, k) -> (4, BLK*BLK*Cin, s2*s2*Cout) bf16 window
    matmul blocks (au-major window order) + (1, s2*s2*Cout) f32 bias: conv1 is evaluated
    directly into conv2's stride-s2 phase slab (lane order = (row parity, col parity, ch))."""
    cout, cin, kh, kw = w.shape
    blk = s1 * s2
    w_hwio = jnp.transpose(w, (2, 3, 1, 0)).astype(jnp.float32)      # (kh, kw, cin, cout)
    mats = []
    for au in range(2):
        for av in range(2):
            mat = jnp.zeros((blk, blk, cin, s2, s2, cout), jnp.float32)
            for p in range(s2):
                dy0 = max(0, au * blk - s1 * p)
                dy1 = min(kh, (au + 1) * blk - s1 * p)
                if dy1 <= dy0:
                    continue
                for q in range(s2):
                    dx0 = max(0, av * blk - s1 * q)
                    dx1 = min(kw, (av + 1) * blk - s1 * q)
                    if dx1 <= dx0:
                        continue
                    ry0 = s1 * p + dy0 - au * blk
                    rx0 = s1 * q + dx0 - av * blk
                    mat = mat.at[ry0:ry0 + dy1 - dy0, rx0:rx0 + dx1 - dx0, :, p, q, :].set(
                        w_hwio[dy0:dy1, dx0:dx1])
            mats.append(mat.reshape(blk * blk * cin, s2 * s2 * cout))
    w_pk = jnp.stack(mats).astype(ACT_DTYPE)                         # (4, blk*blk*cin, 4*cout)
    b_pk = jnp.tile(b, s2 * s2).reshape(1, s2 * s2 * cout).astype(jnp.float32)
    return w_pk, b_pk


def _pack_conv(w, b, stride):
    """torch (Cout,Cin,kh,kw) -> (nq*nq*stride*stride*Cin, Cout) bf16, rows ordered
    (phase iq, jq | within-stride p, q | cin), matching the in-kernel phase-slab windows."""
    cout, cin, kh, kw = w.shape
    nqh, nqw = _cdiv(kh, stride), _cdiv(kw, stride)
    w = jnp.transpose(w, (2, 3, 1, 0))
    w = jnp.pad(w, ((0, nqh * stride - kh), (0, nqw * stride - kw), (0, 0), (0, 0)))
    w = w.reshape(nqh, stride, nqw, stride, cin, cout).transpose(0, 2, 1, 3, 4, 5)
    w = w.reshape(nqh * nqw * stride * stride * cin, cout).astype(ACT_DTYPE)
    b = b.reshape(1, cout).astype(jnp.float32)
    return w, b


def pack_params(lp, n_actions, conv_hw):
    """One-time repack: conv weights into kernel layout (NO channel padding any more),
    FC1 rows permuted from NCHW-flatten to NHWC-flatten order, both heads fused, bf16."""
    Hc, Wc = conv_hw
    c1_w, c1_b = _pack_conv1_superblock(lp["c1_w"], lp["c1_b"], S1, S2)
    c2_w, c2_b = _pack_conv(lp["c2_w"], lp["c2_b"], S2)
    c3_w, c3_b = _pack_conv(lp["c3_w"], lp["c3_b"], S3)

    def pack_fc1(w):   # (512, 64*Hc*Wc) with NCHW-flat columns -> (Hc*Wc*64, 512) rows
        w = w.reshape(H1FC, C3OUT, Hc, Wc)
        return jnp.transpose(w, (2, 3, 1, 0)).reshape(Hc * Wc * C3OUT, H1FC)

    w1 = jnp.concatenate([pack_fc1(lp["a1_w"]), pack_fc1(lp["v1_w"])], axis=1).astype(ACT_DTYPE)
    b1 = jnp.concatenate([lp["a1_b"], lp["v1_b"]]).astype(jnp.float32).reshape(1, 2 * H1FC)

    A = n_actions
    wa = jnp.transpose(lp["a2_w"])                        # (512, A)
    wv = jnp.transpose(lp["v2_w"])                        # (512, 1)
    w2 = jnp.concatenate(
        [jnp.concatenate([wa, jnp.zeros((H1FC, 1), jnp.float32)], axis=1),
         jnp.concatenate([jnp.zeros((H1FC, A), jnp.float32), wv], axis=1)], axis=0
    ).astype(ACT_DTYPE)                                   # (1024, A+1) block-diagonal
    b2 = jnp.concatenate([lp["a2_b"], lp["v2_b"]]).astype(jnp.float32).reshape(1, A + 1)

    return {"c1_w": c1_w, "c1_b": c1_b, "c2_w": c2_w, "c2_b": c2_b,
            "c3_w": c3_w, "c3_b": c3_b, "w1": w1, "b1": b1, "w2": w2, "b2": b2}


# ----------------------------------------------------------------------------
# Forward pass (Pallas) and pure-JAX f32 reference (exact PyTorch-module semantics).
# ----------------------------------------------------------------------------
def dueling_dqn_forward(pp, state_nchw):
    _, _, H, W = state_nchw.shape
    g = conv_geometry(H, W)
    conv_out = conv_stack(state_nchw, pp, g)     # (B, F) in (h, w, c) order; FC1 pre-permuted
    return fc_dueling(conv_out, pp["w1"], pp["b1"], pp["w2"], pp["b2"])


def reference_forward(lp, state):
    x = jnp.transpose(state, (0, 2, 3, 1))

    def conv(x, w, b, stride):
        wj = jnp.transpose(w, (2, 3, 1, 0))
        y = jax.lax.conv_general_dilated(x, wj, (stride, stride), "VALID",
                                         dimension_numbers=("NHWC", "HWIO", "NHWC"))
        return jnp.maximum(y + b, 0.0)

    x = conv(x, lp["c1_w"], lp["c1_b"], S1)
    x = conv(x, lp["c2_w"], lp["c2_b"], S2)
    x = conv(x, lp["c3_w"], lp["c3_b"], S3)
    conv_out = jnp.transpose(x, (0, 3, 1, 2)).reshape(x.shape[0], -1)   # .view(B,-1) on NCHW
    adv = jnp.maximum(conv_out @ lp["a1_w"].T + lp["a1_b"], 0.0) @ lp["a2_w"].T + lp["a2_b"]
    val = jnp.maximum(conv_out @ lp["v1_w"].T + lp["v1_b"], 0.0) @ lp["v2_w"].T + lp["v2_b"]
    return val + adv - jnp.mean(adv)


# ----------------------------------------------------------------------------
if __name__ == "__main__":
    # Small but non-degenerate: 52 --(k8,s4)--> 12 --(k4,s2)--> 5 --(k3,s1)--> 3
    B, C, H, W = 2, 4, 52, 52
    N_ACTIONS = 6

    key = jax.random.PRNGKey(0)
    k_x, k_p = jax.random.split(key)
    x = jax.random.normal(k_x, (B, C, H, W), jnp.float32)

    hw = conv_out_hw(H, W)
    lp = init_logical_params(k_p, C, N_ACTIONS, hw)
    pp = pack_params(lp, N_ACTIONS, hw)

    fwd = jax.jit(dueling_dqn_forward)
    out = jax.block_until_ready(fwd(pp, x))

    ref = reference_forward(lp, x)
    assert out.shape == (B, N_ACTIONS)
    err = float(jnp.max(jnp.abs(out - ref)))
    scale = float(jnp.max(jnp.abs(ref)))
    # bf16 matmul operands vs f32 reference -> tolerance scaled to the Q-value magnitude
    assert err <= 1e-2 + 5e-2 * scale, f"max abs err {err} (ref scale {scale})"

    print("KERNEL_OK")
</pallas_src>

<mosaic_0001>
module attributes {stable_mosaic.version = 11 : i64} {
  func.func @_conv_stack_kernel(%arg0: i32, %arg1: memref<1x56x256xbf16, #tpu.memory_space<vmem>>, %arg2: memref<4x256x128xbf16, #tpu.memory_space<vmem>>, %arg3: memref<1x128xf32, #tpu.memory_space<vmem>>, %arg4: memref<512x64xbf16, #tpu.memory_space<vmem>>, %arg5: memref<1x64xf32, #tpu.memory_space<vmem>>, %arg6: memref<576x64xbf16, #tpu.memory_space<vmem>>, %arg7: memref<1x64xf32, #tpu.memory_space<vmem>>, %arg8: memref<1x3x3x64xbf16, #tpu.memory_space<vmem>>, %arg9: memref<43x128xbf16, #tpu.memory_space<vmem>>, %arg10: memref<37x64xbf16, #tpu.memory_space<vmem>>) attributes {dimension_semantics = [#tpu.dimension_semantics<parallel>], iteration_bounds = array<i64: 2>, scalar_prefetch = 0 : i64, scratch_operands = 2 : i64, tpu.core_type = #tpu.core_type<tc>, window_params = [{transform_indices = @transform_0, window_bounds = array<i64: 1, 56, 256>}, {pipeline_mode = #tpu.pipeline_mode<synchronous>, transform_indices = @transform_1, window_bounds = array<i64: 4, 256, 128>}, {pipeline_mode = #tpu.pipeline_mode<synchronous>, transform_indices = @transform_2, window_bounds = array<i64: 1, 128>}, {pipeline_mode = #tpu.pipeline_mode<synchronous>, transform_indices = @transform_3, window_bounds = array<i64: 512, 64>}, {pipeline_mode = #tpu.pipeline_mode<synchronous>, transform_indices = @transform_4, window_bounds = array<i64: 1, 64>}, {pipeline_mode = #tpu.pipeline_mode<synchronous>, transform_indices = @transform_5, window_bounds = array<i64: 576, 64>}, {pipeline_mode = #tpu.pipeline_mode<synchronous>, transform_indices = @transform_6, window_bounds = array<i64: 1, 64>}, {transform_indices = @transform_7, window_bounds = array<i64: 1, 3, 3, 64>}]} {
    %c0 = arith.constant 0 : index
    %c0_0 = arith.constant 0 : index
    %c0_1 = arith.constant 0 : index
    %0 = vector.load %arg1[%c0, %c0_0, %c0_1] : memref<1x56x256xbf16, #tpu.memory_space<vmem>>, vector<1x42x256xbf16>
    %1 = vector.shape_cast %0 : vector<1x42x256xbf16> to vector<42x256xbf16>
    %c0_2 = arith.constant 0 : index
    %c0_3 = arith.constant 0 : index
    %c0_4 = arith.constant 0 : index
    %2 = vector.load %arg2[%c0_2, %c0_3, %c0_4] : memref<4x256x128xbf16, #tpu.memory_space<vmem>>, vector<1x256x128xbf16>
    %3 = vector.shape_cast %2 : vector<1x256x128xbf16> to vector<256x128xbf16>
    %cst = arith.constant dense<0.000000e+00> : vector<42x128xf32>
    %4 = tpu.matmul %1, %3, %cst {dimension_numbers = #tpu.dot_dimension_numbers<[1], [0], [0], [1], [0, 0, 1, 1], [], []>} : vector<42x256xbf16>, vector<256x128xbf16>, vector<42x128xf32> -> vector<42x128xf32>
    %c0_5 = arith.constant 0 : index
    %c1 = arith.constant 1 : index
    %c0_6 = arith.constant 0 : index
    %5 = vector.load %arg1[%c0_5, %c1, %c0_6] : memref<1x56x256xbf16, #tpu.memory_space<vmem>>, vector<1x42x256xbf16>
    %6 = vector.shape_cast %5 : vector<1x42x256xbf16> to vector<42x256xbf16>
    %c1_7 = arith.constant 1 : index
    %c0_8 = arith.constant 0 : index
    %c0_9 = arith.constant 0 : index
    %7 = vector.load %arg2[%c1_7, %c0_8, %c0_9] : memref<4x256x128xbf16, #tpu.memory_space<vmem>>, vector<1x256x128xbf16>
    %8 = vector.shape_cast %7 : vector<1x256x128xbf16> to vector<256x128xbf16>
    %cst_10 = arith.constant dense<0.000000e+00> : vector<42x128xf32>
    %9 = tpu.matmul %6, %8, %cst_10 {dimension_numbers = #tpu.dot_dimension_numbers<[1], [0], [0], [1], [0, 0, 1, 1], [], []>} : vector<42x256xbf16>, vector<256x128xbf16>, vector<42x128xf32> -> vector<42x128xf32>
    %10 = arith.addf %4, %9 : vector<42x128xf32>
    %c0_11 = arith.constant 0 : index
    %c7 = arith.constant 7 : index
    %c0_12 = arith.constant 0 : index
    %11 = vector.load %arg1[%c0_11, %c7, %c0_12] : memref<1x56x256xbf16, #tpu.memory_space<vmem>>, vector<1x42x256xbf16>
    %12 = vector.shape_cast %11 : vector<1x42x256xbf16> to vector<42x256xbf16>
    %c2 = arith.constant 2 : index
    %c0_13 = arith.constant 0 : index
    %c0_14 = arith.constant 0 : index
    %13 = vector.load %arg2[%c2, %c0_13, %c0_14] : memref<4x256x128xbf16, #tpu.memory_space<vmem>>, vector<1x256x128xbf16>
    %14 = vector.shape_cast %13 : vector<1x256x128xbf16> to vector<256x128xbf16>
    %cst_15 = arith.constant dense<0.000000e+00> : vector<42x128xf32>
    %15 = tpu.matmul %12, %14, %cst_15 {dimension_numbers = #tpu.dot_dimension_numbers<[1], [0], [0], [1], [0, 0, 1, 1], [], []>} : vector<42x256xbf16>, vector<256x128xbf16>, vector<42x128xf32> -> vector<42x128xf32>
    %16 = arith.addf %10, %15 : vector<42x128xf32>
    %c0_16 = arith.constant 0 : index
    %c8 = arith.constant 8 : index
    %c0_17 = arith.constant 0 : index
    %17 = vector.load %arg1[%c0_16, %c8, %c0_17] : memref<1x56x256xbf16, #tpu.memory_space<vmem>>, vector<1x42x256xbf16>
    %18 = vector.shape_cast %17 : vector<1x42x256xbf16> to vector<42x256xbf16>
    %c3 = arith.constant 3 : index
    %c0_18 = arith.constant 0 : index
    %c0_19 = arith.constant 0 : index
    %19 = vector.load %arg2[%c3, %c0_18, %c0_19] : memref<4x256x128xbf16, #tpu.memory_space<vmem>>, vector<1x256x128xbf16>
    %20 = vector.shape_cast %19 : vector<1x256x128xbf16> to vector<256x128xbf16>
    %cst_20 = arith.constant dense<0.000000e+00> : vector<42x128xf32>
    %21 = tpu.matmul %18, %20, %cst_20 {dimension_numbers = #tpu.dot_dimension_numbers<[1], [0], [0], [1], [0, 0, 1, 1], [], []>} : vector<42x256xbf16>, vector<256x128xbf16>, vector<42x128xf32> -> vector<42x128xf32>
    %22 = arith.addf %16, %21 : vector<42x128xf32>
    %c0_21 = arith.constant 0 : index
    %c0_22 = arith.constant 0 : index
    %23 = vector.load %arg3[%c0_21, %c0_22] : memref<1x128xf32, #tpu.memory_space<vmem>>, vector<1x128xf32>
    %24 = vector.broadcast %23 : vector<1x128xf32> to vector<42x128xf32>
    %25 = arith.addf %22, %24 : vector<42x128xf32>
    %cst_23 = arith.constant 0.000000e+00 : f32
    %26 = vector.broadcast %cst_23 : f32 to vector<42x128xf32>
    %27 = arith.maximumf %25, %26 : vector<42x128xf32>
    %28 = arith.truncf %27 : vector<42x128xf32> to vector<42x128xbf16>
    %c0_24 = arith.constant 0 : index
    %c0_25 = arith.constant 0 : index
    %29 = vector.load %arg9[%c0_24, %c0_25] : memref<43x128xbf16, #tpu.memory_space<vmem>>, vector<42x128xbf16>
    tpu.vector_store %arg9[%c0_24, %c0_25], %28 {strides = array<i32>} : memref<43x128xbf16, #tpu.memory_space<vmem>>, vector<42x128xbf16>,
    %cst_26 = arith.constant 0.000000e+00 : bf16
    %30 = vector.broadcast %cst_26 : bf16 to vector<1x128xbf16>
    %c42 = arith.constant 42 : index
    %c0_27 = arith.constant 0 : index
    %31 = vector.load %arg9[%c42, %c0_27] : memref<43x128xbf16, #tpu.memory_space<vmem>>, vector<1x128xbf16>
    tpu.vector_store %arg9[%c42, %c0_27], %30 {strides = array<i32>} : memref<43x128xbf16, #tpu.memory_space<vmem>>, vector<1x128xbf16>,
    %c0_28 = arith.constant 0 : index
    %c0_29 = arith.constant 0 : index
    %32 = vector.load %arg4[%c0_28, %c0_29] : memref<512x64xbf16, #tpu.memory_space<vmem>>, vector<128x64xbf16>
    %c0_30 = arith.constant 0 : index
    %c0_31 = arith.constant 0 : index
    %33 = vector.load %arg9[%c0_30, %c0_31] : memref<43x128xbf16, #tpu.memory_space<vmem>>, vector<35x128xbf16>
    %cst_32 = arith.constant dense<0.000000e+00> : vector<35x64xf32>
    %34 = tpu.matmul %33, %32, %cst_32 {dimension_numbers = #tpu.dot_dimension_numbers<[1], [0], [0], [1], [0, 0, 1, 1], [], []>} : vector<35x128xbf16>, vector<128x64xbf16>, vector<35x64xf32> -> vector<35x64xf32>
    %c128 = arith.constant 128 : index
    %c0_33 = arith.constant 0 : index
    %35 = vector.load %arg4[%c128, %c0_33] : memref<512x64xbf16, #tpu.memory_space<vmem>>, vector<128x64xbf16>
    %c1_34 = arith.constant 1 : index
    %c0_35 = arith.constant 0 : index
    %36 = vector.load %arg9[%c1_34, %c0_35] : memref<43x128xbf16, #tpu.memory_space<vmem>>, vector<35x128xbf16>
    %cst_36 = arith.constant dense<0.000000e+00> : vector<35x64xf32>
    %37 = tpu.matmul %36, %35, %cst_36 {dimension_numbers = #tpu.dot_dimension_numbers<[1], [0], [0], [1], [0, 0, 1, 1], [], []>} : vector<35x128xbf16>, vector<128x64xbf16>, vector<35x64xf32> -> vector<35x64xf32>
    %38 = arith.addf %34, %37 : vector<35x64xf32>
    %c256 = arith.constant 256 : index
    %c0_37 = arith.constant 0 : index
    %39 = vector.load %arg4[%c256, %c0_37] : memref<512x64xbf16, #tpu.memory_space<vmem>>, vector<128x64xbf16>
    %c7_38 = arith.constant 7 : index
    %c0_39 = arith.constant 0 : index
    %40 = vector.load %arg9[%c7_38, %c0_39] : memref<43x128xbf16, #tpu.memory_space<vmem>>, vector<35x128xbf16>
    %cst_40 = arith.constant dense<0.000000e+00> : vector<35x64xf32>
    %41 = tpu.matmul %40, %39, %cst_40 {dimension_numbers = #tpu.dot_dimension_numbers<[1], [0], [0], [1], [0, 0, 1, 1], [], []>} : vector<35x128xbf16>, vector<128x64xbf16>, vector<35x64xf32> -> vector<35x64xf32>
    %42 = arith.addf %38, %41 : vector<35x64xf32>
    %c384 = arith.constant 384 : index
    %c0_41 = arith.constant 0 : index
    %43 = vector.load %arg4[%c384, %c0_41] : memref<512x64xbf16, #tpu.memory_space<vmem>>, vector<128x64xbf16>
    %c8_42 = arith.constant 8 : index
    %c0_43 = arith.constant 0 : index
    %44 = vector.load %arg9[%c8_42, %c0_43] : memref<43x128xbf16, #tpu.memory_space<vmem>>, vector<35x128xbf16>
    %cst_44 = arith.constant dense<0.000000e+00> : vector<35x64xf32>
    %45 = tpu.matmul %44, %43, %cst_44 {dimension_numbers = #tpu.dot_dimension_numbers<[1], [0], [0], [1], [0, 0, 1, 1], [], []>} : vector<35x128xbf16>, vector<128x64xbf16>, vector<35x64xf32> -> vector<35x64xf32>
    %46 = arith.addf %42, %45 : vector<35x64xf32>
    %c0_45 = arith.constant 0 : index
    %c0_46 = arith.constant 0 : index
    %47 = vector.load %arg5[%c0_45, %c0_46] : memref<1x64xf32, #tpu.memory_space<vmem>>, vector<1x64xf32>
    %48 = vector.broadcast %47 : vector<1x64xf32> to vector<35x64xf32>
    %49 = arith.addf %46, %48 : vector<35x64xf32>
    %cst_47 = arith.constant 0.000000e+00 : f32
    %50 = vector.broadcast %cst_47 : f32 to vector<35x64xf32>
    %51 = arith.maximumf %49, %50 : vector<35x64xf32>
    %52 = arith.truncf %51 : vector<35x64xf32> to vector<35x64xbf16>
    %c0_48 = arith.constant 0 : index
    %c0_49 = arith.constant 0 : index
    %53 = vector.load %arg10[%c0_48, %c0_49] : memref<37x64xbf16, #tpu.memory_space<vmem>>, vector<35x64xbf16>
    tpu.vector_store %arg10[%c0_48, %c0_49], %52 {strides = array<i32>} : memref<37x64xbf16, #tpu.memory_space<vmem>>, vector<35x64xbf16>,
    %cst_50 = arith.constant 0.000000e+00 : bf16
    %54 = vector.broadcast %cst_50 : bf16 to vector<2x64xbf16>
    %c35 = arith.constant 35 : index
    %c0_51 = arith.constant 0 : index
    %55 = vector.load %arg10[%c35, %c0_51] : memref<37x64xbf16, #tpu.memory_space<vmem>>, vector<2x64xbf16>
    tpu.vector_store %arg10[%c35, %c0_51], %54 {strides = array<i32>} : memref<37x64xbf16, #tpu.memory_space<vmem>>, vector<2x64xbf16>,
    %c0_52 = arith.constant 0 : index
    %c0_53 = arith.constant 0 : index
    %56 = vector.load %arg6[%c0_52, %c0_53] : memref<576x64xbf16, #tpu.memory_space<vmem>>, vector<64x64xbf16>
    %c0_54 = arith.constant 0 : index
    %c0_55 = arith.constant 0 : index
    %57 = vector.load %arg10[%c0_54, %c0_55] : memref<37x64xbf16, #tpu.memory_space<vmem>>, vector<21x64xbf16>
    %cst_56 = arith.constant dense<0.000000e+00> : vector<21x64xf32>
    %58 = tpu.matmul %57, %56, %cst_56 {dimension_numbers = #tpu.dot_dimension_numbers<[1], [0], [0], [1], [0, 0, 1, 1], [], []>} : vector<21x64xbf16>, vector<64x64xbf16>, vector<21x64xf32> -> vector<21x64xf32>
    %c64 = arith.constant 64 : index
    %c0_57 = arith.constant 0 : index
    %59 = vector.load %arg6[%c64, %c0_57] : memref<576x64xbf16, #tpu.memory_space<vmem>>, vector<64x64xbf16>
    %c1_58 = arith.constant 1 : index
    %c0_59 = arith.constant 0 : index
    %60 = vector.load %arg10[%c1_58, %c0_59] : memref<37x64xbf16, #tpu.memory_space<vmem>>, vector<21x64xbf16>
    %cst_60 = arith.constant dense<0.000000e+00> : vector<21x64xf32>
    %61 = tpu.matmul %60, %59, %cst_60 {dimension_numbers = #tpu.dot_dimension_numbers<[1], [0], [0], [1], [0, 0, 1, 1], [], []>} : vector<21x64xbf16>, vector<64x64xbf16>, vector<21x64xf32> -> vector<21x64xf32>
    %62 = arith.addf %58, %61 : vector<21x64xf32>
    %c128_61 = arith.constant 128 : index
    %c0_62 = arith.constant 0 : index
    %63 = vector.load %arg6[%c128_61, %c0_62] : memref<576x64xbf16, #tpu.memory_space<vmem>>, vector<64x64xbf16>
    %c2_63 = arith.constant 2 : index
    %c0_64 = arith.constant 0 : index
    %64 = vector.load %arg10[%c2_63, %c0_64] : memref<37x64xbf16, #tpu.memory_space<vmem>>, vector<21x64xbf16>
    %cst_65 = arith.constant dense<0.000000e+00> : vector<21x64xf32>
    %65 = tpu.matmul %64, %63, %cst_65 {dimension_numbers = #tpu.dot_dimension_numbers<[1], [0], [0], [1], [0, 0, 1, 1], [], []>} : vector<21x64xbf16>, vector<64x64xbf16>, vector<21x64xf32> -> vector<21x64xf32>
    %66 = arith.addf %62, %65 : vector<21x64xf32>
    %c192 = arith.constant 192 : index
    %c0_66 = arith.constant 0 : index
    %67 = vector.load %arg6[%c192, %c0_66] : memref<576x64xbf16, #tpu.memory_space<vmem>>, vector<64x64xbf16>
    %c7_67 = arith.constant 7 : index
    %c0_68 = arith.constant 0 : index
    %68 = vector.load %arg10[%c7_67, %c0_68] : memref<37x64xbf16, #tpu.memory_space<vmem>>, vector<21x64xbf16>
    %cst_69 = arith.constant dense<0.000000e+00> : vector<21x64xf32>
    %69 = tpu.matmul %68, %67, %cst_69 {dimension_numbers = #tpu.dot_dimension_numbers<[1], [0], [0], [1], [0, 0, 1, 1], [], []>} : vector<21x64xbf16>, vector<64x64xbf16>, vector<21x64xf32> -> vector<21x64xf32>
    %70 = arith.addf %66, %69 : vector<21x64xf32>
    %c256_70 = arith.constant 256 : index
    %c0_71 = arith.constant 0 : index
    %71 = vector.load %arg6[%c256_70, %c0_71] : memref<576x64xbf16, #tpu.memory_space<vmem>>, vector<64x64xbf16>
    %c8_72 = arith.constant 8 : index
    %c0_73 = arith.constant 0 : index
    %72 = vector.load %arg10[%c8_72, %c0_73] : memref<37x64xbf16, #tpu.memory_space<vmem>>, vector<21x64xbf16>
    %cst_74 = arith.constant dense<0.000000e+00> : vector<21x64xf32>
    %73 = tpu.matmul %72, %71, %cst_74 {dimension_numbers = #tpu.dot_dimension_numbers<[1], [0], [0], [1], [0, 0, 1, 1], [], []>} : vector<21x64xbf16>, vector<64x64xbf16>, vector<21x64xf32> -> vector<21x64xf32>
    %74 = arith.addf %70, %73 : vector<21x64xf32>
    %c320 = arith.constant 320 : index
    %c0_75 = arith.constant 0 : index
    %75 = vector.load %arg6[%c320, %c0_75] : memref<576x64xbf16, #tpu.memory_space<vmem>>, vector<64x64xbf16>
    %c9 = arith.constant 9 : index
    %c0_76 = arith.constant 0 : index
    %76 = vector.load %arg10[%c9, %c0_76] : memref<37x64xbf16, #tpu.memory_space<vmem>>, vector<21x64xbf16>
    %cst_77 = arith.constant dense<0.000000e+00> : vector<21x64xf32>
    %77 = tpu.matmul %76, %75, %cst_77 {dimension_numbers = #tpu.dot_dimension_numbers<[1], [0], [0], [1], [0, 0, 1, 1], [], []>} : vector<21x64xbf16>, vector<64x64xbf16>, vector<21x64xf32> -> vector<21x64xf32>
    %78 = arith.addf %74, %77 : vector<21x64xf32>
    %c384_78 = arith.constant 384 : index
    %c0_79 = arith.constant 0 : index
    %79 = vector.load %arg6[%c384_78, %c0_79] : memref<576x64xbf16, #tpu.memory_space<vmem>>, vector<64x64xbf16>
    %c14 = arith.constant 14 : index
    %c0_80 = arith.constant 0 : index
    %80 = vector.load %arg10[%c14, %c0_80] : memref<37x64xbf16, #tpu.memory_space<vmem>>, vector<21x64xbf16>
    %cst_81 = arith.constant dense<0.000000e+00> : vector<21x64xf32>
    %81 = tpu.matmul %80, %79, %cst_81 {dimension_numbers = #tpu.dot_dimension_numbers<[1], [0], [0], [1], [0, 0, 1, 1], [], []>} : vector<21x64xbf16>, vector<64x64xbf16>, vector<21x64xf32> -> vector<21x64xf32>
    %82 = arith.addf %78, %81 : vector<21x64xf32>
    %c448 = arith.constant 448 : index
    %c0_82 = arith.constant 0 : index
    %83 = vector.load %arg6[%c448, %c0_82] : memref<576x64xbf16, #tpu.memory_space<vmem>>, vector<64x64xbf16>
    %c15 = arith.constant 15 : index
    %c0_83 = arith.constant 0 : index
    %84 = vector.load %arg10[%c15, %c0_83] : memref<37x64xbf16, #tpu.memory_space<vmem>>, vector<21x64xbf16>
    %cst_84 = arith.constant dense<0.000000e+00> : vector<21x64xf32>
    %85 = tpu.matmul %84, %83, %cst_84 {dimension_numbers = #tpu.dot_dimension_numbers<[1], [0], [0], [1], [0, 0, 1, 1], [], []>} : vector<21x64xbf16>, vector<64x64xbf16>, vector<21x64xf32> -> vector<21x64xf32>
    %86 = arith.addf %82, %85 : vector<21x64xf32>
    %c512 = arith.constant 512 : index
    %c0_85 = arith.constant 0 : index
    %87 = vector.load %arg6[%c512, %c0_85] : memref<576x64xbf16, #tpu.memory_space<vmem>>, vector<64x64xbf16>
    %c16 = arith.constant 16 : index
    %c0_86 = arith.constant 0 : index
    %88 = vector.load %arg10[%c16, %c0_86] : memref<37x64xbf16, #tpu.memory_space<vmem>>, vector<21x64xbf16>
    %cst_87 = arith.constant dense<0.000000e+00> : vector<21x64xf32>
    %89 = tpu.matmul %88, %87, %cst_87 {dimension_numbers = #tpu.dot_dimension_numbers<[1], [0], [0], [1], [0, 0, 1, 1], [], []>} : vector<21x64xbf16>, vector<64x64xbf16>, vector<21x64xf32> -> vector<21x64xf32>
    %90 = arith.addf %86, %89 : vector<21x64xf32>
    %c0_88 = arith.constant 0 : index
    %c0_89 = arith.constant 0 : index
    %91 = vector.load %arg7[%c0_88, %c0_89] : memref<1x64xf32, #tpu.memory_space<vmem>>, vector<1x64xf32>
    %92 = vector.broadcast %91 : vector<1x64xf32> to vector<21x64xf32>
    %93 = arith.addf %90, %92 : vector<21x64xf32>
    %cst_90 = arith.constant 0.000000e+00 : f32
    %94 = vector.broadcast %cst_90 : f32 to vector<21x64xf32>
    %95 = arith.maximumf %93, %94 : vector<21x64xf32>
    %96 = arith.truncf %95 : vector<21x64xf32> to vector<21x64xbf16>
    %97 = vector.extract_strided_slice %96 {offsets = [0, 0], sizes = [3, 64], strides = [1, 1]} : vector<21x64xbf16> to vector<3x64xbf16>
    %c0_91 = arith.constant 0 : index
    %c0_92 = arith.constant 0 : index
    %c0_93 = arith.constant 0 : index
    %c0_94 = arith.constant 0 : index
    %98 = vector.load %arg8[%c0_91, %c0_92, %c0_93, %c0_94] : memref<1x3x3x64xbf16, #tpu.memory_space<vmem>>, vector<1x1x3x64xbf16>
    %99 = vector.shape_cast %98 : vector<1x1x3x64xbf16> to vector<3x64xbf16>
    %100 = vector.shape_cast %97 : vector<3x64xbf16> to vector<1x1x3x64xbf16>
    tpu.vector_store %arg8[%c0_91, %c0_92, %c0_93, %c0_94], %100 {strides = array<i32>} : memref<1x3x3x64xbf16, #tpu.memory_space<vmem>>, vector<1x1x3x64xbf16>,
    %101 = vector.extract_strided_slice %96 {offsets = [7, 0], sizes = [3, 64], strides = [1, 1]} : vector<21x64xbf16> to vector<3x64xbf16>
    %c0_95 = arith.constant 0 : index
    %c1_96 = arith.constant 1 : index
    %c0_97 = arith.constant 0 : index
    %c0_98 = arith.constant 0 : index
    %102 = vector.load %arg8[%c0_95, %c1_96, %c0_97, %c0_98] : memref<1x3x3x64xbf16, #tpu.memory_space<vmem>>, vector<1x1x3x64xbf16>
    %103 = vector.shape_cast %102 : vector<1x1x3x64xbf16> to vector<3x64xbf16>
    %104 = vector.shape_cast %101 : vector<3x64xbf16> to vector<1x1x3x64xbf16>
    tpu.vector_store %arg8[%c0_95, %c1_96, %c0_97, %c0_98], %104 {strides = array<i32>} : memref<1x3x3x64xbf16, #tpu.memory_space<vmem>>, vector<1x1x3x64xbf16>,
    %105 = vector.extract_strided_slice %96 {offsets = [14, 0], sizes = [3, 64], strides = [1, 1]} : vector<21x64xbf16> to vector<3x64xbf16>
    %c0_99 = arith.constant 0 : index
    %c2_100 = arith.constant 2 : index
    %c0_101 = arith.constant 0 : index
    %c0_102 = arith.constant 0 : index
    %106 = vector.load %arg8[%c0_99, %c2_100, %c0_101, %c0_102] : memref<1x3x3x64xbf16, #tpu.memory_space<vmem>>, vector<1x1x3x64xbf16>
    %107 = vector.shape_cast %106 : vector<1x1x3x64xbf16> to vector<3x64xbf16>
    %108 = vector.shape_cast %105 : vector<3x64xbf16> to vector<1x1x3x64xbf16>
    tpu.vector_store %arg8[%c0_99, %c2_100, %c0_101, %c0_102], %108 {strides = array<i32>} : memref<1x3x3x64xbf16, #tpu.memory_space<vmem>>, vector<1x1x3x64xbf16>,
    return
  }
  func.func @transform_0(%arg0: i32) -> (i32, i32, i32) {
    %c0_i32 = arith.constant 0 : i32
    %c0_i32_0 = arith.constant 0 : i32
    %c0_i32_1 = arith.constant 0 : i32
    return %arg0, %c0_i32, %c0_i32_0 : i32, i32, i32
  }
  func.func @transform_1(%arg0: i32) -> (i32, i32, i32) {
    %c0_i32 = arith.constant 0 : i32
    %c0_i32_0 = arith.constant 0 : i32
    %c0_i32_1 = arith.constant 0 : i32
    %c0_i32_2 = arith.constant 0 : i32
    return %c0_i32, %c0_i32_0, %c0_i32_1 : i32, i32, i32
  }
  func.func @transform_2(%arg0: i32) -> (i32, i32) {
    %c0_i32 = arith.constant 0 : i32
    %c0_i32_0 = arith.constant 0 : i32
    %c0_i32_1 = arith.constant 0 : i32
    return %c0_i32, %c0_i32_0 : i32, i32
  }
  func.func @transform_3(%arg0: i32) -> (i32, i32) {
    %c0_i32 = arith.constant 0 : i32
    %c0_i32_0 = arith.constant 0 : i32
    %c0_i32_1 = arith.constant 0 : i32
    return %c0_i32, %c0_i32_0 : i32, i32
  }
  func.func @transform_4(%arg0: i32) -> (i32, i32) {
    %c0_i32 = arith.constant 0 : i32
    %c0_i32_0 = arith.constant 0 : i32
    %c0_i32_1 = arith.constant 0 : i32
    return %c0_i32, %c0_i32_0 : i32, i32
  }
  func.func @transform_5(%arg0: i32) -> (i32, i32) {
    %c0_i32 = arith.constant 0 : i32
    %c0_i32_0 = arith.constant 0 : i32
    %c0_i32_1 = arith.constant 0 : i32
    return %c0_i32, %c0_i32_0 : i32, i32
  }
  func.func @transform_6(%arg0: i32) -> (i32, i32) {
    %c0_i32 = arith.constant 0 : i32
    %c0_i32_0 = arith.constant 0 : i32
    %c0_i32_1 = arith.constant 0 : i32
    return %c0_i32, %c0_i32_0 : i32, i32
  }
  func.func @transform_7(%arg0: i32) -> (i32, i32, i32, i32) {
    %c0_i32 = arith.constant 0 : i32
    %c0_i32_0 = arith.constant 0 : i32
    %c0_i32_1 = arith.constant 0 : i32
    %c0_i32_2 = arith.constant 0 : i32
    return %arg0, %c0_i32, %c0_i32_0, %c0_i32_1 : i32, i32, i32, i32
  }
}

module attributes {stable_mosaic.version = 11 : i64} {
  func.func @_fc_dueling_kernel(%arg0: memref<2x576xbf16, #tpu.memory_space<vmem>>, %arg1: memref<576x1024xbf16, #tpu.memory_space<vmem>>, %arg2: memref<1x1024xf32, #tpu.memory_space<vmem>>, %arg3: memref<1024x7xbf16, #tpu.memory_space<vmem>>, %arg4: memref<1x7xf32, #tpu.memory_space<vmem>>, %arg5: memref<2x6xf32, #tpu.memory_space<vmem>>) attributes {dimension_semantics = [], scalar_prefetch = 0 : i64, scratch_operands = 0 : i64, tpu.core_type = #tpu.core_type<tc>} {
    %c0 = arith.constant 0 : index
    %c0_0 = arith.constant 0 : index
    %0 = vector.load %arg0[%c0, %c0_0] : memref<2x576xbf16, #tpu.memory_space<vmem>>, vector<2x576xbf16>
    %c0_1 = arith.constant 0 : index
    %c0_2 = arith.constant 0 : index
    %1 = vector.load %arg1[%c0_1, %c0_2] : memref<576x1024xbf16, #tpu.memory_space<vmem>>, vector<576x1024xbf16>
    %cst = arith.constant dense<0.000000e+00> : vector<2x1024xf32>
    %2 = tpu.matmul %0, %1, %cst {dimension_numbers = #tpu.dot_dimension_numbers<[1], [0], [0], [1], [0, 0, 1, 1], [], []>} : vector<2x576xbf16>, vector<576x1024xbf16>, vector<2x1024xf32> -> vector<2x1024xf32>
    %c0_3 = arith.constant 0 : index
    %c0_4 = arith.constant 0 : index
    %3 = vector.load %arg2[%c0_3, %c0_4] : memref<1x1024xf32, #tpu.memory_space<vmem>>, vector<1x1024xf32>
    %4 = vector.broadcast %3 : vector<1x1024xf32> to vector<2x1024xf32>
    %5 = arith.addf %2, %4 : vector<2x1024xf32>
    %cst_5 = arith.constant 0.000000e+00 : f32
    %6 = vector.broadcast %cst_5 : f32 to vector<2x1024xf32>
    %7 = arith.maximumf %5, %6 : vector<2x1024xf32>
    %8 = arith.truncf %7 : vector<2x1024xf32> to vector<2x1024xbf16>
    %c0_6 = arith.constant 0 : index
    %c0_7 = arith.constant 0 : index
    %9 = vector.load %arg3[%c0_6, %c0_7] : memref<1024x7xbf16, #tpu.memory_space<vmem>>, vector<1024x7xbf16>
    %cst_8 = arith.constant dense<0.000000e+00> : vector<2x7xf32>
    %10 = tpu.matmul %8, %9, %cst_8 {dimension_numbers = #tpu.dot_dimension_numbers<[1], [0], [0], [1], [0, 0, 1, 1], [], []>} : vector<2x1024xbf16>, vector<1024x7xbf16>, vector<2x7xf32> -> vector<2x7xf32>
    %c0_9 = arith.constant 0 : index
    %c0_10 = arith.constant 0 : index
    %11 = vector.load %arg4[%c0_9, %c0_10] : memref<1x7xf32, #tpu.memory_space<vmem>>, vector<1x7xf32>
    %12 = vector.broadcast %11 : vector<1x7xf32> to vector<2x7xf32>
    %13 = arith.addf %10, %12 : vector<2x7xf32>
    %14 = vector.extract_strided_slice %13 {offsets = [0, 0], sizes = [2, 6], strides = [1, 1]} : vector<2x7xf32> to vector<2x6xf32>
    %15 = vector.extract_strided_slice %13 {offsets = [0, 6], sizes = [2, 1], strides = [1, 1]} : vector<2x7xf32> to vector<2x1xf32>
    %16 = vector.shape_cast %14 : vector<2x6xf32> to vector<1x2x6xf32>
    %cst_11 = arith.constant dense<0.000000e+00> : vector<1xf32>
    %17 = vector.multi_reduction <add>, %16, %cst_11 [1, 2] : vector<1x2x6xf32> to vector<1xf32>
    %18 = vector.shape_cast %17 : vector<1xf32> to vector<1x1x1xf32>
    %19 = vector.extract %18[0, 0, 0] : f32 from vector<1x1x1xf32>
    %cst_12 = arith.constant 0.0833333358 : f32
    %20 = arith.mulf %19, %cst_12 : f32
    %21 = vector.broadcast %15 : vector<2x1xf32> to vector<2x6xf32>
    %22 = arith.addf %21, %14 : vector<2x6xf32>
    %23 = vector.broadcast %20 : f32 to vector<2x6xf32>
    %24 = arith.subf %22, %23 : vector<2x6xf32>
    %c0_13 = arith.constant 0 : index
    %c0_14 = arith.constant 0 : index
    %25 = vector.load %arg5[%c0_13, %c0_14] : memref<2x6xf32, #tpu.memory_space<vmem>>, vector<2x6xf32>
    tpu.vector_store %arg5[%c0_13, %c0_14], %24 {strides = array<i32>} : memref<2x6xf32, #tpu.memory_space<vmem>>, vector<2x6xf32>,
    return
  }
}

</mosaic_0001>

<bundles_post_ra>
// kernel: dueling_dqn_forward.2
= control target key start
LH: loop header
LB: loop body
LE: loop exit
PB: predicated region body
PF: predicated region fallthrough
CT: control target
= control target key end

     0   :  { %s4045_s24 = smov 0   ;;  %s4708_s0 = inlined_call_operand.vmem [shape: bf16[2,56,256], index: 0, kind: input, shape index: {}]   ;;  %s4709_s1 = inlined_call_operand.vmem [shape: bf16[4,256,128], index: 1, kind: input, shape index: {}]   ;;  %s4710_s2 = inlined_call_operand.vmem [shape: f32[1,128], index: 2, kind: input, shape index: {}]   ;;  %s4711_s3 = inlined_call_operand.vmem [shape: bf16[512,64], index: 3, kind: input, shape index: {}]   ;;  %s4712_s4 = inlined_call_operand.vmem [shape: f32[1,64], index: 4, kind: input, shape index: {}]   ;;  %s4713_s5 = inlined_call_operand.vmem [shape: bf16[576,64], index: 5, kind: input, shape index: {}]   ;;  %s4714_s6 = inlined_call_operand.vmem [shape: f32[1,64], index: 6, kind: input, shape index: {}]   ;;  %s4715_s7 = inlined_call_operand.vmem [shape: bf16[2,3,3,64], index: 7, kind: output, shape index: {}]  }
   0x1 LB: > { %s3013_s25 = sadd.s32 4294967295, %s4000_s24   ;;  %p3017_p0 = scmp.ge.s32.totalorder %s4000_s24, 1  ;;  %s4000_s24 = sphi %s4045_s24, %s17_s24  }
   0x2   : > { %p237_p1 = scmp.lt.s32.totalorder %s4000_s24, 3 }
   0x4   : > { %p238_p2 = pnand %p3017_p0, %p237_p1 }
   0x5   : > { %p269_p3 = scmp.lt.s32.totalorder (!%p238_p2), %s3013_s25, 1 }
   0x6   : > { %241 = sbr.rel (%p238_p2) target bundleno = 848 (0x350), region = 48 }
   0xb   : > { %v3821_v0 = vld [vmem:[%s4709_s1 + $0xf8] sm:$0xff]   ;;  %v3825_v4 = vld [vmem:[%s4709_s1 + $0xf0] sm:$0xff]   ;;  %v3829_v8 = vld [vmem:[%s4709_s1 + $0xe8] sm:$0xff]   ;;  %s4721_s25 = smov (!%p269_p3, %s3013_s25), 1  ;;  %vm376_vm0 = vsmask.f32 7424 }
   0xc   : > { %v3822_v1 = vld [vmem:[%s4709_s1 + $0x78] sm:$0xff]   ;;  %3354 = vmatprep.subr.bf16.mxu0 %v3821_v0  ;;  %v3826_v5 = vld [vmem:[%s4709_s1 + $0x70] sm:$0xff]   ;;  %v3830_v9 = vld [vmem:[%s4709_s1 + $0x68] sm:$0xff]   ;;  %s3808_s13 = smul.u32 56, %s4721_s25  ;;  %vm815_vm1 = vsmask.f32 4352 }
   0xd   : > { %v3823_v2 = vld [vmem:[%s4709_s1 + $0xb8] sm:$0xff]   ;;  %3388 = vmatprep.subr.bf16.mxu1 %v3822_v1  ;;  %v3827_v6 = vld [vmem:[%s4709_s1 + $0xb0] sm:$0xff]   ;;  %v3831_v10 = vld [vmem:[%s4709_s1 + $0xa8] sm:$0xff]   ;;  %vm4003_vm2 = vmmov 0   ;;  %vm1296_vm3 = vcmask 1041409   ;;  %vm1936_vm6 = vcmask 519168  }
   0xe   : > { %v3824_v3 = vld [vmem:[%s4709_s1 + $0x38] sm:$0xff]   ;;  %3355 = vmatpush3.bf16.msra.mxu0 %v3823_v2  ;;  %v3828_v7 = vld [vmem:[%s4709_s1 + $0x30] sm:$0xff]   ;;  %v3832_v11 = vld [vmem:[%s4709_s1 + $0x28] sm:$0xff]   ;;  %s4153_s26 = scalar_lea.vmem %s4708_s0, %s3808_s13  ;;  %vm1297_vm4 = vsmask.f32 1280  ;;  %vm1941_vm7 = vcmask 517120  }
   0xf   : > { %3389 = vmatpush3.bf16.msra.mxu1 %v3824_v3  ;;  %3356 = vmatprep.subr.bf16.mxu0 %v3825_v4  ;;  %v3833_v12 = vld [vmem:[%s4709_s1 + $0xe0] sm:$0xff]   ;;  %v3837_v16 = vld [vmem:[%s4709_s1 + $0xd8] sm:$0xff]   ;;  %v3841_v20 = vld [vmem:[%s4709_s1 + $0xd0] sm:$0xff]   ;;  %vm2018_vm8 = vcmask 523264   ;;  %vm1946_vm10 = vcmask 518145   ;;  %vm2165_vm12 = vcmask 1046528  }
  0x10   : > { %3390 = vmatprep.subr.bf16.mxu1 %v3826_v5  ;;  %v3834_v13 = vld [vmem:[%s4709_s1 + $0x60] sm:$0xff]   ;;  %v3838_v17 = vld [vmem:[%s4709_s1 + $0x58] sm:$0xff]   ;;  %v3842_v21 = vld [vmem:[%s4709_s1 + $0x50] sm:$0xff]   ;;  %vm1947_vm11 = vsmask.f32 2310  ;;  %vm2588_vm14 = vcmask 1044480  }
  0x11   : > { %v3835_v14 = vld [vmem:[%s4709_s1 + $0xa0] sm:$0xff]   ;;  %v3839_v18 = vld [vmem:[%s4709_s1 + $0x98] sm:$0xff]   ;;  %v3843_v22 = vld [vmem:[%s4709_s1 + $0x90] sm:$0xff]   ;;  %s3809_s30 = smul.u32 6, %s4721_s25  ;;  %vm2942_vm15 = vcmask 1040384  }
  0x12   : > { %3357 = vmatpush3.bf16.msra.mxu0 %v3827_v6  ;;  %v3836_v15 = vld [vmem:[%s4709_s1 + $0x20] sm:$0xff]   ;;  %v3840_v19 = vld [vmem:[%s4709_s1 + $0x18] sm:$0xff]   ;;  %v3844_v23 = vld [vmem:[%s4709_s1 + $0x10] sm:$0xff]  }
  0x13   : > { %3391 = vmatpush3.bf16.msra.mxu1 %v3828_v7  ;;  %3358 = vmatprep.subr.bf16.mxu0 %v3829_v8  ;;  %v3845_v24 = vld [vmem:[%s4709_s1 + $0xc8] sm:$0xff]   ;;  %v3849_v28 = vld [vmem:[%s4709_s1 + $0xc0] sm:$0xff]   ;;  %v4166_v34 = vld [vmem:[%s4153_s26 + $0x10] sm:$0xff]  ;;  %s4691_s10 = scalar_lea.vmem %s4715_s7, %s3809_s30 }
  0x14   : > { %3392 = vmatprep.subr.bf16.mxu1 %v3830_v9  ;;  %v3846_v25 = vld [vmem:[%s4709_s1 + $0x48] sm:$0xff]   ;;  %v3850_v29 = vld [vmem:[%s4709_s1 + $0x40] sm:$0xff]   ;;  %v4169_v35 = vld [vmem:[%s4153_s26 + $0x18] sm:$0xff] }
  0x15   : > { %v3847_v26 = vld [vmem:[%s4709_s1 + $0x88] sm:$0xff]   ;;  %v3851_v30 = vld [vmem:[%s4709_s1 + $0x80] sm:$0xff]   ;;  %v4175_v38 = vcombine.high %v4166_v34, %v4169_v35  ;;  %v4179_v39 = vcombine.low %v4166_v34, %v4169_v35  ;;  %v3857_v40 = vld [vmem:[%s4709_s1 + $0x178] sm:$0xff]  }
  0x16   : > { %3359 = vmatpush3.bf16.msra.mxu0 %v3831_v10  ;;  %v3848_v27 = vld [vmem:[%s4709_s1 + $0x8] sm:$0xff]   ;;  %v3852_v31 = vld [vmem:[%s4709_s1] sm:$0xff]   ;;  %v3858_v45 = vld [vmem:[%s4709_s1 + $0x1f8] sm:$0xff]  }
  0x17   : > { %3393 = vmatpush3.bf16.msra.mxu1 %v3832_v11  ;;  %3360 = vmatprep.subr.bf16.mxu0 %v3833_v12  ;;  %v280_v32 = vld [vmem:[%s4153_s26] sm:$0xff]  ;;  %v4163_v33 = vld [vmem:[%s4153_s26 + $0x8] sm:$0xff]  ;;  %v397_v46 = vshll.u32 %v4175_v38, 16  ;;  %v385_v47 = vshll.u32 %v4179_v39, 16  ;;  %v3859_v52 = vld [vmem:[%s4709_s1 + $0x138] sm:$0xff]   ;;  %v409_v61 = vshrl.u32 %v4175_v38, 16 }
  0x18   : > { %3394 = vmatprep.subr.bf16.mxu1 %v3834_v13  ;;  %v3053_v36 = vcombine.high %v280_v32, %v4163_v33  ;;  %v3052_v37 = vcombine.low %v280_v32, %v4163_v33  ;;  %v3860_v53 = vld [vmem:[%s4709_s1 + $0x1b8] sm:$0xff]   ;;  %v3862_v56 = vld [vmem:[%s4709_s1 + $0x1f0] sm:$0xff]   ;;  %v401_v63 = vshrl.u32 %v4179_v39, 16  ;;  %v3866_v0 = vld [vmem:[%s4709_s1 + $0x1e8] sm:$0xff]  }
  0x19   : > { %v399_v50 = vrot.slane %v397_v46, 1  ;;  %v387_v51 = vrot.slane %v385_v47, 1  ;;  %v3861_v59 = vld [vmem:[%s4709_s1 + $0x170] sm:$0xff]   ;;  %v4220_v1 = vld [vmem:[%s4153_s26 + $0x20] sm:$0xff]  ;;  %v318_v2 = vld [vmem:[%s4153_s26 + $0x28] sm:$0x33] }
  0x1a   : > { %3361 = vmatpush3.bf16.msra.mxu0 %v3835_v14  ;;  %v390_v41 = vshrl.u32 %v3053_v36, 16  ;;  %v392_v42 = vshll.u32 %v3053_v36, 16  ;;  %721 = vmatprep.mubr.bf16.mxu1 %v3053_v36  ;;  %v378_v43 = vshrl.u32 %v3052_v37, 16  ;;  %v380_v44 = vshll.u32 %v3052_v37, 16  ;;  %v3864_v60 = vld [vmem:[%s4709_s1 + $0x1b0] sm:$0xff]   ;;  %v3865_v3 = vld [vmem:[%s4709_s1 + $0x168] sm:$0xff]   ;;  %vm1298_vm5 = vmand %vm1296_vm3, %vm1297_vm4 }
  0x1b   : > { %3395 = vmatpush3.bf16.msra.mxu1 %v3836_v15  ;;  %3362 = vmatprep.subr.bf16.mxu0 %v3837_v16  ;;  %v3863_v62 = vld [vmem:[%s4709_s1 + $0x130] sm:$0xff]   ;;  %v3057_v4 = vcombine.high %v4220_v1, %v318_v2  ;;  %v3056_v5 = vcombine.low %v4220_v1, %v318_v2  ;;  %v3869_v6 = vld [vmem:[%s4709_s1 + $0x1a8] sm:$0xff]   ;;  %v411_v7 = vor.u32 %v409_v61, %v399_v50  ;;  %v3871_v15 = vld [vmem:[%s4709_s1 + $0x160] sm:$0xff]  }
  0x1c   : > { %3396 = vmatprep.subr.bf16.mxu1 %v3838_v17  ;;  %v394_v48 = vrot.slane %v392_v42, 1  ;;  %v382_v49 = vrot.slane %v380_v44, 1  ;;  %v403_v9 = vor.u32 %v401_v63, %v387_v51  ;;  %v3868_v11 = vld [vmem:[%s4709_s1 + $0x128] sm:$0xff]   ;;  %v3872_v16 = vld [vmem:[%s4709_s1 + $0x1e0] sm:$0xff]   ;;  %v3882_v36 = vld [vmem:[%s4709_s1 + $0x1d0] sm:$0xff]  }
  0x1d   : > { %v413_v8 = vshll.u32 %v3057_v4, 16  ;;  %v405_v10 = vshll.u32 %v3056_v5, 16  ;;  %v420_v12 = vshrl.u32 %v3057_v4, 16  ;;  %v3873_v17 = vld [vmem:[%s4709_s1 + $0x120] sm:$0xff]   ;;  %v3886_v42 = vld [vmem:[%s4709_s1 + $0x1c8] sm:$0xff]   ;;  %vm4537_vm9 = vmand %vm1941_vm7, %vm1297_vm4  ;;  %vm2945_vm4 = vcmask 1044484  }
  0x1e   : > { %3363 = vmatpush3.bf16.msra.mxu0 %v3839_v18  ;;  %v395_v54 = vor.u32 %v394_v48, %v390_v41  ;;  %v383_v55 = vor.u32 %v382_v49, %v378_v43  ;;  %v3885_v41 = vld [vmem:[%s4709_s1 + $0x148] sm:$0xff]   ;;  %v844_v43 = vrot.slane %v409_v61, 3  ;;  %v827_v49 = vrot.slane %v401_v63, 3  ;;  %vm4566_vm13 = vmand %vm1946_vm10, %vm1947_vm11 }
  0x1f   : > { %3397 = vmatpush3.bf16.msra.mxu1 %v3840_v19  ;;  %3364 = vmatprep.subr.bf16.mxu0 %v3841_v20  ;;  %v415_v13 = vrot.slane %v413_v8, 1  ;;  %v407_v14 = vrot.slane %v405_v10, 1  ;;  %v3874_v20 = vld [vmem:[%s4709_s1 + $0x1a0] sm:$0xff]   ;;  %v3887_v44 = vld [vmem:[%s4709_s1 + $0x108] sm:$0xff]   ;;  %vm2913_vm11 = vsmask.f32 6424 }
  0x20   : > { %3398 = vmatprep.subr.bf16.mxu1 %v3842_v21  ;;  %v400_v57 = vsel %vm376_vm0, %v395_v54, %v399_v50  ;;  %v388_v58 = vsel %vm376_vm0, %v383_v55, %v387_v51  ;;  %v3888_v48 = vld [vmem:[%s4709_s1 + $0x188] sm:$0xff]   ;;  %v3889_v50 = vld [vmem:[%s4709_s1 + $0x140] sm:$0xff]   ;;  %v830_v51 = vrot.slane %v385_v47, 4  ;;  %v3180_v47 = vcombine.low %v4163_v33, %v4166_v34 }
  0x21   : > { %557 = vmatprep.mubr.bf16.mxu0 %v400_v57  ;;  %v416_v18 = vsel %vm376_vm0, %v411_v7, %v415_v13  ;;  %v408_v19 = vsel %vm376_vm0, %v403_v9, %v407_v14  ;;  %v422_v21 = vor.u32 %v420_v12, %v415_v13  ;;  %v751_v57 = vld [vmem:[%s4153_s26 + $0x28] sm:$0xff] }
  0x22   : > { %3365 = vmatpush3.bf16.msra.mxu0 %v3843_v22  ;;  %v3875_v22 = vld [vmem:[%s4709_s1 + $0x158] sm:$0xff]   ;;  %v3128_v61 = vcombine.low %v4220_v1, %v751_v57 }
  0x23   : > { %3399 = vmatpush3.bf16.msra.mxu1 %v3844_v23  ;;  %3366 = vmatprep.subr.bf16.mxu0 %v3845_v24  ;;  %v3876_v23 = vld [vmem:[%s4709_s1 + $0x1d8] sm:$0xff]   ;;  %v285_v24 = vld [vmem:[%s4153_s26 + $0x28] sm:$0x11] }
  0x24   : > { %3400 = vmatprep.subr.bf16.mxu1 %v3846_v25  ;;  %v417_v25 = vshrl.u32 %v3056_v5, 16  ;;  %v851_v5 = vshrl.u32 %v3128_v61, 16 }
  0x26   : > { %3367 = vmatpush3.bf16.msra.mxu0 %v3847_v26  ;;  %v3075_v26 = vcombine.high %v4220_v1, %v285_v24  ;;  %v419_v32 = vor.u32 %v417_v25, %v407_v14  ;;  %v853_v13 = vrot.slane %v851_v5, 3  ;;  %v3182_v25 = vcombine.low %v4169_v35, %v4220_v1 }
  0x27   : > { %3401 = vmatpush3.bf16.msra.mxu1 %v3848_v27  ;;  %3368 = vmatprep.subr.bf16.mxu0 %v3849_v28  ;;  %v3878_v27 = vld [vmem:[%s4709_s1 + $0x118] sm:$0xff]   ;;  %v3074_v28 = vcombine.low %v4220_v1, %v285_v24 }
  0x28   : > { %3402 = vmatprep.subr.bf16.mxu1 %v3850_v29  ;;  %v3181_v29 = vcombine.high %v4163_v33, %v4166_v34 }
  0x2a   : > { %3369 = vmatpush3.bf16.msra.mxu0 %v3851_v30  ;;  %v3879_v30 = vld [vmem:[%s4709_s1 + $0x198] sm:$0xff]  }
  0x2b   : > { %3403 = vmatpush3.bf16.msra.mxu1 %v3852_v31  ;;  %3422 = vmatprep.subr.bf16.mxu0 %v3857_v40  ;;  %v3881_v31 = vld [vmem:[%s4709_s1 + $0x150] sm:$0xff]  }
  0x2c   : > { %3456 = vmatprep.subr.bf16.mxu1 %v3858_v45  ;;  %v3884_v40 = vld [vmem:[%s4709_s1 + $0x190] sm:$0xff]   ;;  %v847_v45 = vrot.slane %v397_v46, 4  ;;  %v3891_v46 = vld [vmem:[%s4709_s1 + $0x100] sm:$0xff]  }
  0x2d   : > { %558 = vmatmul.mubr.bf16.vlgmr.msra.gmra.mxu0 %v388_v58  ;;  %v3183_v58 = vcombine.high %v4169_v35, %v4220_v1  ;;  %v3905_v35 = vld [vmem:[%s4711_s3 + $0x38] sm:$0xff]  }
  0x2e   : > { %722 = vmatmul.mubr.bf16.vlgmr.msra.gmra.mxu1 %v3052_v37  ;;  %3423 = vmatpush3.bf16.msra.mxu0 %v3859_v52  ;;  %v3883_v37 = vld [vmem:[%s4709_s1 + $0x110] sm:$0xff]   ;;  %v3892_v52 = vld [vmem:[%s4709_s1 + $0x180] sm:$0xff]  }
  0x2f   : > { %729 = vmatprep.mubr.bf16.mxu1 %v4175_v38  ;;  %3457 = vmatpush3.bf16.msra.mxu1 %v3860_v53  ;;  %v3890_v38 = vld [vmem:[%s4709_s1 + $0x1c0] sm:$0xff]   ;;  %v848_v53 = vor.u32 %v847_v45, %v844_v43  ;;  %v3912_v43 = vld [vmem:[%s4711_s3 + $0x10] sm:$0xff]   ;;  %v3914_v45 = vld [vmem:[%s4711_s3 + $0x8] sm:$0xff]  }
  0x30   : > { %3458 = vmatprep.subr.bf16.mxu1 %v3862_v56  ;;  %3424 = vmatprep.subr.bf16.mxu0 %v3861_v59  ;;  %v831_v56 = vor.u32 %v830_v51, %v827_v49  ;;  %v752_v59 = vld [vmem:[%s4153_s26 + $0x30] sm:$0x11]  ;;  %v3916_v49 = vld [vmem:[%s4711_s3] sm:$0xff]  }
  0x31   : > { %565 = vmatprep.mubr.bf16.mxu0 %v416_v18  ;;  %v3130_v63 = vcombine.low %v752_v59, %v752_v59  ;;  %v3920_v51 = vld [vmem:[%s4711_s3 + $0x50] sm:$0xff]  }
  0x32   : > { %3425 = vmatpush3.bf16.msra.mxu0 %v3863_v62  ;;  %v3131_v62 = vcombine.high %v752_v59, %v752_v59 }
  0x33   : > { %3459 = vmatpush3.bf16.msra.mxu1 %v3864_v60  ;;  %3426 = vmatprep.subr.bf16.mxu0 %v3865_v3  ;;  %v3129_v60 = vcombine.high %v4220_v1, %v751_v57  ;;  %v869_v18 = vshll.u32 %v3130_v63, 16  ;;  %v4002_v1 = vmov 0.0  }
  0x34   : > { %3460 = vmatprep.subr.bf16.mxu1 %v3866_v0 }
  0x35   : > { %566 = vmatmul.mubr.bf16.gmra.mxu0 %v408_v19  ;;  %v860_v4 = vshrl.u32 %v3129_v60, 16 }
  0x36   : > { %730 = vmatmul.mubr.bf16.gmra.mxu1 %v4179_v39  ;;  %3427 = vmatpush3.bf16.msra.mxu0 %v3868_v11  ;;  %v746_v39 = vld [vmem:[%s4153_s26] sm:$0x88] }
  0x37   : > { %3461 = vmatpush3.bf16.msra.mxu1 %v3869_v6  ;;  %3428 = vmatprep.subr.bf16.mxu0 %v3871_v15  ;;  %v3124_v54 = vcombine.low %v746_v39, %v4163_v33  ;;  %v3125_v55 = vcombine.high %v746_v39, %v4163_v33  ;;  %v863_v33 = vshll.u32 %v3129_v60, 16  ;;  %v854_v6 = vshll.u32 %v3128_v61, 16 }
  0x38   : > { %3462 = vmatprep.subr.bf16.mxu1 %v3872_v16  ;;  %573 = vmatprep.mubr.bf16.mxu0 %v422_v21  ;;  %v862_v11 = vrot.slane %v860_v4, 3 }
  0x39   : > { %737 = vmatprep.mubr.bf16.mxu1 %v3075_v26  ;;  %v834_v34 = vshrl.u32 %v3125_v55, 16  ;;  %v837_v0 = vshll.u32 %v3125_v55, 16  ;;  %v817_v2 = vshrl.u32 %v3124_v54, 16  ;;  %v820_v3 = vshll.u32 %v3124_v54, 16 }
  0x3a   : > { %3429 = vmatpush3.bf16.msra.mxu0 %v3873_v17  ;;  %v865_v12 = vrot.slane %v863_v33, 4  ;;  %v856_v14 = vrot.slane %v854_v6, 4  ;;  %v874_v17 = vshll.u32 %v3131_v62, 16  ;;  %v3185_v26 = vcombine.high %v751_v57, %v752_v59 }
  0x3b   : > { %3463 = vmatpush3.bf16.msra.mxu1 %v3874_v20  ;;  %3430 = vmatprep.subr.bf16.mxu0 %v3875_v22  ;;  %v836_v7 = vrot.slane %v834_v34, 3  ;;  %v839_v8 = vrot.slane %v837_v0, 4  ;;  %v819_v9 = vrot.slane %v817_v2, 3  ;;  %v822_v10 = vrot.slane %v820_v3, 4 }
  0x3c   : > { %3464 = vmatprep.subr.bf16.mxu1 %v3876_v23  ;;  %v866_v19 = vor.u32 %v865_v12, %v862_v11  ;;  %v876_v22 = vrot.slane %v874_v17, 4  ;;  %v871_v23 = vrot.slane %v869_v18, 4 }
  0x3d   : > { %574 = vmatmul.mubr.bf16.gmra.mxu0 %v419_v32  ;;  %v840_v15 = vor.u32 %v839_v8, %v836_v7  ;;  %v823_v16 = vor.u32 %v822_v10, %v819_v9  ;;  %v3906_v32 = vld [vmem:[%s4711_s3 + $0x30] sm:$0xff]  }
  0x3e   : > { %738 = vmatmul.mubr.bf16.gmra.mxu1 %v3074_v28  ;;  %3431 = vmatpush3.bf16.msra.mxu0 %v3878_v27  ;;  %v867_v24 = vsel %vm815_vm1, %v848_v53, %v866_v19  ;;  %v857_v27 = vor.u32 %v856_v14, %v853_v13 }
  0x3f   : > { %3465 = vmatpush3.bf16.msra.mxu1 %v3879_v30  ;;  %1216 = vmatprep.mubr.bf16.mxu1 %v3181_v29  ;;  %v849_v20 = vsel %vm815_vm1, %v840_v15, %v848_v53  ;;  %v832_v21 = vsel %vm815_vm1, %v823_v16, %v831_v56  ;;  %v877_v29 = vsel %vm815_vm1, %v866_v19, %v876_v22 }
  0x40   : > { %3466 = vmatprep.subr.bf16.mxu1 %v3882_v36  ;;  %3432 = vmatprep.subr.bf16.mxu0 %v3881_v31  ;;  %v858_v28 = vsel %vm815_vm1, %v831_v56, %v857_v27  ;;  %v3184_v30 = vcombine.low %v751_v57, %v752_v59  ;;  %v872_v31 = vsel %vm815_vm1, %v857_v27, %v871_v23  ;;  %v3907_v36 = vld [vmem:[%s4711_s3 + $0x28] sm:$0xff]  }
  0x41   : > { %1012 = vmatprep.mubr.bf16.mxu0 %v849_v20 }
  0x42   : > { %3433 = vmatpush3.bf16.msra.mxu0 %v3883_v37  ;;  %v3908_v37 = vld [vmem:[%s4711_s3 + $0x20] sm:$0xff]  }
  0x43   : > { %3467 = vmatpush3.bf16.msra.mxu1 %v3884_v40  ;;  %3434 = vmatprep.subr.bf16.mxu0 %v3885_v41  ;;  %v3909_v40 = vld [vmem:[%s4711_s3 + $0x78] sm:$0xff]  }
  0x44   : > { %3468 = vmatprep.subr.bf16.mxu1 %v3886_v42  ;;  %v3910_v41 = vld [vmem:[%s4711_s3 + $0x18] sm:$0xff]   ;;  %v3911_v42 = vld [vmem:[%s4711_s3 + $0x70] sm:$0xff]  }
  0x46   : > { %3435 = vmatpush3.bf16.msra.mxu0 %v3887_v44  ;;  %v3913_v44 = vld [vmem:[%s4711_s3 + $0x68] sm:$0xff]  }
  0x47   : > { %3469 = vmatpush3.bf16.msra.mxu1 %v3888_v48  ;;  %3436 = vmatprep.subr.bf16.mxu0 %v3889_v50  ;;  %v3915_v48 = vld [vmem:[%s4711_s3 + $0x60] sm:$0xff]   ;;  %v3917_v50 = vld [vmem:[%s4711_s3 + $0x58] sm:$0xff]  }
  0x48   : > { %3470 = vmatprep.subr.bf16.mxu1 %v3890_v38  ;;  %v3922_v38 = vld [vmem:[%s4711_s3 + $0x48] sm:$0xff]  }
  0x4a   : > { %3437 = vmatpush3.bf16.msra.mxu0 %v3891_v46  ;;  %v1299_v46 = vld [vmem:[#allocation2 + $0x14] sm:$0x2] }
  0x4b   : > { %3471 = vmatpush3.bf16.msra.mxu1 %v3892_v52  ;;  %3588 = vmatprep.subr.bf16.mxu0 %v4002_v1  ;;  %v3925_v52 = vld [vmem:[%s4711_s3 + $0x40] sm:$0xff]   ;;  %v1300_v39 = vsel %vm1298_vm5, 0, %v1299_v46 }
  0x4c   : > { %3616 = vmatprep.subr.bf16.mxu1 %v4002_v1  ;;  %1301 = vst [vmem:[#allocation2 + $0x14] sm:$0x2] %v1300_v39 }
  0x4d   : > { %1013 = vmatmul.mubr.bf16.vlgmr.msra.gmra.mxu0 %v832_v21 }
  0x4e   : > { %1217 = vmatmul.mubr.bf16.vlgmr.msra.gmra.mxu1 %v3180_v47  ;;  %1020 = vmatprep.mubr.bf16.mxu0 %v867_v24 }
  0x4f   : > { %1224 = vmatprep.mubr.bf16.mxu1 %v3183_v58  ;;  %3617 = vmatpush3.bf16.msra.mxu1 %v3905_v35 }
  0x50   : > { %3618 = vmatprep.subr.bf16.mxu1 %v4002_v1  ;;  %3589 = vmatpush3.bf16.msra.mxu0 %v3909_v40 }
  0x51   : > { %3590 = vmatprep.subr.bf16.mxu0 %v4002_v1 }
  0x53   : > { %3619 = vmatpush3.bf16.msra.mxu1 %v3906_v32 }
  0x54   : > { %3620 = vmatprep.subr.bf16.mxu1 %v4002_v1  ;;  %3591 = vmatpush3.bf16.msra.mxu0 %v3911_v42 }
  0x55   : > { %1021 = vmatmul.mubr.bf16.gmra.mxu0 %v858_v28  ;;  %3592 = vmatprep.subr.bf16.mxu0 %v4002_v1 }
  0x56   : > { %1225 = vmatmul.mubr.bf16.gmra.mxu1 %v3182_v25  ;;  %1028 = vmatprep.mubr.bf16.mxu0 %v877_v29 }
  0x57   : > { %1232 = vmatprep.mubr.bf16.mxu1 %v3185_v26  ;;  %3621 = vmatpush3.bf16.msra.mxu1 %v3907_v36 }
  0x58   : > { %3622 = vmatprep.subr.bf16.mxu1 %v4002_v1  ;;  %3593 = vmatpush3.bf16.msra.mxu0 %v3913_v44 }
  0x59   : > { %3594 = vmatprep.subr.bf16.mxu0 %v4002_v1 }
  0x5b   : > { %3623 = vmatpush3.bf16.msra.mxu1 %v3908_v37  ;;  %v3202_v37 = vld [vmem:[%s4710_s2] ss:$0 sm:$0xff] }
  0x5c   : > { %3624 = vmatprep.subr.bf16.mxu1 %v4002_v1  ;;  %3595 = vmatpush3.bf16.msra.mxu0 %v3915_v48 }
  0x5d   : > { %1029 = vmatmul.mubr.bf16.gmra.mxu0 %v872_v31  ;;  %3596 = vmatprep.subr.bf16.mxu0 %v4002_v1 }
  0x5e   : > { %1233 = vmatmul.mubr.bf16.gmra.mxu1 %v3184_v30  ;;  %3604 = vmatprep.mubr.msk.bf16.mxu0 %vm4003_vm2, %v4002_v1 }
  0x5f   : > { %3625 = vmatpush3.bf16.msra.mxu1 %v3910_v41  ;;  %3632 = vmatprep.mubr.msk.bf16.mxu1 %vm4003_vm2, %v4002_v1 }
  0x60   : > { %3626 = vmatprep.subr.bf16.mxu1 %v4002_v1  ;;  %3597 = vmatpush3.bf16.msra.mxu0 %v3917_v50 }
  0x61   : > { %3598 = vmatprep.subr.bf16.mxu0 %v4002_v1 }
  0x63   : > { %3627 = vmatpush3.bf16.msra.mxu1 %v3912_v43 }
  0x64   : > { %3628 = vmatprep.subr.bf16.mxu1 %v4002_v1  ;;  %3599 = vmatpush3.bf16.msra.mxu0 %v3920_v51 }
  0x65   : > { %3600 = vmatprep.subr.bf16.mxu0 %v4002_v1 }
  0x67   : > { %3629 = vmatpush3.bf16.msra.mxu1 %v3914_v45 }
  0x68   : > { %3630 = vmatprep.subr.bf16.mxu1 %v4002_v1  ;;  %3601 = vmatpush3.bf16.msra.mxu0 %v3922_v38 }
  0x69   : > { %3602 = vmatprep.subr.bf16.mxu0 %v4002_v1 }
  0x6b   : > { %3631 = vmatpush3.bf16.msra.mxu1 %v3916_v49 }
  0x6c   : > { %3672 = vmatprep.subr.bf16.mxu1 %v4002_v1  ;;  %3603 = vmatpush3.bf16.msra.mxu0 %v3925_v52 }
  0x6d   : > { %3644 = vmatprep.subr.bf16.mxu0 %v4002_v1 }
  0xed   : > { %v3370_v55 = vpop.f32.mrf.mxu0 }
  0xee   : > { %v3404_v53 = vpop.f32.mrf.mxu1 }
  0xef   : > { %v3371_v57 = vpop.f32.mrf.mxu0 }
  0xf0   : > { %v3405_v47 = vpop.f32.mrf.mxu1  ;;  %v3372_v13 = vadd.f32 %v3371_v57, %v3370_v55 }
  0xf1   : > { %v3373_v59 = vpop.f32.mrf.mxu0  ;;  %v3406_v14 = vadd.f32 %v3405_v47, %v3404_v53 }
  0xf2   : > { %v3407_v54 = vpop.f32.mrf.mxu1 }
  0xf3   : > { %v3374_v61 = vpop.f32.mrf.mxu0  ;;  %v724_v19 = vadd.f32 %v3406_v14, %v3372_v13 }
  0xf4   : > { %v3408_v56 = vpop.f32.mrf.mxu1  ;;  %v3375_v20 = vadd.f32 %v3374_v61, %v3373_v59 }
  0xf5   : > { %v3376_v63 = vpop.f32.mrf.mxu0  ;;  %v3409_v21 = vadd.f32 %v3408_v56, %v3407_v54 }
  0xf6   : > { %v3410_v58 = vpop.f32.mrf.mxu1 }
  0xf7   : > { %v3377_v34 = vpop.f32.mrf.mxu0  ;;  %v727_v30 = vadd.f32 %v3409_v21, %v3375_v20 }
  0xf8   : > { %v3411_v60 = vpop.f32.mrf.mxu1  ;;  %v3378_v31 = vadd.f32 %v3377_v34, %v3376_v63 }
  0xf9   : > { %v3379_v2 = vpop.f32.mrf.mxu0  ;;  %v3412_v28 = vadd.f32 %v3411_v60, %v3410_v58 }
  0xfa   : > { %v3413_v62 = vpop.f32.mrf.mxu1 }
  0xfb   : > { %v3380_v4 = vpop.f32.mrf.mxu0  ;;  %v732_v49 = vadd.f32 %v3412_v28, %v3378_v31  ;;  %v3921_v31 = vld [vmem:[%s4711_s3 + $0xf0] sm:$0xff]  }
  0xfc   : > { %v3414_v0 = vpop.f32.mrf.mxu1  ;;  %v3381_v44 = vadd.f32 %v3380_v4, %v3379_v2 }
  0xfd   : > { %v3382_v5 = vpop.f32.mrf.mxu0  ;;  %v3415_v45 = vadd.f32 %v3414_v0, %v3413_v62 }
  0xfe   : > { %v3416_v3 = vpop.f32.mrf.mxu1 }
  0xff   : > { %v3383_v7 = vpop.f32.mrf.mxu0  ;;  %v735_v55 = vadd.f32 %v3415_v45, %v3381_v44  ;;  %v3926_v44 = vld [vmem:[%s4711_s3 + $0xe0] sm:$0xff]   ;;  %v3927_v45 = vld [vmem:[%s4711_s3 + $0xb8] sm:$0xff]  }
 0x100   : > { %v3417_v33 = vpop.f32.mrf.mxu1  ;;  %v3384_v56 = vadd.f32 %v3383_v7, %v3382_v5 }
 0x101   : > { %v3385_v9 = vpop.f32.mrf.mxu0  ;;  %v3418_v57 = vadd.f32 %v3417_v33, %v3416_v3 }
 0x102   : > { %v3419_v6 = vpop.f32.mrf.mxu1 }
 0x103   : > { %v3386_v12 = vpop.f32.mrf.mxu0 }
 0x104   : > { %v3420_v8 = vpop.f32.mrf.mxu1 }
 0x105   : > { %v3421_v13 = vadd.f32 %v3420_v8, %v3419_v6  ;;  %v3919_v8 = vld [vmem:[%s4711_s3 + $0xf8] sm:$0xff]  }
 0x10d   : > { %v3438_v16 = vpop.f32.mrf.mxu0 }
 0x10e   : > { %v3472_v10 = vpop.f32.mrf.mxu1 }
 0x10f   : > { %v3439_v18 = vpop.f32.mrf.mxu0 }
 0x110   : > { %v3473_v11 = vpop.f32.mrf.mxu1  ;;  %v3440_v22 = vadd.f32 %v3439_v18, %v3438_v16 }
 0x111   : > { %v3441_v24 = vpop.f32.mrf.mxu0  ;;  %v3474_v26 = vadd.f32 %v3473_v11, %v3472_v10  ;;  %v740_v10 = vadd.f32 %v3418_v57, %v3384_v56  ;;  %v3387_v11 = vadd.f32 %v3386_v12, %v3385_v9  ;;  %v3933_v57 = vld [vmem:[%s4711_s3 + $0xc8] sm:$0xff]  }
 0x112   : > { %v3475_v15 = vpop.f32.mrf.mxu1  ;;  %v1037_v25 = vadd.f32 %v3440_v22, %v724_v19 }
 0x113   : > { %v3442_v29 = vpop.f32.mrf.mxu0  ;;  %v743_v19 = vadd.f32 %v3421_v13, %v3387_v11  ;;  %v3939_v13 = vld [vmem:[%s4711_s3 + $0x90] sm:$0xff]  }
 0x114   : > { %v3476_v17 = vpop.f32.mrf.mxu1  ;;  %v1241_v35 = vadd.f32 %v3474_v26, %v1037_v25  ;;  %v3443_v32 = vadd.f32 %v3442_v29, %v3441_v24 }
 0x115   : > { %v3444_v40 = vpop.f32.mrf.mxu0  ;;  %v3477_v42 = vadd.f32 %v3476_v17, %v3475_v15 }
 0x116   : > { %v3478_v23 = vpop.f32.mrf.mxu1  ;;  %v1038_v41 = vadd.f32 %v3443_v32, %v727_v30  ;;  %v1254_v50 = vadd.f32 %v3202_v37, %v1241_v35 }
 0x117   : > { %v3445_v48 = vpop.f32.mrf.mxu0 }
 0x118   : > { %v3479_v27 = vpop.f32.mrf.mxu1  ;;  %v1242_v51 = vadd.f32 %v3477_v42, %v1038_v41  ;;  %v3446_v38 = vadd.f32 %v3445_v48, %v3444_v40  ;;  %v1260_v59 = vmax.f32 %v1254_v50, 0.0  ;;  %v3924_v40 = vld [vmem:[%s4711_s3 + $0xe8] sm:$0xff]  }
 0x119   : > { %v3447_v52 = vpop.f32.mrf.mxu0  ;;  %v3480_v47 = vadd.f32 %v3479_v27, %v3478_v23 }
 0x11a   : > { %v3481_v36 = vpop.f32.mrf.mxu1  ;;  %v1255_v39 = vadd.f32 %v3202_v37, %v1242_v51  ;;  %v1039_v53 = vadd.f32 %v3446_v38, %v732_v49 }
 0x11b   : > { %v3448_v58 = vpop.f32.mrf.mxu0 }
 0x11c   : > { %v3482_v43 = vpop.f32.mrf.mxu1  ;;  %v1261_v60 = vmax.f32 %v1255_v39, 0.0  ;;  %v1243_v61 = vadd.f32 %v3480_v47, %v1039_v53  ;;  %v3449_v63 = vadd.f32 %v3448_v58, %v3447_v52  ;;  %v3930_v52 = vld [vmem:[%s4711_s3 + $0xb0] sm:$0xff]   ;;  %v3934_v58 = vld [vmem:[%s4711_s3 + $0xa0] sm:$0xff]  }
 0x11d   : > { %v3450_v34 = vpop.f32.mrf.mxu0  ;;  %v3483_v4 = vadd.f32 %v3482_v43, %v3481_v36  ;;  %v3931_v47 = vld [vmem:[%s4711_s3 + $0xd0] sm:$0xff]  }
 0x11e   : > { %v3484_v46 = vpop.f32.mrf.mxu1  ;;  %v3346_v0 = vpack.c.bf16 %v1261_v60, %v1260_v59  ;;  %v1040_v2 = vadd.f32 %v3449_v63, %v735_v55  ;;  %v1256_v15 = vadd.f32 %v3202_v37, %v1243_v61  ;;  %v3932_v55 = vld [vmem:[%s4711_s3 + $0xa8] sm:$0xff]   ;;  %v3935_v59 = vld [vmem:[%s4711_s3 + $0xc0] sm:$0xff]  }
 0x11f   : > { %v3451_v14 = vpop.f32.mrf.mxu0 }
 0x120   : > { %v3485_v54 = vpop.f32.mrf.mxu1  ;;  %3347 = vst [vmem:[#allocation2] sm:$0xff] %v3346_v0   ;;  %v1244_v16 = vadd.f32 %v3483_v4, %v1040_v2  ;;  %v3452_v17 = vadd.f32 %v3451_v14, %v3450_v34  ;;  %v1262_v22 = vmax.f32 %v1256_v15, 0.0 }
 0x121   : > { %v3486_v5 = vadd.f32 %v3485_v54, %v3484_v46  ;;  %v3453_v33 = vpop.f32.mrf.mxu0  ;;  %v3929_v46 = vld [vmem:[%s4711_s3 + $0xd8] sm:$0xff]  }
 0x122   : > { %v3487_v62 = vpop.f32.mrf.mxu1  ;;  %v1257_v7 = vadd.f32 %v3202_v37, %v1244_v16  ;;  %v1041_v18 = vadd.f32 %v3452_v17, %v740_v10  ;;  %v3940_v17 = vld [vmem:[%s4711_s3 + $0x88] sm:$0xff]  }
 0x123   : > { %v3454_v20 = vpop.f32.mrf.mxu0 }
 0x124   : > { %v3488_v3 = vpop.f32.mrf.mxu1  ;;  %v1263_v23 = vmax.f32 %v1257_v7, 0.0  ;;  %v1245_v24 = vadd.f32 %v3486_v5, %v1041_v18  ;;  %v3455_v25 = vadd.f32 %v3454_v20, %v3453_v33 }
 0x125   : > { %v3489_v21 = vadd.f32 %v3488_v3, %v3487_v62  ;;  %v3936_v62 = vld [vmem:[%s4711_s3 + $0x98] sm:$0xff]  }
 0x126   : > { %v3351_v26 = vpack.c.bf16 %v1263_v23, %v1262_v22  ;;  %v1258_v9 = vadd.f32 %v3202_v37, %v1245_v24  ;;  %v1042_v6 = vadd.f32 %v3455_v25, %v743_v19 }
 0x127   : > { %v3918_v12 = vld [vmem:[#allocation2] sm:$0xff]  }
 0x128   : > { %3353 = vst [vmem:[#allocation2 + $0x8] sm:$0xff] %v3351_v26   ;;  %v1264_v27 = vmax.f32 %v1258_v9, 0.0  ;;  %v1246_v28 = vadd.f32 %v3489_v21, %v1042_v6  ;;  %3633 = vmatmul.mubr.bf16.vlgmr.msra.gmra.mxu1 %v3918_v12  ;;  %v1355_v35 = vshll.u32 %v3918_v12, 16  ;;  %v1353_v43 = vshrl.u32 %v3918_v12, 16  ;;  %v1605_v0 = vld [vmem:[#allocation2] sm:$0x8] }
 0x129   : > { %3673 = vmatpush3.bf16.msra.mxu1 %v3919_v8  ;;  %3636 = vmatprep.mubr.msk.bf16.mxu1 %vm4003_vm2, %v4002_v1  ;;  %v1606_v2 = vld [vmem:[#allocation2 + $0x4] sm:$0xf] }
 0x12a   : > { %v3336_v29 = vpack.c.bf16 %v1264_v27, %v1264_v27  ;;  %v1259_v30 = vadd.f32 %v3202_v37, %v1246_v28  ;;  %3674 = vmatprep.subr.bf16.mxu1 %v4002_v1  ;;  %v1357_v41 = vrot.slane %v1355_v35, 1  ;;  %v3228_v10 = vcombine.low %v1605_v0, %v1606_v2  ;;  %v3944_v21 = vld [vmem:[%s4711_s3 + $0x80] sm:$0xff]   ;;  %v3946_v35 = vld [vmem:[%s4713_s5 + $0x38] sm:$0xff]  }
 0x12c   : > { %1294 = vst [vmem:[#allocation2 + $0x10] sm:$0xf] %v3336_v29  ;;  %v1265_v32 = vmax.f32 %v1259_v30, 0.0  ;;  %v1358_v49 = vor.u32 %v1357_v41, %v1353_v43  ;;  %v1627_v5 = vshrl.u32 %v3228_v10, 16  ;;  %v1630_v3 = vshll.u32 %v3228_v10, 16  ;;  %v3947_v30 = vld [vmem:[%s4713_s5 + $0x18] sm:$0xff]  }
 0x12d   : > { %3675 = vmatpush3.bf16.msra.mxu1 %v3921_v31  ;;  %v3949_v31 = vld [vmem:[%s4713_s5 + $0x10] sm:$0xff]   ;;  %v3954_v41 = vld [vmem:[%s4713_s5 + $0x20] sm:$0xff]  }
 0x12e   : > { %v3337_v36 = vpack.c.bf16 %v1265_v32, %v1265_v32  ;;  %3676 = vmatprep.subr.bf16.mxu1 %v4002_v1  ;;  %v1629_v22 = vrot.slane %v1627_v5, 3  ;;  %v1632_v23 = vrot.slane %v1630_v3, 4  ;;  %v3948_v32 = vld [vmem:[%s4713_s5 + $0x30] sm:$0xff]   ;;  %v3250_v3 = vld [vmem:[%s4712_s4] ss:$0 sm:$0xff] }
 0x12f   : > { %v3923_v37 = vld [vmem:[#allocation2 + $0x8] sm:$0xff]  }
 0x130   : > { %1295 = vst [vmem:[#allocation2 + $0x14] sm:$0x1] %v3337_v36  ;;  %v1360_v42 = vshll.u32 %v3923_v37, 16  ;;  %3637 = vmatmul.mubr.bf16.gmra.mxu1 %v3923_v37  ;;  %v1364_v39 = vshrl.u32 %v3923_v37, 16  ;;  %v1607_v61 = vld [vmem:[#allocation2 + $0x8] sm:$0xf]  ;;  %v1633_v9 = vor.u32 %v1632_v23, %v1629_v22 }
 0x131   : > { %3677 = vmatpush3.bf16.msra.mxu1 %v3924_v40  ;;  %3640 = vmatprep.mubr.msk.bf16.mxu1 %vm4003_vm2, %v4002_v1  ;;  %v1608_v63 = vld [vmem:[#allocation2 + $0xc] sm:$0xf]  ;;  %v3239_v11 = vcombine.low %v1606_v2, %v1607_v61  ;;  %v3952_v36 = vld [vmem:[%s4713_s5] sm:$0xff]   ;;  %v4517_v37 = vld [vmem:[%s4713_s5 + $0x78] sm:$0xff]  }
 0x132   : > { %v1362_v48 = vrot.slane %v1360_v42, 1  ;;  %3678 = vmatprep.subr.bf16.mxu1 %v4002_v1  ;;  %v3229_v4 = vcombine.low %v1607_v61, %v1608_v63  ;;  %v3951_v40 = vld [vmem:[%s4713_s5 + $0x28] sm:$0xff]   ;;  %v4526_v42 = vld [vmem:[%s4713_s5 + $0x58] sm:$0xff]  }
 0x133   : > { %v3928_v50 = vld [vmem:[#allocation2 + $0x10] ss:$0 sps:$4 sm:$0x33]  }
 0x134   : > { %v1363_v51 = vsel %vm376_vm0, %v1358_v49, %v1362_v48  ;;  %v1368_v38 = vshll.u32 %v3928_v50, 16  ;;  %v1366_v54 = vor.u32 %v1364_v39, %v1362_v48  ;;  %v1372_v60 = vshrl.u32 %v3928_v50, 16  ;;  %v1609_v33 = vld [vmem:[#allocation2 + $0x10] sm:$0xf] }
 0x135   : > { %3679 = vmatpush3.bf16.msra.mxu1 %v3926_v44  ;;  %3605 = vmatmul.mubr.bf16.vlgmr.msra.gmra.mxu0 %v1363_v51  ;;  %v1635_v14 = vshrl.u32 %v3229_v4, 16  ;;  %v1638_v15 = vshll.u32 %v3229_v4, 16  ;;  %v3240_v20 = vcombine.low %v1608_v63, %v1609_v33 }
 0x136   : > { %3645 = vmatpush3.bf16.msra.mxu0 %v3927_v45  ;;  %3680 = vmatprep.subr.bf16.mxu1 %v4002_v1  ;;  %v1370_v53 = vrot.slane %v1368_v38, 1 }
 0x137   : > { %3646 = vmatprep.subr.bf16.mxu0 %v4002_v1  ;;  %3608 = vmatprep.mubr.msk.bf16.mxu0 %vm4003_vm2, %v4002_v1  ;;  %v1610_v16 = vld [vmem:[#allocation2 + $0x14] sm:$0x1]  ;;  %v1637_v18 = vrot.slane %v1635_v14, 3  ;;  %v1640_v19 = vrot.slane %v1638_v15, 4 }
 0x138   : > { %3641 = vmatmul.mubr.bf16.gmra.mxu1 %v3928_v50  ;;  %v1371_v56 = vsel %vm376_vm0, %v1366_v54, %v1370_v53  ;;  %v1374_v34 = vor.u32 %v1372_v60, %v1370_v53  ;;  %v3230_v7 = vcombine.low %v1609_v33, %v1610_v16  ;;  %v3945_v27 = vld [vmem:[#allocation2 + $0x14] ss:$0 sps:$4 sm:$0x33]  }
 0x139   : > { %3681 = vmatpush3.bf16.msra.mxu1 %v3929_v46  ;;  %3688 = vmatprep.mubr.msk.bf16.mxu1 %vm4003_vm2, %v4002_v1  ;;  %v1641_v26 = vor.u32 %v1640_v19, %v1637_v18 }
 0x13a   : > { %3647 = vmatpush3.bf16.msra.mxu0 %v3930_v52  ;;  %3682 = vmatprep.subr.bf16.mxu1 %v4002_v1  ;;  %v1644_v24 = vshrl.u32 %v3230_v7, 16  ;;  %v1647_v25 = vshll.u32 %v3230_v7, 16 }
 0x13b   : > { %3648 = vmatprep.subr.bf16.mxu0 %v4002_v1  ;;  %v1642_v6 = vsel %vm815_vm1, %v1633_v9, %v1641_v26 }
 0x13c   : > { %v1646_v8 = vrot.slane %v1644_v24, 3  ;;  %v1649_v12 = vrot.slane %v1647_v25, 4 }
 0x13d   : > { %3683 = vmatpush3.bf16.msra.mxu1 %v3931_v47  ;;  %3609 = vmatmul.mubr.bf16.gmra.mxu0 %v1371_v56 }
 0x13e   : > { %3649 = vmatpush3.bf16.msra.mxu0 %v3932_v55  ;;  %3684 = vmatprep.subr.bf16.mxu1 %v4002_v1  ;;  %v1650_v28 = vor.u32 %v1649_v12, %v1646_v8 }
 0x13f   : > { %3650 = vmatprep.subr.bf16.mxu0 %v4002_v1  ;;  %3612 = vmatprep.mubr.msk.bf16.mxu0 %vm4003_vm2, %v4002_v1 }
 0x140   : > { %v1651_v29 = vsel %vm815_vm1, %v1641_v26, %v1650_v28 }
 0x141   : > { %3685 = vmatpush3.bf16.msra.mxu1 %v3933_v57 }
 0x142   : > { %3651 = vmatpush3.bf16.msra.mxu0 %v3934_v58  ;;  %3686 = vmatprep.subr.bf16.mxu1 %v4002_v1 }
 0x143   : > { %3652 = vmatprep.subr.bf16.mxu0 %v4002_v1 }
 0x145   : > { %3687 = vmatpush3.bf16.msra.mxu1 %v3935_v59  ;;  %3613 = vmatmul.mubr.bf16.gmra.mxu0 %v1374_v34 }
 0x146   : > { %3653 = vmatpush3.bf16.msra.mxu0 %v3936_v62  ;;  %3660 = vmatprep.mubr.msk.bf16.mxu0 %vm4003_vm2, %v4002_v1 }
 0x147   : > { %3654 = vmatprep.subr.bf16.mxu0 %v4002_v1  ;;  %3712 = vmatprep.subr.bf16.mxu1 %v3947_v30 }
 0x148   : > { %3689 = vmatmul.mubr.bf16.vlgmr.msra.gmra.mxu1 %v3239_v11 }
 0x149   : > { %3692 = vmatprep.mubr.msk.bf16.mxu1 %vm4003_vm2, %v4002_v1  ;;  %3713 = vmatpush3.bf16.msra.mxu1 %v3947_v30 }
 0x14a   : > { %3655 = vmatpush3.bf16.msra.mxu0 %v3939_v13  ;;  %3714 = vmatprep.subr.bf16.mxu1 %v3949_v31 }
 0x14b   : > { %3656 = vmatprep.subr.bf16.mxu0 %v4002_v1 }
 0x14d   : > { %3715 = vmatpush3.bf16.msra.mxu1 %v3949_v31 }
 0x14e   : > { %3657 = vmatpush3.bf16.msra.mxu0 %v3940_v17 }
 0x14f   : > { %3658 = vmatprep.subr.bf16.mxu0 %v4002_v1 }
 0x150   : > { %3693 = vmatmul.mubr.bf16.gmra.mxu1 %v3240_v20 }
 0x151   : > { %3696 = vmatprep.mubr.msk.bf16.mxu1 %vm4003_vm2, %v4002_v1 }
 0x152   : > { %3659 = vmatpush3.bf16.msra.mxu0 %v3944_v21 }
 0x153   : > { %3700 = vmatprep.subr.bf16.mxu0 %v3946_v35 }
 0x155   : > { %3661 = vmatmul.mubr.bf16.vlgmr.msra.gmra.mxu0 %v1642_v6 }
 0x156   : > { %3664 = vmatprep.mubr.msk.bf16.mxu0 %vm4003_vm2, %v4002_v1  ;;  %3701 = vmatpush3.bf16.msra.mxu0 %v3946_v35 }
 0x157   : > { %3702 = vmatprep.subr.bf16.mxu0 %v3948_v32 }
 0x158   : > { %3697 = vmatmul.mubr.bf16.gmra.mxu1 %v3945_v27 }
 0x15a   : > { %3703 = vmatpush3.bf16.msra.mxu0 %v3948_v32 }
 0x15b   : > { %3704 = vmatprep.subr.bf16.mxu0 %v3951_v40 }
 0x15d   : > { %3665 = vmatmul.mubr.bf16.gmra.mxu0 %v1651_v29 }
 0x15e   : > { %3668 = vmatprep.mubr.msk.bf16.mxu0 %vm4003_vm2, %v4002_v1  ;;  %v3950_v1 = vld [vmem:[%s4713_s5 + $0x8] sm:$0xff]   ;;  %3705 = vmatpush3.bf16.msra.mxu0 %v3951_v40  ;;  %vm2909_vm2 = vsmask.f32 2312 }
 0x15f   : > { %3716 = vmatprep.subr.bf16.mxu1 %v3950_v1  ;;  %3706 = vmatprep.subr.bf16.mxu0 %v3954_v41 }
 0x160   : > { %3717 = vmatpush3.bf16.msra.mxu1 %v3950_v1 }
 0x161   : > { %3718 = vmatprep.subr.bf16.mxu1 %v3952_v36 }
 0x162   : > { %3707 = vmatpush3.bf16.msra.mxu0 %v3954_v41 }
 0x163   : > { %3724 = vmatprep.subr.bf16.mxu0 %v4526_v42 }
 0x164   : > { %3719 = vmatpush3.bf16.msra.mxu1 %v3952_v36 }
 0x165   : > { %3669 = vmatmul.mubr.bf16.gmra.mxu0 %v1650_v28  ;;  %3736 = vmatprep.subr.bf16.mxu1 %v4517_v37 }
 0x1e8   : > { %v1567_v43 = vpop.f32.mrf.mxu1 }
 0x1ea   : > { %v3634_v44 = vpop.f32.mrf.mxu1 }
 0x1ec   : > { %v1570_v45 = vpop.f32.mrf.mxu1 }
 0x1ee   : > { %v3635_v48 = vpop.f32.mrf.mxu1 }
 0x1f0   : > { %v1575_v49 = vpop.f32.mrf.mxu1 }
 0x1f2   : > { %v3638_v50 = vpop.f32.mrf.mxu1 }
 0x1f4   : > { %v1578_v51 = vpop.f32.mrf.mxu1 }
 0x1f5   : > { %v1460_v38 = vpop.f32.mrf.mxu0 }
 0x1f6   : > { %v3639_v46 = vpop.f32.mrf.mxu1  ;;  %v1568_v14 = vadd.f32 %v1567_v43, %v1460_v38 }
 0x1f7   : > { %v3606_v52 = vpop.f32.mrf.mxu0 }
 0x1f8   : > { %v1583_v39 = vpop.f32.mrf.mxu1 }
 0x1f9   : > { %v1463_v53 = vpop.f32.mrf.mxu0 }
 0x1fa   : > { %v3642_v47 = vpop.f32.mrf.mxu1  ;;  %v1571_v7 = vadd.f32 %v1570_v45, %v1463_v53 }
 0x1fb   : > { %v3607_v54 = vpop.f32.mrf.mxu0 }
 0x1fc   : > { %v1586_v55 = vpop.f32.mrf.mxu1 }
 0x1fd   : > { %v1468_v56 = vpop.f32.mrf.mxu0 }
 0x1fe   : > { %v3643_v57 = vpop.f32.mrf.mxu1  ;;  %v1576_v25 = vadd.f32 %v1575_v49, %v1468_v56 }
 0x1ff   : > { %v3610_v58 = vpop.f32.mrf.mxu0 }
 0x201   : > { %v1471_v59 = vpop.f32.mrf.mxu0 }
 0x202   : > { %v1579_v31 = vadd.f32 %v1578_v51, %v1471_v59 }
 0x203   : > { %v3611_v60 = vpop.f32.mrf.mxu0 }
 0x205   : > { %v1476_v61 = vpop.f32.mrf.mxu0 }
 0x206   : > { %v1584_v44 = vadd.f32 %v1583_v39, %v1476_v61 }
 0x207   : > { %v3614_v63 = vpop.f32.mrf.mxu0 }
 0x208   : > { %v1871_v62 = vpop.f32.mrf.mxu1 }
 0x209   : > { %v1479_v34 = vpop.f32.mrf.mxu0 }
 0x20a   : > { %v3690_v0 = vpop.f32.mrf.mxu1 }
 0x20b   : > { %v3615_v2 = vpop.f32.mrf.mxu0 }
 0x20c   : > { %v1874_v4 = vpop.f32.mrf.mxu1 }
 0x20e   : > { %v3691_v10 = vpop.f32.mrf.mxu1 }
 0x210   : > { %v1879_v11 = vpop.f32.mrf.mxu1 }
 0x212   : > { %v3694_v13 = vpop.f32.mrf.mxu1 }
 0x214   : > { %v1882_v15 = vpop.f32.mrf.mxu1 }
 0x215   : > { %v1737_v16 = vpop.f32.mrf.mxu0 }
 0x216   : > { %v1759_v17 = vadd.f32 %v1737_v16, %v1568_v14  ;;  %v3695_v5 = vpop.f32.mrf.mxu1 }
 0x217   : > { %v3662_v33 = vpop.f32.mrf.mxu0 }
 0x218   : > { %v1893_v18 = vadd.f32 %v1871_v62, %v1759_v17  ;;  %v1887_v19 = vpop.f32.mrf.mxu1  ;;  %v1943_v62 = vld [vmem:[#allocation3 + $0x10] sm:$0x3] }
 0x219   : > { %v1740_v20 = vpop.f32.mrf.mxu0 }
 0x21a   : > { %v1905_v21 = vadd.f32 %v3250_v3, %v1893_v18  ;;  %v1760_v22 = vadd.f32 %v1740_v20, %v1571_v7  ;;  %v3698_v23 = vpop.f32.mrf.mxu1 }
 0x21b   : > { %v3663_v24 = vpop.f32.mrf.mxu0 }
 0x21c   : > { %v1910_v26 = vmax.f32 %v1905_v21, 0.0  ;;  %v1894_v9 = vadd.f32 %v1874_v4, %v1760_v22  ;;  %v1890_v6 = vpop.f32.mrf.mxu1 }
 0x21d   : > { %v1745_v8 = vpop.f32.mrf.mxu0  ;;  %v3962_v6 = vld [vmem:[%s4713_s5 + $0x50] sm:$0xff]  }
 0x21e   : > { %v3338_v12 = vpack.c.bf16 %v1910_v26, %v1910_v26  ;;  %v1906_v27 = vadd.f32 %v3250_v3, %v1894_v9  ;;  %v1761_v28 = vadd.f32 %v1745_v8, %v1576_v25  ;;  %v3699_v29 = vpop.f32.mrf.mxu1 }
 0x21f   : > { %v3666_v30 = vpop.f32.mrf.mxu0 }
 0x220   : > { %1937 = vst.msk [vmem:[#allocation3] sm:$0xf] %vm1936_vm6, %v3338_v12  ;;  %v1911_v35 = vmax.f32 %v1906_v27, 0.0  ;;  %v1895_v1 = vadd.f32 %v1879_v11, %v1761_v28  ;;  %v3957_v11 = vld [vmem:[%s4713_s5 + $0x70] sm:$0xff]   ;;  %v3991_v27 = vld [vmem:[%s4713_s5 + $0x108] sm:$0xff]  }
 0x221   : > { %v1748_v32 = vpop.f32.mrf.mxu0 }
 0x222   : > { %v3339_v36 = vpack.c.bf16 %v1911_v35, %v1911_v35  ;;  %v1907_v40 = vadd.f32 %v3250_v3, %v1895_v1  ;;  %v1762_v41 = vadd.f32 %v1748_v32, %v1579_v31  ;;  %v3963_v1 = vld [vmem:[%s4713_s5 + $0x60] sm:$0xff]  }
 0x223   : > { %v3667_v43 = vpop.f32.mrf.mxu0 }
 0x224   : > { %1938 = vst.msk [vmem:[#allocation3 + $0x4] sm:$0xf] %vm1936_vm6, %v3339_v36  ;;  %v1912_v45 = vmax.f32 %v1907_v40, 0.0  ;;  %v1896_v48 = vadd.f32 %v1882_v15, %v1762_v41  ;;  %v3966_v43 = vld [vmem:[%s4713_s5 + $0x48] sm:$0xff]  }
 0x225   : > { %v1753_v49 = vpop.f32.mrf.mxu0 }
 0x226   : > { %v3340_v50 = vpack.c.bf16 %v1912_v45, %v1912_v45  ;;  %v1908_v38 = vadd.f32 %v3250_v3, %v1896_v48  ;;  %v1763_v46 = vadd.f32 %v1753_v49, %v1584_v44 }
 0x227   : > { %v3670_v52 = vpop.f32.mrf.mxu0  ;;  %v1960_v39 = vld [vmem:[#allocation3] sm:$0xf] }
 0x228   : > { %1939 = vst.msk [vmem:[#allocation3 + $0x8] sm:$0xf] %vm1936_vm6, %v3340_v50  ;;  %v1913_v51 = vmax.f32 %v1908_v38, 0.0  ;;  %v1897_v53 = vadd.f32 %v1887_v19, %v1763_v46  ;;  %v2258_v61 = vld [vmem:[#allocation3] sm:$0x8]  ;;  %v3961_v19 = vld [vmem:[%s4713_s5 + $0x68] sm:$0xff]  }
 0x229   : > { %v1756_v47 = vpop.f32.mrf.mxu0  ;;  %v2157_v4 = vld [vmem:[#allocation3] sm:$0xe] }
 0x22a   : > { %v3341_v54 = vpack.c.bf16 %v1913_v51, %v1913_v51  ;;  %v1909_v55 = vadd.f32 %v3250_v3, %v1897_v53  ;;  %v3970_v51 = vld [vmem:[%s4713_s5 + $0x40] sm:$0xff]   ;;  %v3971_v53 = vld [vmem:[%s4713_s5 + $0xb0] sm:$0xff]   ;;  %v3972_v47 = vld [vmem:[%s4713_s5 + $0x98] sm:$0xff]  }
 0x22b   : > { %v3671_v56 = vpop.f32.mrf.mxu0  ;;  %v1961_v57 = vld [vmem:[#allocation3 + $0x4] sm:$0xf] }
 0x22c   : > { %v2259_v58 = vld [vmem:[#allocation3 + $0x4] sm:$0xf]  ;;  %1940 = vst.msk [vmem:[#allocation3 + $0xc] sm:$0xf] %vm1936_vm6, %v3341_v54  ;;  %v1914_v59 = vmax.f32 %v1909_v55, 0.0  ;;  %v3256_v60 = vcombine.low %v1960_v39, %v1961_v57  ;;  %v3270_v5 = vcombine.low %v2157_v4, %v1961_v57 }
 0x22d   : > { %v3278_v34 = vcombine.low %v2258_v61, %v2259_v58  ;;  %v2574_v57 = vld [vmem:[#allocation3 + $0x4] sm:$0x8]  ;;  %v3974_v61 = vld [vmem:[%s4713_s5 + $0x90] sm:$0xff]   ;;  %vm2911_vm6 = vsmask.f32 4368 }
 0x22e   : > { %v3342_v0 = vpack.c.bf16 %v1914_v59, %v1914_v59  ;;  %3720 = vmatprep.mubr.msk.bf16.mxu1 %vm2018_vm8, %v3256_v60  ;;  %v1982_v2 = vshll.u32 %v3256_v60, 16  ;;  %v1980_v14 = vshrl.u32 %v3256_v60, 16  ;;  %v3973_v59 = vld [vmem:[%s4713_s5 + $0xa8] sm:$0xff]  }
 0x22f   : > { %v3956_v10 = vld [vmem:[#allocation3 + $0x8] ss:$0 sps:$4 sm:$0x77]   ;;  %v2273_v33 = vshrl.u32 %v3278_v34, 16  ;;  %v2276_v20 = vshll.u32 %v3278_v34, 16 }
 0x230   : > { %v1944_v13 = vsel %vm4537_vm9, %v3342_v0, %v1943_v62  ;;  %v1984_v15 = vrot.slane %v1982_v2, 1  ;;  %v4547_v16 = vld [vmem:[#allocation3 + $0x8] ss:$0 sps:$4 sm:$0xff]   ;;  %3721 = vmatmul.mubr.msk.bf16.vlgmr.msra.gmra.mxu1 %vm2018_vm8, %v3956_v10  ;;  %v1987_v17 = vshll.u32 %v3956_v10, 16  ;;  %v1991_v18 = vshrl.u32 %v3956_v10, 16  ;;  %v3976_v10 = vld [vmem:[%s4713_s5 + $0x88] sm:$0xff]  }
 0x231   : > { %1945 = vst [vmem:[#allocation3 + $0x10] sm:$0x3] %v1944_v13  ;;  %v2260_v3 = vld [vmem:[#allocation3 + $0x8] sm:$0xf]  ;;  %3737 = vmatpush3.bf16.msra.mxu1 %v4517_v37  ;;  %v2167_v23 = vrot.slane %v4547_v16, 1  ;;  %v2166_v37 = vrot.slane %v3270_v5, 1 }
 0x232   : > { %v1985_v7 = vor.u32 %v1984_v15, %v1980_v14  ;;  %v4554_v21 = vcombine.low %v2259_v58, %v2260_v3  ;;  %3738 = vmatprep.subr.bf16.mxu1 %v3957_v11  ;;  %v1989_v22 = vrot.slane %v1987_v17, 1  ;;  %v2275_v28 = vrot.slane %v2273_v33, 3  ;;  %v4601_v54 = vld [vmem:[#allocation3 + $0x8] sm:$0xf]  ;;  %v3977_v14 = vld [vmem:[%s4713_s5 + $0xf8] sm:$0xff]  }
 0x233   : > { %v2261_v24 = vld [vmem:[#allocation3 + $0xc] sm:$0x3]  ;;  %v2278_v29 = vrot.slane %v2276_v20, 4  ;;  %v2168_v35 = vsel %vm2165_vm12, %v2166_v37, %v2167_v23  ;;  %v3300_v60 = vcombine.low %v2574_v57, %v4601_v54  ;;  %v3982_v20 = vld [vmem:[%s4713_s5 + $0xd8] sm:$0xff]  }
 0x234   : > { %v3279_v25 = vcombine.low %v2260_v3, %v2261_v24  ;;  %v1990_v26 = vsel %vm376_vm0, %v1985_v7, %v1989_v22  ;;  %v1993_v9 = vor.u32 %v1991_v18, %v1989_v22  ;;  %v4561_v8 = vld [vmem:[#allocation3 + $0xc] ss:$0 sps:$4 sm:$0x77]   ;;  %v2474_v12 = vshll.u32 %v4554_v21, 16  ;;  %v3981_v18 = vld [vmem:[%s4713_s5 + $0xf0] sm:$0xff]   ;;  %v3983_v22 = vld [vmem:[%s4713_s5 + $0xe8] sm:$0xff]  }
 0x235   : > { %3739 = vmatpush3.bf16.msra.mxu1 %v3957_v11  ;;  %3708 = vmatprep.mubr.msk.bf16.mxu0 %vm2018_vm8, %v1990_v26  ;;  %v2478_v45 = vshll.u32 %v4561_v8, 16  ;;  %v2279_v48 = vor.u32 %v2278_v29, %v2275_v28  ;;  %v2472_v50 = vshrl.u32 %v4554_v21, 16  ;;  %v4605_v56 = vld [vmem:[#allocation3 + $0xc] sm:$0xf]  ;;  %v2682_v2 = vshrl.u32 %v3300_v60, 16  ;;  %v3984_v24 = vld [vmem:[%s4713_s5 + $0xd0] sm:$0xff]  }
 0x236   : > { %v2281_v30 = vshrl.u32 %v3279_v25, 16  ;;  %v2284_v31 = vshll.u32 %v3279_v25, 16  ;;  %3709 = vmatmul.mubr.msk.bf16.vlgmr.msra.gmra.mxu0 %vm2018_vm8, %v1993_v9  ;;  %3740 = vmatprep.subr.bf16.mxu1 %v3961_v19  ;;  %v2476_v44 = vrot.slane %v2474_v12, 1  ;;  %v3975_v0 = vld [vmem:[%s4713_s5 + $0xa0] sm:$0xff]   ;;  %v2685_v4 = vshll.u32 %v3300_v60, 16  ;;  %v3986_v9 = vld [vmem:[%s4713_s5 + $0xc8] sm:$0xff]  }
 0x237   : > { %3725 = vmatpush3.bf16.msra.mxu0 %v4526_v42  ;;  %3732 = vmatprep.mubr.msk.bf16.mxu0 %vm2018_vm8, %v2168_v35  ;;  %v3967_v42 = vld [vmem:[%s4713_s5 + $0xb8] sm:$0xff]   ;;  %v2480_v52 = vrot.slane %v2478_v45, 1  ;;  %v2684_v15 = vrot.slane %v2682_v2, 3  ;;  %v2482_v17 = vshrl.u32 %v4561_v8, 16  ;;  %v3980_v3 = vld [vmem:[%s4713_s5 + $0x80] sm:$0xff]   ;;  %v3314_v12 = vcombine.low %v4601_v54, %v4605_v56 }
 0x238   : > { %v1949_v32 = vld [vmem:[#allocation3 + $0x10] sm:$0x6]  ;;  %v2283_v36 = vrot.slane %v2281_v30, 3  ;;  %v2286_v40 = vrot.slane %v2284_v31, 4  ;;  %3726 = vmatprep.subr.bf16.mxu0 %v3962_v6  ;;  %v2477_v46 = vor.u32 %v2476_v44, %v2472_v50  ;;  %v2687_v16 = vrot.slane %v2685_v4, 4  ;;  %v3985_v26 = vld [vmem:[%s4713_s5 + $0xe0] sm:$0xff]  }
 0x239   : > { %v1950_v41 = vsel %vm4566_vm13, 0, %v1949_v32  ;;  %3741 = vmatpush3.bf16.msra.mxu1 %v3961_v19  ;;  %v2484_v33 = vor.u32 %v2482_v17, %v2480_v52  ;;  %v3987_v37 = vld [vmem:[%s4713_s5 + $0xc0] sm:$0xff]   ;;  %v3993_v29 = vld [vmem:[#allocation3 + $0x10] ss:$0 sps:$4 sm:$0x77]  }
 0x23a   : > { %1951 = vst [vmem:[#allocation3 + $0x10] sm:$0x6] %v1950_v41  ;;  %v2287_v49 = vor.u32 %v2286_v40, %v2283_v36  ;;  %3742 = vmatprep.subr.bf16.mxu1 %v3963_v1  ;;  %v2481_v55 = vsel %vm376_vm0, %v2477_v46, %v2480_v52  ;;  %v2688_v7 = vor.u32 %v2687_v16, %v2684_v15  ;;  %v3992_v28 = vld [vmem:[%s4713_s5 + $0x100] sm:$0xff]   ;;  %vm2943_vm0 = vcmask 1042434  }
 0x23b   : > { %3727 = vmatpush3.bf16.msra.mxu0 %v3962_v6  ;;  %v3988_v6 = vld [vmem:[%s4713_s5 + $0x118] sm:$0xff]   ;;  %vm2944_vm3 = vmor %vm2942_vm15, %vm2943_vm0 }
 0x23c   : > { %v2288_v38 = vsel %vm815_vm1, %v2279_v48, %v2287_v49  ;;  %3728 = vmatprep.subr.bf16.mxu0 %v3966_v43  ;;  %vm2946_vm7 = vmor %vm2944_vm3, %vm2945_vm4 }
 0x23d   : > { %3744 = vmatprep.mubr.msk.bf16.mxu1 %vm2018_vm8, %v2288_v38  ;;  %3743 = vmatpush3.bf16.msra.mxu1 %v3963_v1 }
 0x23e   : > { %3760 = vmatprep.subr.bf16.mxu1 %v3967_v42 }
 0x23f   : > { %3729 = vmatpush3.bf16.msra.mxu0 %v3966_v43 }
 0x240   : > { %3745 = vmatmul.mubr.msk.bf16.vlgmr.msra.gmra.mxu1 %vm2018_vm8, %v2287_v49  ;;  %3730 = vmatprep.subr.bf16.mxu0 %v3970_v51 }
 0x241   : > { %v2577_v39 = vld [vmem:[#allocation3 + $0x10] sm:$0x3]  ;;  %3761 = vmatpush3.bf16.msra.mxu1 %v3967_v42  ;;  %3768 = vmatprep.mubr.msk.bf16.mxu1 %vm2018_vm8, %v2481_v55 }
 0x242   : > { %v4609_v58 = vcombine.low %v4605_v56, %v2577_v39  ;;  %3762 = vmatprep.subr.bf16.mxu1 %v3971_v53 }
 0x243   : > { %3731 = vmatpush3.bf16.msra.mxu0 %v3970_v51 }
 0x244   : > { %3748 = vmatprep.subr.bf16.mxu0 %v3972_v47  ;;  %v2690_v62 = vshrl.u32 %v4609_v58, 16  ;;  %v2693_v34 = vshll.u32 %v4609_v58, 16 }
 0x245   : > { %3763 = vmatpush3.bf16.msra.mxu1 %v3971_v53 }
 0x246   : > { %3733 = vmatmul.mubr.msk.bf16.vlgmr.msra.gmra.mxu0 %vm2018_vm8, %v2167_v23  ;;  %3764 = vmatprep.subr.bf16.mxu1 %v3973_v59  ;;  %v2692_v11 = vrot.slane %v2690_v62, 3  ;;  %v2695_v13 = vrot.slane %v2693_v34, 4  ;;  %v2589_v23 = vrot.slane %v3300_v60, 3 }
 0x247   : > { %3749 = vmatpush3.bf16.msra.mxu0 %v3972_v47  ;;  %3756 = vmatprep.mubr.msk.bf16.mxu0 %vm2018_vm8, %v4554_v21  ;;  %v2590_v21 = vrot.slane %v4609_v58, 3 }
 0x248   : > { %3750 = vmatprep.subr.bf16.mxu0 %v3974_v61  ;;  %v2696_v5 = vor.u32 %v2695_v13, %v2692_v11 }
 0x249   : > { %3765 = vmatpush3.bf16.msra.mxu1 %v3973_v59  ;;  %v2591_v25 = vsel %vm2588_vm14, %v2589_v23, %v2590_v21 }
 0x24a   : > { %3766 = vmatprep.subr.bf16.mxu1 %v3975_v0  ;;  %v2697_v19 = vsel %vm815_vm1, %v2688_v7, %v2696_v5  ;;  %vm2908_vm1 = vsmask.f32 256 }
 0x24b   : > { %3751 = vmatpush3.bf16.msra.mxu0 %v3974_v61  ;;  %vm2910_vm5 = vmor %vm2908_vm1, %vm2909_vm2 }
 0x24c   : > { %3752 = vmatprep.subr.bf16.mxu0 %v3976_v10  ;;  %vm2912_vm10 = vmor %vm2910_vm5, %vm2911_vm6 }
 0x24d   : > { %3767 = vmatpush3.bf16.msra.mxu1 %v3975_v0  ;;  %vm2914_vm13 = vmor %vm2912_vm10, %vm2913_vm11 }
 0x24e   : > { %3784 = vmatprep.subr.bf16.mxu1 %v3977_v14 }
 0x24f   : > { %3753 = vmatpush3.bf16.msra.mxu0 %v3976_v10 }
 0x250   : > { %3769 = vmatmul.mubr.msk.bf16.vlgmr.msra.gmra.mxu1 %vm2018_vm8, %v2484_v33  ;;  %3754 = vmatprep.subr.bf16.mxu0 %v3980_v3 }
 0x251   : > { %3785 = vmatpush3.bf16.msra.mxu1 %v3977_v14  ;;  %3792 = vmatprep.mubr.msk.bf16.mxu1 %vm2018_vm8, %v2697_v19 }
 0x252   : > { %3786 = vmatprep.subr.bf16.mxu1 %v3981_v18 }
 0x253   : > { %3755 = vmatpush3.bf16.msra.mxu0 %v3980_v3 }
 0x254   : > { %3772 = vmatprep.subr.bf16.mxu0 %v3982_v20 }
 0x255   : > { %3787 = vmatpush3.bf16.msra.mxu1 %v3981_v18 }
 0x256   : > { %3757 = vmatmul.mubr.msk.bf16.vlgmr.msra.gmra.mxu0 %vm2018_vm8, %v4561_v8  ;;  %3788 = vmatprep.subr.bf16.mxu1 %v3983_v22  ;;  %v3990_v8 = vld [vmem:[%s4713_s5 + $0x110] sm:$0xff]  }
 0x257   : > { %3773 = vmatpush3.bf16.msra.mxu0 %v3982_v20  ;;  %3780 = vmatprep.mubr.msk.bf16.mxu0 %vm2018_vm8, %v2591_v25 }
 0x258   : > { %3774 = vmatprep.subr.bf16.mxu0 %v3984_v24 }
 0x259   : > { %3789 = vmatpush3.bf16.msra.mxu1 %v3983_v22  ;;  %v3322_v22 = vld [vmem:[%s4714_s6] ss:$0 sm:$0xff] }
 0x25a   : > { %3790 = vmatprep.subr.bf16.mxu1 %v3985_v26 }
 0x25b   : > { %3775 = vmatpush3.bf16.msra.mxu0 %v3984_v24 }
 0x25c   : > { %3776 = vmatprep.subr.bf16.mxu0 %v3986_v9 }
 0x25d   : > { %3791 = vmatpush3.bf16.msra.mxu1 %v3985_v26  ;;  %v4004_v26 = vmov 1983009808  }
 0x25f   : > { %3777 = vmatpush3.bf16.msra.mxu0 %v3986_v9  ;;  %v2894_v9 = vunpack.c.l.s4 %v4004_v26 }
 0x260   : > { %3793 = vmatmul.mubr.msk.bf16.vlgmr.msra.gmra.mxu1 %vm2018_vm8, %v2696_v5  ;;  %3778 = vmatprep.subr.bf16.mxu0 %v3987_v37 }
 0x263   : > { %3779 = vmatpush3.bf16.msra.mxu0 %v3987_v37  ;;  %v2896_v37 = vlaneseq }
 0x264   : > { %3796 = vmatprep.subr.bf16.mxu0 %v3988_v6 }
 0x266   : > { %3781 = vmatmul.mubr.msk.bf16.vlgmr.msra.gmra.mxu0 %vm2018_vm8, %v2590_v21 }
 0x267   : > { %3797 = vmatpush3.bf16.msra.mxu0 %v3988_v6  ;;  %3804 = vmatprep.mubr.msk.bf16.mxu0 %vm2018_vm8, %v3314_v12 }
 0x268   : > { %3798 = vmatprep.subr.bf16.mxu0 %v3990_v8 }
 0x26b   : > { %3799 = vmatpush3.bf16.msra.mxu0 %v3990_v8 }
 0x26c   : > { %3800 = vmatprep.subr.bf16.mxu0 %v3991_v27 }
 0x26f   : > { %3801 = vmatpush3.bf16.msra.mxu0 %v3991_v27 }
 0x270   : > { %3802 = vmatprep.subr.bf16.mxu0 %v3992_v28 }
 0x273   : > { %3803 = vmatpush3.bf16.msra.mxu0 %v3992_v28 }
 0x276   : > { %3805 = vmatmul.mubr.msk.bf16.vlgmr.msra.gmra.mxu0 %vm2018_vm8, %v3993_v29  ;;  %vm2947_vm8 = vcmask 1046534  }
 0x277   : > { %vm2948_vm12 = vmor %vm2946_vm7, %vm2947_vm8 }
 0x2f0   : > { %v3722_v30 = vpop.f32.mrf.mxu1 }
 0x2f2   : > { %v2135_v31 = vpop.f32.mrf.mxu1 }
 0x2f4   : > { %v3723_v35 = vpop.f32.mrf.mxu1 }
 0x2f5   : > { %v2897_v35 = vshrl.u32 %v2896_v37, 7 }
 0x2f6   : > { %v3710_v1 = vpop.f32.mrf.mxu0  ;;  %v2138_v40 = vpop.f32.mrf.mxu1 }
 0x2f7   : > { %v2144_v57 = vadd.f32 %v3722_v30, %v3710_v1 }
 0x2f8   : > { %v2059_v32 = vpop.f32.mrf.mxu0 }
 0x2f9   : > { %v2136_v60 = vadd.f32 %v2135_v31, %v2059_v32  ;;  %v2895_v31 = vunpack.c.0.s8 %v2894_v9 }
 0x2fa   : > { %v3711_v36 = vpop.f32.mrf.mxu0 }
 0x2fc   : > { %v2062_v44 = vpop.f32.mrf.mxu0 }
 0x2fd   : > { %v2139_v2 = vadd.f32 %v2138_v40, %v2062_v44 }
 0x300   : > { %v3746_v41 = vpop.f32.mrf.mxu1 }
 0x302   : > { %v2353_v43 = vpop.f32.mrf.mxu1 }
 0x304   : > { %v3747_v45 = vpop.f32.mrf.mxu1 }
 0x306   : > { %v3734_v48 = vpop.f32.mrf.mxu0  ;;  %v2356_v50 = vpop.f32.mrf.mxu1 }
 0x307   : > { %v2249_v61 = vadd.f32 %v3734_v48, %v2144_v57  ;;  %v2888_v48 = vld [vmem:[%s4691_s10] sm:$0x3] }
 0x308   : > { %v2233_v49 = vpop.f32.mrf.mxu0 }
 0x309   : > { %v2247_v34 = vadd.f32 %v2233_v49, %v2136_v60  ;;  %v2369_v4 = vadd.f32 %v3746_v41, %v2249_v61  ;;  %v3325_v61 = vld [vmem:[%s4691_s10 + $0x2] sm:$0x3] }
 0x30a   : > { %v3735_v42 = vpop.f32.mrf.mxu0 }
 0x30b   : > { %v2367_v14 = vadd.f32 %v2353_v43, %v2247_v34  ;;  %v2898_v43 = vsub.s32 %v2895_v31, %v2897_v35 }
 0x30c   : > { %v2236_v52 = vpop.f32.mrf.mxu0 }
 0x30d   : > { %v2248_v11 = vadd.f32 %v2236_v52, %v2139_v2 }
 0x30f   : > { %v2368_v16 = vadd.f32 %v2356_v50, %v2248_v11 }
 0x310   : > { %v3770_v38 = vpop.f32.mrf.mxu1 }
 0x312   : > { %v2549_v46 = vpop.f32.mrf.mxu1 }
 0x314   : > { %v3771_v51 = vpop.f32.mrf.mxu1 }
 0x316   : > { %v3758_v53 = vpop.f32.mrf.mxu0  ;;  %v2552_v55 = vpop.f32.mrf.mxu1 }
 0x317   : > { %v2463_v13 = vadd.f32 %v3758_v53, %v2369_v4 }
 0x318   : > { %v2447_v47 = vpop.f32.mrf.mxu0 }
 0x319   : > { %v2461_v15 = vadd.f32 %v2447_v47, %v2367_v14  ;;  %v2565_v17 = vadd.f32 %v3770_v38, %v2463_v13 }
 0x31a   : > { %v3759_v54 = vpop.f32.mrf.mxu0 }
 0x31b   : > { %v2563_v33 = vadd.f32 %v2549_v46, %v2461_v15 }
 0x31c   : > { %v2450_v58 = vpop.f32.mrf.mxu0 }
 0x31d   : > { %v2462_v5 = vadd.f32 %v2450_v58, %v2368_v16  ;;  %v3328_v58 = vld [vmem:[%s4691_s10 + $0x4] sm:$0x3] }
 0x31f   : > { %v2564_v19 = vadd.f32 %v2552_v55, %v2462_v5 }
 0x320   : > { %v3794_v56 = vpop.f32.mrf.mxu1 }
 0x322   : > { %v2762_v39 = vpop.f32.mrf.mxu1 }
 0x324   : > { %v3795_v59 = vpop.f32.mrf.mxu1 }
 0x326   : > { %v3782_v62 = vpop.f32.mrf.mxu0  ;;  %v2765_v27 = vpop.f32.mrf.mxu1 }
 0x327   : > { %v2672_v3 = vadd.f32 %v3782_v62, %v2565_v17 }
 0x328   : > { %v2656_v0 = vpop.f32.mrf.mxu0 }
 0x329   : > { %v2670_v7 = vadd.f32 %v2656_v0, %v2563_v33  ;;  %v2778_v20 = vadd.f32 %v3794_v56, %v2672_v3 }
 0x32a   : > { %v3783_v10 = vpop.f32.mrf.mxu0 }
 0x32b   : > { %v2776_v25 = vadd.f32 %v2762_v39, %v2670_v7 }
 0x32c   : > { %v2659_v18 = vpop.f32.mrf.mxu0 }
 0x32d   : > { %v2671_v23 = vadd.f32 %v2659_v18, %v2564_v19 }
 0x32f   : > { %v2777_v29 = vadd.f32 %v2765_v27, %v2671_v23 }
 0x336   : > { %v3806_v21 = vpop.f32.mrf.mxu0 }
 0x337   : > { %v2872_v24 = vadd.f32 %v3806_v21, %v2778_v20 }
 0x338   : > { %v2856_v6 = vpop.f32.mrf.mxu0 }
 0x339   : > { %v2882_v8 = vadd.f32 %v3322_v22, %v2872_v24  ;;  %v2870_v12 = vadd.f32 %v2856_v6, %v2776_v25 }
 0x33a   : > { %v3807_v28 = vpop.f32.mrf.mxu0 }
 0x33b   : > { %v2885_v30 = vmax.f32 %v2882_v8, 0.0  ;;  %v2880_v32 = vadd.f32 %v3322_v22, %v2870_v12 }
 0x33c   : > { %v2859_v1 = vpop.f32.mrf.mxu0 }
 0x33d   : > { %v2871_v36 = vadd.f32 %v2859_v1, %v2777_v29  ;;  %v2887_v41 = vpack.c.bf16 %v2885_v30, %v2885_v30  ;;  %v2883_v44 = vmax.f32 %v2880_v32, 0.0 }
 0x33f   : > { %v2881_v40 = vadd.f32 %v3322_v22, %v2871_v36  ;;  %v2941_v50 = vrot.slane %v2887_v41, %v2898_v43 }
 0x341   : > { %v2884_v45 = vmax.f32 %v2881_v40, 0.0  ;;  %v2951_v54 = vrot.slane %v2941_v50, 7 }
 0x343   : > { %v2886_v49 = vpack.c.bf16 %v2884_v45, %v2883_v44  ;;  %v3323_v42 = vpack.c.bf16 %v2884_v45, %v2884_v45 }
 0x345   : > { %v2889_v38 = vsel %vm4537_vm9, %v2886_v49, %v2888_v48  ;;  %v2899_v46 = vrot.slane %v2886_v49, %v2898_v43  ;;  %v2906_v52 = vrot.slane %v3323_v42, %v2898_v43 }
 0x346   : > { %2890 = vst [vmem:[%s4691_s10] sm:$0x3] %v2889_v38 }
 0x347   : > { %v2907_v51 = vcombine.high %v2899_v46, %v2899_v46  ;;  %v2921_v53 = vshrl.u32 %v2906_v52, 16  ;;  %v2934_v47 = vcombine.high %v2906_v52, %v2906_v52  ;;  %v2924_v39 = vshll.u32 %v2906_v52, 16 }
 0x349   : > { %v2916_v55 = vshrl.u32 %v2907_v51, 16  ;;  %v2923_v56 = vrot.slane %v2921_v53, 7  ;;  %v3327_v57 = vrot.slane %v2934_v47, 9 }
 0x34b   : > { %v3324_v59 = vrot.slane %v2916_v55, 9  ;;  %v2926_v60 = vor.u32 %v2924_v39, %v2923_v56  ;;  %v2952_v62 = vsel %vm2948_vm12, %v3327_v57, %v2951_v54 }
 0x34c   : > { %v2956_v34 = vsel %vm4537_vm9, %v2952_v62, %v3328_v58 }
 0x34d   : > { %v2927_v0 = vsel %vm2914_vm13, %v3324_v59, %v2926_v60  ;;  %3329 = vst [vmem:[%s4691_s10 + $0x4] sm:$0x3] %v2956_v34 }
 0x34e   : > { %v2931_v2 = vsel %vm4537_vm9, %v2927_v0, %v3325_v61 }
 0x34f   : > { %3326 = vst [vmem:[%s4691_s10 + $0x2] sm:$0x3] %v2931_v2 }
 0x350 PF: > { %s17_s24 = sadd.s32 1, %s4000_s24  }
 0x351   : > { %p14_p4 = scmp.ge.s32.totalorder %s17_s24, 4  }
 0x353   :  { %16 = sbr.rel (!%p14_p4) target bundleno = 1 (0x1), region = 83 }

// kernel: dueling_dqn_forward.3
= control target key start
LH: loop header
LB: loop body
LE: loop exit
PB: predicated region body
PF: predicated region fallthrough
CT: control target
= control target key end

     0   :  { %v313_v32 = vlaneseq  ;;  %v3602_v33 = vmov 1966171168   ;;  %vm1837_vm0 = vcmask 523264   ;;  %s4798_s0 = inlined_call_operand.vmem [shape: bf16[2,576], index: 0, kind: input, shape index: {}]   ;;  %s4799_s1 = inlined_call_operand.vmem [shape: bf16[576,1024], index: 1, kind: input, shape index: {}]   ;;  %s4800_s2 = inlined_call_operand.vmem [shape: f32[1,1024], index: 2, kind: input, shape index: {}]   ;;  %s4801_s3 = inlined_call_operand.vmem [shape: bf16[1024,7], index: 3, kind: input, shape index: {}]   ;;  %s4802_s4 = inlined_call_operand.vmem [shape: f32[1,7], index: 4, kind: input, shape index: {}]   ;;  %s4803_s5 = inlined_call_operand.hbm [shape: f32[2,6], index: 5, kind: output, shape index: {}]  }
   0x1   :  { %v79_v0 = vld [vmem:[%s4799_s1 + $0x1c0] sm:$0xff]  ;;  %v356_v34 = vunpack.c.l.s4 %v3602_v33 }
   0x2   :  { %v83_v1 = vld [vmem:[%s4799_s1 + $0x1e0] sm:$0xff]  ;;  %v3702_v43 = vshrl.u32 %v313_v32, 7 }
   0x3   :  { %v207_v2 = vld [vmem:[%s4799_s1 + $0x5c0] sm:$0xff]  ;;  %v3120_v3 = vcombine.high %v79_v0, %v83_v1  ;;  %v3119_v5 = vcombine.low %v79_v0, %v83_v1  ;;  %v357_v44 = vunpack.c.0.s8 %v356_v34 }
   0x4   :  { %v211_v4 = vld [vmem:[%s4799_s1 + $0x5e0] sm:$0xff] }
   0x5   :  { %v71_v6 = vld [vmem:[%s4799_s1 + $0x180] sm:$0xff]  ;;  %v3248_v8 = vcombine.high %v207_v2, %v211_v4  ;;  %v3247_v9 = vcombine.low %v207_v2, %v211_v4  ;;  %1841 = vmatprep.subr.bf16.mxu0 %v3120_v3  ;;  %v3717_v53 = vsub.s32 %v357_v44, %v3702_v43 }
   0x6   :  { %v75_v7 = vld [vmem:[%s4799_s1 + $0x1a0] sm:$0xff]  ;;  %1842 = vmatpush1.bf16.msra.mxu0 %v3119_v5 }
   0x7   :  { %v3112_v10 = vcombine.high %v71_v6, %v75_v7  ;;  %v199_v11 = vld [vmem:[%s4799_s1 + $0x580] sm:$0xff]  ;;  %1882 = vmatprep.subr.bf16.mxu1 %v3248_v8  ;;  %v3111_v18 = vcombine.low %v71_v6, %v75_v7 }
   0x8   :  { %v203_v12 = vld [vmem:[%s4799_s1 + $0x5a0] sm:$0xff]  ;;  %1883 = vmatpush1.bf16.msra.mxu1 %v3247_v9 }
   0x9   :  { %v63_v13 = vld [vmem:[%s4799_s1 + $0x140] sm:$0xff]  ;;  %v3240_v14 = vcombine.high %v199_v11, %v203_v12  ;;  %1843 = vmatprep.subr.bf16.mxu0 %v3112_v10  ;;  %v3239_v19 = vcombine.low %v199_v11, %v203_v12 }
   0xa   :  { %v67_v15 = vld [vmem:[%s4799_s1 + $0x160] sm:$0xff]  ;;  %1844 = vmatpush1.bf16.msra.mxu0 %v3111_v18 }
   0xb   :  { %v191_v16 = vld [vmem:[%s4799_s1 + $0x540] sm:$0xff]  ;;  %v3104_v20 = vcombine.high %v63_v13, %v67_v15  ;;  %1884 = vmatprep.subr.bf16.mxu1 %v3240_v14  ;;  %v3103_v26 = vcombine.low %v63_v13, %v67_v15 }
   0xc   :  { %v195_v17 = vld [vmem:[%s4799_s1 + $0x560] sm:$0xff]  ;;  %1885 = vmatpush1.bf16.msra.mxu1 %v3239_v19 }
   0xd   :  { %v3232_v21 = vcombine.high %v191_v16, %v195_v17  ;;  %v55_v22 = vld [vmem:[%s4799_s1 + $0x100] sm:$0xff]  ;;  %1845 = vmatprep.subr.bf16.mxu0 %v3104_v20  ;;  %v3231_v27 = vcombine.low %v191_v16, %v195_v17 }
   0xe   :  { %v59_v23 = vld [vmem:[%s4799_s1 + $0x120] sm:$0xff]  ;;  %1846 = vmatpush1.bf16.msra.mxu0 %v3103_v26 }
   0xf   :  { %v183_v24 = vld [vmem:[%s4799_s1 + $0x500] sm:$0xff]  ;;  %v3096_v28 = vcombine.high %v55_v22, %v59_v23  ;;  %1886 = vmatprep.subr.bf16.mxu1 %v3232_v21  ;;  %v3095_v37 = vcombine.low %v55_v22, %v59_v23 }
  0x10   :  { %v187_v25 = vld [vmem:[%s4799_s1 + $0x520] sm:$0xff]  ;;  %1887 = vmatpush1.bf16.msra.mxu1 %v3231_v27 }
  0x11   :  { %v3224_v29 = vcombine.high %v183_v24, %v187_v25  ;;  %v47_v30 = vld [vmem:[%s4799_s1 + $0xc0] sm:$0xff]  ;;  %1847 = vmatprep.subr.bf16.mxu0 %v3096_v28  ;;  %v3223_v38 = vcombine.low %v183_v24, %v187_v25 }
  0x12   :  { %v51_v31 = vld [vmem:[%s4799_s1 + $0xe0] sm:$0xff]  ;;  %1848 = vmatpush1.bf16.msra.mxu0 %v3095_v37 }
  0x13   :  { %v175_v35 = vld [vmem:[%s4799_s1 + $0x4c0] sm:$0xff]  ;;  %v3088_v39 = vcombine.high %v47_v30, %v51_v31  ;;  %1888 = vmatprep.subr.bf16.mxu1 %v3224_v29  ;;  %v3087_v47 = vcombine.low %v47_v30, %v51_v31 }
  0x14   :  { %v179_v36 = vld [vmem:[%s4799_s1 + $0x4e0] sm:$0xff]  ;;  %1889 = vmatpush1.bf16.msra.mxu1 %v3223_v38 }
  0x15   :  { %v3216_v40 = vcombine.high %v175_v35, %v179_v36  ;;  %v39_v41 = vld [vmem:[%s4799_s1 + $0x80] sm:$0xff]  ;;  %1849 = vmatprep.subr.bf16.mxu0 %v3088_v39  ;;  %v3215_v48 = vcombine.low %v175_v35, %v179_v36 }
  0x16   :  { %v43_v42 = vld [vmem:[%s4799_s1 + $0xa0] sm:$0xff]  ;;  %1850 = vmatpush1.bf16.msra.mxu0 %v3087_v47 }
  0x17   :  { %v167_v45 = vld [vmem:[%s4799_s1 + $0x480] sm:$0xff]  ;;  %v3080_v49 = vcombine.high %v39_v41, %v43_v42  ;;  %1890 = vmatprep.subr.bf16.mxu1 %v3216_v40  ;;  %v3079_v56 = vcombine.low %v39_v41, %v43_v42 }
  0x18   :  { %v171_v46 = vld [vmem:[%s4799_s1 + $0x4a0] sm:$0xff]  ;;  %1891 = vmatpush1.bf16.msra.mxu1 %v3215_v48 }
  0x19   :  { %v3208_v50 = vcombine.high %v167_v45, %v171_v46  ;;  %v31_v51 = vld [vmem:[%s4799_s1 + $0x40] sm:$0xff]  ;;  %1851 = vmatprep.subr.bf16.mxu0 %v3080_v49  ;;  %v3207_v57 = vcombine.low %v167_v45, %v171_v46 }
  0x1a   :  { %v35_v52 = vld [vmem:[%s4799_s1 + $0x60] sm:$0xff]  ;;  %1852 = vmatpush1.bf16.msra.mxu0 %v3079_v56 }
  0x1b   :  { %v159_v54 = vld [vmem:[%s4799_s1 + $0x440] sm:$0xff]  ;;  %v3072_v58 = vcombine.high %v31_v51, %v35_v52  ;;  %1892 = vmatprep.subr.bf16.mxu1 %v3208_v50  ;;  %v3071_v2 = vcombine.low %v31_v51, %v35_v52 }
  0x1c   :  { %v163_v55 = vld [vmem:[%s4799_s1 + $0x460] sm:$0xff]  ;;  %1893 = vmatpush1.bf16.msra.mxu1 %v3207_v57 }
  0x1d   :  { %v3728_v59 = vld [vmem:[%s4798_s0] sm:$0x1f]  ;;  %v3200_v60 = vcombine.high %v159_v54, %v163_v55  ;;  %1853 = vmatprep.subr.bf16.mxu0 %v3072_v58  ;;  %v3199_v4 = vcombine.low %v159_v54, %v163_v55 }
  0x1e   :  { %v23_v61 = vld [vmem:[%s4799_s1] sm:$0xff]  ;;  %v3738_v63 = vrot.slane %v3728_v59, %v3717_v53  ;;  %1854 = vmatpush1.bf16.msra.mxu0 %v3071_v2 }
  0x1f   :  { %v27_v62 = vld [vmem:[%s4799_s1 + $0x20] sm:$0xff]  ;;  %1894 = vmatprep.subr.bf16.mxu1 %v3200_v60 }
  0x20   :  { %v151_v0 = vld [vmem:[%s4799_s1 + $0x400] sm:$0xff]  ;;  %v369_v3 = vcombine.high %v3738_v63, %v3738_v63  ;;  %v3064_v5 = vcombine.high %v23_v61, %v27_v62  ;;  %v3063_v12 = vcombine.low %v23_v61, %v27_v62  ;;  %1895 = vmatpush1.bf16.msra.mxu1 %v3199_v4 }
  0x21   :  { %v155_v1 = vld [vmem:[%s4799_s1 + $0x420] sm:$0xff] }
  0x22   :  { %v3192_v6 = vcombine.high %v151_v0, %v155_v1  ;;  %v143_v7 = vld [vmem:[%s4799_s1 + $0x3c0] sm:$0xff]  ;;  %v3755_v9 = vrot.slane %v369_v3, %v3717_v53  ;;  %1855 = vmatprep.subr.bf16.mxu0 %v3064_v5  ;;  %v3191_v14 = vcombine.low %v151_v0, %v155_v1 }
  0x23   :  { %v147_v8 = vld [vmem:[%s4799_s1 + $0x3e0] sm:$0xff]  ;;  %1856 = vmatpush1.bf16.msra.mxu0 %v3063_v12 }
  0x24   :  { %v271_v10 = vld [vmem:[%s4799_s1 + $0x7c0] sm:$0xff]  ;;  %1873 = vmatprep.mubr.bf16.mxu0 %v3755_v9  ;;  %v3766_v13 = vcombine.high %v3755_v9, %v3755_v9  ;;  %v3184_v15 = vcombine.high %v143_v7, %v147_v8  ;;  %1896 = vmatprep.subr.bf16.mxu1 %v3192_v6  ;;  %v3183_v21 = vcombine.low %v143_v7, %v147_v8 }
  0x25   :  { %v275_v11 = vld [vmem:[%s4799_s1 + $0x7e0] sm:$0xff]  ;;  %1897 = vmatpush1.bf16.msra.mxu1 %v3191_v14 }
  0x26   :  { %v3312_v16 = vcombine.high %v271_v10, %v275_v11  ;;  %v135_v17 = vld [vmem:[%s4799_s1 + $0x380] sm:$0xff]  ;;  %1914 = vmatprep.mubr.bf16.mxu1 %v3766_v13  ;;  %1857 = vmatprep.subr.bf16.mxu0 %v3184_v15  ;;  %v3311_v22 = vcombine.low %v271_v10, %v275_v11 }
  0x27   :  { %v139_v18 = vld [vmem:[%s4799_s1 + $0x3a0] sm:$0xff]  ;;  %1858 = vmatpush2.bf16.msra.mxu0 %v3183_v21 }
  0x28   :  { %v263_v19 = vld [vmem:[%s4799_s1 + $0x780] sm:$0xff]  ;;  %v3176_v23 = vcombine.high %v135_v17, %v139_v18  ;;  %1898 = vmatprep.subr.bf16.mxu1 %v3312_v16  ;;  %v3175_v29 = vcombine.low %v135_v17, %v139_v18  ;;  %v80_v17 = vld [vmem:[%s4799_s1 + $0x1c8] sm:$0xff] }
  0x29   :  { %v267_v20 = vld [vmem:[%s4799_s1 + $0x7a0] sm:$0xff]  ;;  %1899 = vmatpush2.bf16.msra.mxu1 %v3311_v22  ;;  %v84_v18 = vld [vmem:[%s4799_s1 + $0x1e8] sm:$0xff] }
  0x2a   :  { %v3304_v24 = vcombine.high %v263_v19, %v267_v20  ;;  %v127_v25 = vld [vmem:[%s4799_s1 + $0x340] sm:$0xff]  ;;  %1859 = vmatprep.subr.bf16.mxu0 %v3176_v23  ;;  %v3303_v30 = vcombine.low %v263_v19, %v267_v20  ;;  %v3867_v20 = vrot.slane %v3738_v63, %v3717_v53  ;;  %v3122_v23 = vcombine.high %v80_v17, %v84_v18  ;;  %v76_v63 = vld [vmem:[%s4799_s1 + $0x1a8] sm:$0xff] }
  0x2b   :  { %v131_v26 = vld [vmem:[%s4799_s1 + $0x360] sm:$0xff]  ;;  %1860 = vmatpush2.bf16.msra.mxu0 %v3175_v29  ;;  %v3121_v29 = vcombine.low %v80_v17, %v84_v18  ;;  %v184_v17 = vld [vmem:[%s4799_s1 + $0x508] sm:$0xff] }
  0x2c   :  { %v255_v27 = vld [vmem:[%s4799_s1 + $0x740] sm:$0xff]  ;;  %v3168_v31 = vcombine.high %v127_v25, %v131_v26  ;;  %1900 = vmatprep.subr.bf16.mxu1 %v3304_v24  ;;  %v3167_v37 = vcombine.low %v127_v25, %v131_v26  ;;  %v72_v26 = vld [vmem:[%s4799_s1 + $0x188] sm:$0xff] }
  0x2d   :  { %v259_v28 = vld [vmem:[%s4799_s1 + $0x760] sm:$0xff]  ;;  %1901 = vmatpush2.bf16.msra.mxu1 %v3303_v30 }
  0x2e   :  { %v3296_v32 = vcombine.high %v255_v27, %v259_v28  ;;  %v119_v33 = vld [vmem:[%s4799_s1 + $0x300] sm:$0xff]  ;;  %1861 = vmatprep.subr.bf16.mxu0 %v3168_v31  ;;  %v3295_v38 = vcombine.low %v255_v27, %v259_v28  ;;  %v3883_v27 = vcombine.high %v3867_v20, %v3867_v20 }
  0x2f   :  { %v123_v34 = vld [vmem:[%s4799_s1 + $0x320] sm:$0xff]  ;;  %1862 = vmatpush2.bf16.msra.mxu0 %v3167_v37  ;;  %v3113_v37 = vcombine.low %v72_v26, %v76_v63 }
  0x30   :  { %v247_v35 = vld [vmem:[%s4799_s1 + $0x700] sm:$0xff]  ;;  %v3160_v39 = vcombine.high %v119_v33, %v123_v34  ;;  %1902 = vmatprep.subr.bf16.mxu1 %v3296_v32  ;;  %v3159_v46 = vcombine.low %v119_v33, %v123_v34  ;;  %v64_v33 = vld [vmem:[%s4799_s1 + $0x148] sm:$0xff]  ;;  %v3114_v34 = vcombine.high %v72_v26, %v76_v63 }
  0x31   :  { %v251_v36 = vld [vmem:[%s4799_s1 + $0x720] sm:$0xff]  ;;  %1903 = vmatpush2.bf16.msra.mxu1 %v3295_v38  ;;  %v176_v26 = vld [vmem:[%s4799_s1 + $0x4c8] sm:$0xff] }
  0x32   :  { %v3288_v40 = vcombine.high %v247_v35, %v251_v36  ;;  %v111_v41 = vld [vmem:[%s4799_s1 + $0x2c0] sm:$0xff]  ;;  %1863 = vmatprep.subr.bf16.mxu0 %v3160_v39  ;;  %v3287_v47 = vcombine.low %v247_v35, %v251_v36  ;;  %v68_v35 = vld [vmem:[%s4799_s1 + $0x168] sm:$0xff] }
  0x33   :  { %v115_v42 = vld [vmem:[%s4799_s1 + $0x2e0] sm:$0xff]  ;;  %1864 = vmatpush2.bf16.msra.mxu0 %v3159_v46  ;;  %v354_v46 = vcombine.high %v3728_v59, %v3728_v59  ;;  %v208_v59 = vld [vmem:[%s4799_s1 + $0x5c8] sm:$0xff] }
  0x34   :  { %v239_v44 = vld [vmem:[%s4799_s1 + $0x6c0] sm:$0xff]  ;;  %v3152_v48 = vcombine.high %v111_v41, %v115_v42  ;;  %1904 = vmatprep.subr.bf16.mxu1 %v3288_v40  ;;  %v3151_v55 = vcombine.low %v111_v41, %v115_v42  ;;  %v56_v41 = vld [vmem:[%s4799_s1 + $0x108] sm:$0xff]  ;;  %v3106_v42 = vcombine.high %v64_v33, %v68_v35 }
  0x35   :  { %v243_v45 = vld [vmem:[%s4799_s1 + $0x6e0] sm:$0xff]  ;;  %1905 = vmatpush2.bf16.msra.mxu1 %v3287_v47 }
  0x36   :  { %v3280_v49 = vcombine.high %v239_v44, %v243_v45  ;;  %v103_v50 = vld [vmem:[%s4799_s1 + $0x280] sm:$0xff]  ;;  %1865 = vmatprep.subr.bf16.mxu0 %v3152_v48  ;;  %v3279_v56 = vcombine.low %v239_v44, %v243_v45  ;;  %v60_v44 = vld [vmem:[%s4799_s1 + $0x128] sm:$0xff]  ;;  %v3603_v45 = vmov 0   ;;  %v3105_v48 = vcombine.low %v64_v33, %v68_v35 }
  0x37   :  { %v107_v51 = vld [vmem:[%s4799_s1 + $0x2a0] sm:$0xff]  ;;  %1866 = vmatpush2.bf16.msra.mxu0 %v3151_v55  ;;  %v368_v55 = vrot.slane %v354_v46, %v3717_v53  ;;  %v140_v33 = vld [vmem:[%s4799_s1 + $0x3a8] sm:$0xff] }
  0x38   :  { %v231_v52 = vld [vmem:[%s4799_s1 + $0x680] sm:$0xff]  ;;  %v3144_v57 = vcombine.high %v103_v50, %v107_v51  ;;  %1906 = vmatprep.subr.bf16.mxu1 %v3280_v49  ;;  %v3143_v1 = vcombine.low %v103_v50, %v107_v51  ;;  %v48_v50 = vld [vmem:[%s4799_s1 + $0xc8] sm:$0xff] }
  0x39   :  { %v235_v54 = vld [vmem:[%s4799_s1 + $0x6a0] sm:$0xff]  ;;  %1907 = vmatpush2.bf16.msra.mxu1 %v3279_v56  ;;  %v52_v51 = vld [vmem:[%s4799_s1 + $0xe8] sm:$0xff] }
  0x3a   :  { %v3272_v58 = vcombine.high %v231_v52, %v235_v54  ;;  %v95_v60 = vld [vmem:[%s4799_s1 + $0x240] sm:$0xff]  ;;  %1867 = vmatprep.subr.bf16.mxu0 %v3144_v57  ;;  %v3271_v2 = vcombine.low %v231_v52, %v235_v54  ;;  %v3098_v52 = vcombine.high %v56_v41, %v60_v44  ;;  %v212_v54 = vld [vmem:[%s4799_s1 + $0x5e8] sm:$0xff]  ;;  %v3097_v57 = vcombine.low %v56_v41, %v60_v44 }
  0x3b   :  { %v99_v61 = vld [vmem:[%s4799_s1 + $0x260] sm:$0xff]  ;;  %1868 = vmatpush2.bf16.msra.mxu0 %v3143_v1  ;;  %v204_v1 = vld [vmem:[%s4799_s1 + $0x5a8] sm:$0xff] }
  0x3c   :  { %v223_v62 = vld [vmem:[%s4799_s1 + $0x640] sm:$0xff]  ;;  %v3136_v3 = vcombine.high %v95_v60, %v99_v61  ;;  %1908 = vmatprep.subr.bf16.mxu1 %v3272_v58  ;;  %v3135_v10 = vcombine.low %v95_v60, %v99_v61  ;;  %v3250_v58 = vcombine.high %v208_v59, %v212_v54  ;;  %v40_v60 = vld [vmem:[%s4799_s1 + $0x88] sm:$0xff] }
  0x3d   :  { %v227_v0 = vld [vmem:[%s4799_s1 + $0x660] sm:$0xff]  ;;  %1909 = vmatpush2.bf16.msra.mxu1 %v3271_v2  ;;  %v44_v61 = vld [vmem:[%s4799_s1 + $0xa8] sm:$0xff]  ;;  %v3941_v2 = vrot.slane %v368_v55, %v3717_v53 }
  0x3e   :  { %v3264_v4 = vcombine.high %v223_v62, %v227_v0  ;;  %v87_v5 = vld [vmem:[%s4799_s1 + $0x200] sm:$0xff]  ;;  %1869 = vmatprep.subr.bf16.mxu0 %v3136_v3  ;;  %v3263_v11 = vcombine.low %v223_v62, %v227_v0  ;;  %v200_v62 = vld [vmem:[%s4799_s1 + $0x588] sm:$0xff]  ;;  %v3090_v0 = vcombine.high %v48_v50, %v52_v51  ;;  %v3249_v3 = vcombine.low %v208_v59, %v212_v54 }
  0x3f   :  { %v91_v6 = vld [vmem:[%s4799_s1 + $0x220] sm:$0xff]  ;;  %1870 = vmatpush2.bf16.msra.mxu0 %v3135_v10  ;;  %v3082_v53 = vcombine.high %v40_v60, %v44_v61  ;;  %v196_v10 = vld [vmem:[%s4799_s1 + $0x568] sm:$0xff] }
  0x40   :  { %v215_v7 = vld [vmem:[%s4799_s1 + $0x600] sm:$0xff]  ;;  %v3128_v12 = vcombine.high %v87_v5, %v91_v6  ;;  %1910 = vmatprep.subr.bf16.mxu1 %v3264_v4  ;;  %v3127_v19 = vcombine.low %v87_v5, %v91_v6  ;;  %v3089_v4 = vcombine.low %v48_v50, %v52_v51  ;;  %v3242_v5 = vcombine.high %v200_v62, %v204_v1  ;;  %v32_v6 = vld [vmem:[%s4799_s1 + $0x48] sm:$0xff] }
  0x41   :  { %v219_v8 = vld [vmem:[%s4799_s1 + $0x620] sm:$0xff]  ;;  %1911 = vmatpush2.bf16.msra.mxu1 %v3263_v11  ;;  %v3241_v11 = vcombine.low %v200_v62, %v204_v1  ;;  %v132_v41 = vld [vmem:[%s4799_s1 + $0x368] sm:$0xff] }
  0x42   :  { %v3256_v14 = vcombine.high %v215_v7, %v219_v8  ;;  %v303_v15 = vld [vmem:[%s4799_s1 + $0x8c0] sm:$0xff]  ;;  %1871 = vmatprep.subr.bf16.mxu0 %v3128_v12  ;;  %v3255_v21 = vcombine.low %v215_v7, %v219_v8  ;;  %v36_v7 = vld [vmem:[%s4799_s1 + $0x68] sm:$0xff]  ;;  %v3081_v12 = vcombine.low %v40_v60, %v44_v61 }
  0x43   :  { %v307_v16 = vld [vmem:[%s4799_s1 + $0x8e0] sm:$0xff]  ;;  %1872 = vmatpush2.bf16.msra.mxu0 %v3127_v19  ;;  %v192_v8 = vld [vmem:[%s4799_s1 + $0x548] sm:$0xff]  ;;  %v3074_v18 = vcombine.high %v32_v6, %v36_v7 }
  0x44   :  { %v3344_v22 = vcombine.high %v303_v15, %v307_v16  ;;  %1912 = vmatprep.subr.bf16.mxu1 %v3256_v14  ;;  %v295_v24 = vld [vmem:[%s4799_s1 + $0x880] sm:$0xff]  ;;  %v3343_v28 = vcombine.low %v303_v15, %v307_v16  ;;  %v3234_v14 = vcombine.high %v192_v8, %v196_v10  ;;  %v24_v15 = vld [vmem:[%s4799_s1 + $0x8] sm:$0xff] }
  0x45   :  { %v299_v25 = vld [vmem:[%s4799_s1 + $0x8a0] sm:$0xff]  ;;  %1913 = vmatpush2.bf16.msra.mxu1 %v3255_v21  ;;  %v28_v16 = vld [vmem:[%s4799_s1 + $0x28] sm:$0xff]  ;;  %v3233_v21 = vcombine.low %v192_v8, %v196_v10 }
  0x46   :  { %1931 = vmatprep.subr.bf16.mxu0 %v3344_v22  ;;  %v3336_v30 = vcombine.high %v295_v24, %v299_v25  ;;  %v287_v31 = vld [vmem:[%s4799_s1 + $0x840] sm:$0xff]  ;;  %1964 = vmatprep.subr.bf16.mxu1 %v3122_v23  ;;  %v3335_v36 = vcombine.low %v295_v24, %v299_v25  ;;  %v188_v19 = vld [vmem:[%s4799_s1 + $0x528] sm:$0xff]  ;;  %v3073_v22 = vcombine.low %v32_v6, %v36_v7 }
  0x47   :  { %v291_v32 = vld [vmem:[%s4799_s1 + $0x860] sm:$0xff]  ;;  %1874 = vmatmul.mubr.bf16.vlgmr.msra.gmra.mxu0 %v3867_v20  ;;  %v3226_v23 = vcombine.high %v184_v17, %v188_v19  ;;  %v144_v24 = vld [vmem:[%s4799_s1 + $0x3c8] sm:$0xff]  ;;  %v3066_v63 = vcombine.high %v24_v15, %v28_v16 }
  0x48   :  { %1915 = vmatmul.mubr.bf16.vlgmr.msra.gmra.mxu1 %v3883_v27  ;;  %1932 = vmatpush1.bf16.msra.mxu0 %v3343_v28  ;;  %v3328_v38 = vcombine.high %v287_v31, %v291_v32  ;;  %v279_v39 = vld [vmem:[%s4799_s1 + $0x800] sm:$0xff]  ;;  %v3327_v47 = vcombine.low %v287_v31, %v291_v32  ;;  %v148_v25 = vld [vmem:[%s4799_s1 + $0x3e8] sm:$0xff] }
  0x49   :  { %1965 = vmatpush1.bf16.msra.mxu1 %v3121_v29  ;;  %1933 = vmatprep.subr.bf16.mxu0 %v3336_v30  ;;  %v283_v40 = vld [vmem:[%s4799_s1 + $0x820] sm:$0xff]  ;;  %v180_v28 = vld [vmem:[%s4799_s1 + $0x4e8] sm:$0xff]  ;;  %v3225_v29 = vcombine.low %v184_v17, %v188_v19  ;;  %v3065_v30 = vcombine.low %v24_v15, %v28_v16  ;;  %v3186_v35 = vcombine.high %v144_v24, %v148_v25 }
  0x4a   :  { %1966 = vmatprep.subr.bf16.mxu1 %v3114_v34  ;;  %1955 = vmatprep.mubr.bf16.mxu0 %v3603_v45  ;;  %v3320_v49 = vcombine.high %v279_v39, %v283_v40  ;;  %v3319_v56 = vcombine.low %v279_v39, %v283_v40  ;;  %v3218_v31 = vcombine.high %v176_v26, %v180_v28  ;;  %v136_v32 = vld [vmem:[%s4799_s1 + $0x388] sm:$0xff] }
  0x4b   :  { %1996 = vmatprep.mubr.bf16.mxu1 %v3755_v9  ;;  %v168_v34 = vld [vmem:[%s4799_s1 + $0x488] sm:$0xff]  ;;  %v3178_v44 = vcombine.high %v136_v32, %v140_v33 }
  0x4c   :  { %1934 = vmatpush1.bf16.msra.mxu0 %v3335_v36  ;;  %v172_v36 = vld [vmem:[%s4799_s1 + $0x4a8] sm:$0xff] }
  0x4d   :  { %1967 = vmatpush1.bf16.msra.mxu1 %v3113_v37  ;;  %1935 = vmatprep.subr.bf16.mxu0 %v3328_v38  ;;  %v3217_v37 = vcombine.low %v176_v26, %v180_v28  ;;  %v3185_v38 = vcombine.low %v144_v24, %v148_v25  ;;  %v3210_v39 = vcombine.high %v168_v34, %v172_v36  ;;  %v128_v40 = vld [vmem:[%s4799_s1 + $0x348] sm:$0xff] }
  0x4e   :  { %1968 = vmatprep.subr.bf16.mxu1 %v3106_v42  ;;  %v160_v42 = vld [vmem:[%s4799_s1 + $0x448] sm:$0xff] }
  0x4f   :  { %v164_v46 = vld [vmem:[%s4799_s1 + $0x468] sm:$0xff] }
  0x50   :  { %1936 = vmatpush1.bf16.msra.mxu0 %v3327_v47  ;;  %v3209_v47 = vcombine.low %v168_v34, %v172_v36  ;;  %v120_v50 = vld [vmem:[%s4799_s1 + $0x308] sm:$0xff]  ;;  %v3201_v55 = vcombine.low %v160_v42, %v164_v46 }
  0x51   :  { %1969 = vmatpush1.bf16.msra.mxu1 %v3105_v48  ;;  %1937 = vmatprep.subr.bf16.mxu0 %v3320_v49  ;;  %v3177_v48 = vcombine.low %v136_v32, %v140_v33  ;;  %v3202_v49 = vcombine.high %v160_v42, %v164_v46  ;;  %v124_v51 = vld [vmem:[%s4799_s1 + $0x328] sm:$0xff] }
  0x52   :  { %1970 = vmatprep.subr.bf16.mxu1 %v3098_v52  ;;  %v152_v59 = vld [vmem:[%s4799_s1 + $0x408] sm:$0xff]  ;;  %v3170_v52 = vcombine.high %v128_v40, %v132_v41  ;;  %v3162_v62 = vcombine.high %v120_v50, %v124_v51 }
  0x53   :  { %v156_v54 = vld [vmem:[%s4799_s1 + $0x428] sm:$0xff] }
  0x54   :  { %1938 = vmatpush1.bf16.msra.mxu0 %v3319_v56  ;;  %v3169_v56 = vcombine.low %v128_v40, %v132_v41  ;;  %v116_v60 = vld [vmem:[%s4799_s1 + $0x2e8] sm:$0xff]  ;;  %v3193_v1 = vcombine.low %v152_v59, %v156_v54 }
  0x55   :  { %1971 = vmatpush1.bf16.msra.mxu1 %v3097_v57  ;;  %2005 = vmatprep.subr.bf16.mxu0 %v3250_v58  ;;  %v3194_v57 = vcombine.high %v152_v59, %v156_v54  ;;  %v112_v58 = vld [vmem:[%s4799_s1 + $0x2c8] sm:$0xff] }
  0x56   :  { %1972 = vmatprep.subr.bf16.mxu1 %v3090_v0  ;;  %v272_v61 = vld [vmem:[%s4799_s1 + $0x7c8] sm:$0xff]  ;;  %v3154_v8 = vcombine.high %v112_v58, %v116_v60 }
  0x57   :  { %3351 = vmatmul.mubr.msk.bf16.vlgmr.msra.gmra.mxu0 %vm1837_vm0, %v3941_v2  ;;  %v276_v0 = vld [vmem:[%s4799_s1 + $0x7e8] sm:$0xff] }
  0x58   :  { %2006 = vmatpush1.bf16.msra.mxu0 %v3249_v3  ;;  %2037 = vmatprep.mubr.bf16.mxu0 %v3766_v13  ;;  %v3161_v3 = vcombine.low %v120_v50, %v124_v51  ;;  %v108_v6 = vld [vmem:[%s4799_s1 + $0x2a8] sm:$0xff]  ;;  %v3313_v10 = vcombine.low %v272_v61, %v276_v0 }
  0x59   :  { %1973 = vmatpush1.bf16.msra.mxu1 %v3089_v4  ;;  %2007 = vmatprep.subr.bf16.mxu0 %v3242_v5  ;;  %v3314_v4 = vcombine.high %v272_v61, %v276_v0  ;;  %v104_v5 = vld [vmem:[%s4799_s1 + $0x288] sm:$0xff] }
  0x5a   :  { %1974 = vmatprep.subr.bf16.mxu1 %v3082_v53  ;;  %v264_v7 = vld [vmem:[%s4799_s1 + $0x788] sm:$0xff]  ;;  %v3146_v17 = vcombine.high %v104_v5, %v108_v6 }
  0x5b   :  { %v268_v53 = vld [vmem:[%s4799_s1 + $0x7a8] sm:$0xff] }
  0x5c   :  { %2008 = vmatpush1.bf16.msra.mxu0 %v3241_v11  ;;  %v3153_v11 = vcombine.low %v112_v58, %v116_v60  ;;  %v100_v15 = vld [vmem:[%s4799_s1 + $0x268] sm:$0xff]  ;;  %v3305_v19 = vcombine.low %v264_v7, %v268_v53 }
  0x5d   :  { %1975 = vmatpush1.bf16.msra.mxu1 %v3081_v12  ;;  %2009 = vmatprep.subr.bf16.mxu0 %v3234_v14  ;;  %v3306_v12 = vcombine.high %v264_v7, %v268_v53  ;;  %v96_v14 = vld [vmem:[%s4799_s1 + $0x248] sm:$0xff] }
  0x5e   :  { %1976 = vmatprep.subr.bf16.mxu1 %v3074_v18  ;;  %v256_v16 = vld [vmem:[%s4799_s1 + $0x748] sm:$0xff]  ;;  %v3138_v26 = vcombine.high %v96_v14, %v100_v15 }
  0x5f   :  { %v260_v18 = vld [vmem:[%s4799_s1 + $0x768] sm:$0xff] }
  0x60   :  { %2010 = vmatpush1.bf16.msra.mxu0 %v3233_v21  ;;  %v3145_v21 = vcombine.low %v104_v5, %v108_v6  ;;  %v92_v24 = vld [vmem:[%s4799_s1 + $0x228] sm:$0xff]  ;;  %v3297_v28 = vcombine.low %v256_v16, %v260_v18 }
  0x61   :  { %1977 = vmatpush1.bf16.msra.mxu1 %v3073_v22  ;;  %2011 = vmatprep.subr.bf16.mxu0 %v3226_v23  ;;  %v3298_v22 = vcombine.high %v256_v16, %v260_v18  ;;  %v88_v23 = vld [vmem:[%s4799_s1 + $0x208] sm:$0xff] }
  0x62   :  { %1978 = vmatprep.subr.bf16.mxu1 %v3066_v63  ;;  %v248_v25 = vld [vmem:[%s4799_s1 + $0x708] sm:$0xff]  ;;  %v3130_v34 = vcombine.high %v88_v23, %v92_v24 }
  0x63   :  { %v252_v63 = vld [vmem:[%s4799_s1 + $0x728] sm:$0xff] }
  0x64   :  { %2012 = vmatpush1.bf16.msra.mxu0 %v3225_v29  ;;  %v3137_v29 = vcombine.low %v96_v14, %v100_v15  ;;  %v244_v32 = vld [vmem:[%s4799_s1 + $0x6e8] sm:$0xff]  ;;  %v3289_v36 = vcombine.low %v248_v25, %v252_v63 }
  0x65   :  { %1979 = vmatpush1.bf16.msra.mxu1 %v3065_v30  ;;  %2013 = vmatprep.subr.bf16.mxu0 %v3218_v31  ;;  %v3290_v30 = vcombine.high %v248_v25, %v252_v63  ;;  %v240_v31 = vld [vmem:[%s4799_s1 + $0x6c8] sm:$0xff] }
  0x66   :  { %1980 = vmatprep.subr.bf16.mxu1 %v3186_v35  ;;  %v304_v33 = vld [vmem:[%s4799_s1 + $0x8c8] sm:$0xff]  ;;  %v3281_v46 = vcombine.low %v240_v31, %v244_v32 }
  0x67   :  { %v308_v35 = vld [vmem:[%s4799_s1 + $0x8e8] sm:$0xff] }
  0x68   :  { %2014 = vmatpush1.bf16.msra.mxu0 %v3217_v37  ;;  %v3129_v37 = vcombine.low %v88_v23, %v92_v24  ;;  %v236_v40 = vld [vmem:[%s4799_s1 + $0x6a8] sm:$0xff]  ;;  %v3346_v42 = vcombine.high %v304_v33, %v308_v35 }
  0x69   :  { %1981 = vmatpush2.bf16.msra.mxu1 %v3185_v38  ;;  %2015 = vmatprep.subr.bf16.mxu0 %v3210_v39  ;;  %v3282_v38 = vcombine.high %v240_v31, %v244_v32  ;;  %v232_v39 = vld [vmem:[%s4799_s1 + $0x688] sm:$0xff] }
  0x6a   :  { %1982 = vmatprep.subr.bf16.mxu1 %v3178_v44  ;;  %v296_v41 = vld [vmem:[%s4799_s1 + $0x888] sm:$0xff] }
  0x6b   :  { %v300_v44 = vld [vmem:[%s4799_s1 + $0x8a8] sm:$0xff] }
  0x6c   :  { %2016 = vmatpush1.bf16.msra.mxu0 %v3209_v47 }
  0x6d   :  { %1983 = vmatpush2.bf16.msra.mxu1 %v3177_v48  ;;  %2017 = vmatprep.subr.bf16.mxu0 %v3202_v49 }
  0x6e   :  { %1984 = vmatprep.subr.bf16.mxu1 %v3170_v52 }
  0x70   :  { %2018 = vmatpush1.bf16.msra.mxu0 %v3201_v55 }
  0x71   :  { %1985 = vmatpush2.bf16.msra.mxu1 %v3169_v56  ;;  %2019 = vmatprep.subr.bf16.mxu0 %v3194_v57 }
  0x72   :  { %1986 = vmatprep.subr.bf16.mxu1 %v3162_v62 }
  0x74   :  { %2020 = vmatpush1.bf16.msra.mxu0 %v3193_v1 }
  0x75   :  { %1987 = vmatpush2.bf16.msra.mxu1 %v3161_v3  ;;  %2021 = vmatprep.subr.bf16.mxu0 %v3314_v4 }
  0x76   :  { %1988 = vmatprep.subr.bf16.mxu1 %v3154_v8 }
  0x78   :  { %2022 = vmatpush2.bf16.msra.mxu0 %v3313_v10 }
  0x79   :  { %1989 = vmatpush2.bf16.msra.mxu1 %v3153_v11  ;;  %2023 = vmatprep.subr.bf16.mxu0 %v3306_v12 }
  0x7a   :  { %1990 = vmatprep.subr.bf16.mxu1 %v3146_v17 }
  0x7c   :  { %2024 = vmatpush2.bf16.msra.mxu0 %v3305_v19 }
  0x7d   :  { %1991 = vmatpush2.bf16.msra.mxu1 %v3145_v21  ;;  %2025 = vmatprep.subr.bf16.mxu0 %v3298_v22 }
  0x7e   :  { %1992 = vmatprep.subr.bf16.mxu1 %v3138_v26 }
  0x80   :  { %2026 = vmatpush2.bf16.msra.mxu0 %v3297_v28 }
  0x81   :  { %1993 = vmatpush2.bf16.msra.mxu1 %v3137_v29  ;;  %2027 = vmatprep.subr.bf16.mxu0 %v3290_v30 }
  0x82   :  { %1994 = vmatprep.subr.bf16.mxu1 %v3130_v34 }
  0x84   :  { %2028 = vmatpush2.bf16.msra.mxu0 %v3289_v36 }
  0x85   :  { %10 = vsyncpa [#allocation3], 0  ;;  %1995 = vmatpush2.bf16.msra.mxu1 %v3129_v37  ;;  %2029 = vmatprep.subr.bf16.mxu0 %v3282_v38  ;;  %v3345_v47 = vcombine.low %v304_v33, %v308_v35  ;;  %v3274_v48 = vcombine.high %v232_v39, %v236_v40  ;;  %v3338_v49 = vcombine.high %v296_v41, %v300_v44  ;;  %v224_v50 = vld [vmem:[%s4799_s1 + $0x648] sm:$0xff]  ;;  %v81_v5 = vld [vmem:[%s4799_s1 + $0x1d0] sm:$0xff]  ;;  %vm3028_vm1 = vcmask 41984   ;;  %s3605_s17 = smov [#allocation2]  }
  0x86   :  { %2054 = vmatprep.subr.bf16.mxu1 %v3346_v42  ;;  %v228_v51 = vld [vmem:[%s4799_s1 + $0x668] sm:$0xff]  ;;  %v3273_v54 = vcombine.low %v232_v39, %v236_v40  ;;  %v3337_v55 = vcombine.low %v296_v41, %v300_v44  ;;  %v85_v6 = vld [vmem:[%s4799_s1 + $0x1f0] sm:$0xff]  ;;  %s3055_s18 = sshll.u32 %s3605_s17, 4  ;;  %s3056_s18 = int_to_ptr.vmem [resolvable:$true] %s3055_s18 }
  0x87   :  { %v288_v59 = vld [vmem:[%s4799_s1 + $0x848] sm:$0xff]  ;;  %v3266_v56 = vcombine.high %v224_v50, %v228_v51  ;;  %v3265_v0 = vcombine.low %v224_v50, %v228_v51  ;;  %v209_v7 = vld [vmem:[%s4799_s1 + $0x5d0] sm:$0xff]  ;;  %v3124_v11 = vcombine.high %v81_v5, %v85_v6  ;;  %v3123_v18 = vcombine.low %v81_v5, %v85_v6  ;;  %s3580_s19 = scalar_lea.vmem %s3056_s18, 32  ;;  %p3585_p1 = scmp.lt.s32.totalorder %s3056_s18, %s3056_s18 }
  0x88   :  { %v292_v52 = vld [vmem:[%s4799_s1 + $0x868] sm:$0xff]  ;;  %1997 = vmatmul.mubr.bf16.vlgmr.msra.gmra.mxu1 %v3867_v20  ;;  %2030 = vmatpush2.bf16.msra.mxu0 %v3281_v46  ;;  %v213_v8 = vld [vmem:[%s4799_s1 + $0x5f0] sm:$0xff]  ;;  %p3581_p0 = scmp.ne.s32.totalorder %s3056_s18, %s3580_s19  ;;  %p3586_p2 = scmp.lt.s32.totalorder %s3580_s19, %s3580_s19 }
  0x89   :  { %2055 = vmatpush1.bf16.msra.mxu1 %v3345_v47  ;;  %2031 = vmatprep.subr.bf16.mxu0 %v3274_v48  ;;  %v3330_v57 = vcombine.high %v288_v59, %v292_v52  ;;  %v216_v58 = vld [vmem:[%s4799_s1 + $0x608] sm:$0xff]  ;;  %v3329_v1 = vcombine.low %v288_v59, %v292_v52  ;;  %v3252_v12 = vcombine.high %v209_v7, %v213_v8  ;;  %v73_v14 = vld [vmem:[%s4799_s1 + $0x190] sm:$0xff] }
  0x8a   :  { %2056 = vmatprep.subr.bf16.mxu1 %v3338_v49  ;;  %v220_v60 = vld [vmem:[%s4799_s1 + $0x628] sm:$0xff]  ;;  %2078 = vmatprep.mubr.bf16.mxu1 %v3603_v45  ;;  %v77_v15 = vld [vmem:[%s4799_s1 + $0x1b0] sm:$0xff]  ;;  %v3251_v19 = vcombine.low %v209_v7, %v213_v8  ;;  %p3587_p3 = por %p3586_p2, %p3585_p1 }
  0x8b   :  { %v280_v61 = vld [vmem:[%s4799_s1 + $0x808] sm:$0xff]  ;;  %v3258_v3 = vcombine.high %v216_v58, %v220_v60  ;;  %v3257_v53 = vcombine.low %v216_v58, %v220_v60  ;;  %v201_v16 = vld [vmem:[%s4799_s1 + $0x590] sm:$0xff]  ;;  %v3116_v21 = vcombine.high %v73_v14, %v77_v15  ;;  %v3115_v63 = vcombine.low %v73_v14, %v77_v15 }
  0x8c   :  { %v284_v62 = vld [vmem:[%s4799_s1 + $0x828] sm:$0xff]  ;;  %2032 = vmatpush2.bf16.msra.mxu0 %v3273_v54  ;;  %v205_v17 = vld [vmem:[%s4799_s1 + $0x5b0] sm:$0xff]  ;;  %p3588_p4 = pnand %p3587_p3, %p3581_p0 }
  0x8d   :  { %2057 = vmatpush1.bf16.msra.mxu1 %v3337_v55  ;;  %2033 = vmatprep.subr.bf16.mxu0 %v3266_v56  ;;  %v3322_v4 = vcombine.high %v280_v61, %v284_v62  ;;  %v3321_v10 = vcombine.low %v280_v61, %v284_v62  ;;  %v3244_v22 = vcombine.high %v201_v16, %v205_v17  ;;  %v65_v23 = vld [vmem:[%s4799_s1 + $0x150] sm:$0xff] }
  0x8e   :  { %2058 = vmatprep.subr.bf16.mxu1 %v3330_v57  ;;  %v69_v24 = vld [vmem:[%s4799_s1 + $0x170] sm:$0xff]  ;;  %v3243_v28 = vcombine.low %v201_v16, %v205_v17 }
  0x8f   :  { %v193_v25 = vld [vmem:[%s4799_s1 + $0x550] sm:$0xff]  ;;  %v3108_v29 = vcombine.high %v65_v23, %v69_v24  ;;  %v3107_v35 = vcombine.low %v65_v23, %v69_v24 }
  0x90   :  { %2034 = vmatpush2.bf16.msra.mxu0 %v3265_v0  ;;  %v197_v26 = vld [vmem:[%s4799_s1 + $0x570] sm:$0xff] }
  0x91   :  { %2059 = vmatpush1.bf16.msra.mxu1 %v3329_v1  ;;  %2035 = vmatprep.subr.bf16.mxu0 %v3258_v3  ;;  %v3236_v30 = vcombine.high %v193_v25, %v197_v26  ;;  %v57_v31 = vld [vmem:[%s4799_s1 + $0x110] sm:$0xff]  ;;  %v3235_v36 = vcombine.low %v193_v25, %v197_v26 }
  0x92   :  { %2060 = vmatprep.subr.bf16.mxu1 %v3322_v4  ;;  %v61_v32 = vld [vmem:[%s4799_s1 + $0x130] sm:$0xff] }
  0x93   :  { %v185_v33 = vld [vmem:[%s4799_s1 + $0x510] sm:$0xff]  ;;  %v3100_v37 = vcombine.high %v57_v31, %v61_v32  ;;  %v3099_v44 = vcombine.low %v57_v31, %v61_v32 }
  0x94   :  { %2036 = vmatpush2.bf16.msra.mxu0 %v3257_v53  ;;  %v189_v34 = vld [vmem:[%s4799_s1 + $0x530] sm:$0xff] }
  0x95   :  { %2061 = vmatpush1.bf16.msra.mxu1 %v3321_v10  ;;  %2087 = vmatprep.subr.bf16.mxu0 %v3124_v11  ;;  %v3228_v38 = vcombine.high %v185_v33, %v189_v34  ;;  %v49_v39 = vld [vmem:[%s4799_s1 + $0xd0] sm:$0xff]  ;;  %v3227_v46 = vcombine.low %v185_v33, %v189_v34 }
  0x96   :  { %2128 = vmatprep.subr.bf16.mxu1 %v3252_v12  ;;  %v53_v40 = vld [vmem:[%s4799_s1 + $0xf0] sm:$0xff] }
  0x97   :  { %2038 = vmatmul.mubr.bf16.vlgmr.msra.gmra.mxu0 %v3883_v27  ;;  %v177_v41 = vld [vmem:[%s4799_s1 + $0x4d0] sm:$0xff]  ;;  %v3092_v47 = vcombine.high %v49_v39, %v53_v40  ;;  %v3091_v52 = vcombine.low %v49_v39, %v53_v40 }
  0x98   :  { %3352 = vmatmul.mubr.msk.bf16.vlgmr.msra.gmra.mxu1 %vm1837_vm0, %v3941_v2  ;;  %2088 = vmatpush1.bf16.msra.mxu0 %v3123_v18  ;;  %v181_v42 = vld [vmem:[%s4799_s1 + $0x4f0] sm:$0xff] }
  0x99   :  { %2129 = vmatpush1.bf16.msra.mxu1 %v3251_v19  ;;  %2089 = vmatprep.subr.bf16.mxu0 %v3116_v21  ;;  %v3220_v48 = vcombine.high %v177_v41, %v181_v42  ;;  %v41_v49 = vld [vmem:[%s4799_s1 + $0x90] sm:$0xff]  ;;  %v3219_v54 = vcombine.low %v177_v41, %v181_v42 }
  0x9a   :  { %2130 = vmatprep.subr.bf16.mxu1 %v3244_v22  ;;  %2119 = vmatprep.mubr.bf16.mxu0 %v3755_v9  ;;  %v45_v50 = vld [vmem:[%s4799_s1 + $0xb0] sm:$0xff] }
  0x9b   :  { %2160 = vmatprep.mubr.bf16.mxu1 %v3766_v13  ;;  %v169_v51 = vld [vmem:[%s4799_s1 + $0x490] sm:$0xff]  ;;  %v3084_v55 = vcombine.high %v41_v49, %v45_v50  ;;  %v3083_v62 = vcombine.low %v41_v49, %v45_v50 }
  0x9c   :  { %2090 = vmatpush1.bf16.msra.mxu0 %v3115_v63  ;;  %v173_v59 = vld [vmem:[%s4799_s1 + $0x4b0] sm:$0xff] }
  0x9d   :  { %2131 = vmatpush1.bf16.msra.mxu1 %v3243_v28  ;;  %2091 = vmatprep.subr.bf16.mxu0 %v3108_v29  ;;  %v3212_v56 = vcombine.high %v169_v51, %v173_v59  ;;  %v33_v57 = vld [vmem:[%s4799_s1 + $0x50] sm:$0xff]  ;;  %v3211_v0 = vcombine.low %v169_v51, %v173_v59 }
  0x9e   :  { %2132 = vmatprep.subr.bf16.mxu1 %v3236_v30  ;;  %v37_v58 = vld [vmem:[%s4799_s1 + $0x70] sm:$0xff] }
  0x9f   :  { %v161_v60 = vld [vmem:[%s4799_s1 + $0x450] sm:$0xff]  ;;  %v3076_v1 = vcombine.high %v33_v57, %v37_v58  ;;  %v3075_v8 = vcombine.low %v33_v57, %v37_v58 }
  0xa0   :  { %2092 = vmatpush1.bf16.msra.mxu0 %v3107_v35  ;;  %v165_v61 = vld [vmem:[%s4799_s1 + $0x470] sm:$0xff] }
  0xa1   :  { %2133 = vmatpush1.bf16.msra.mxu1 %v3235_v36  ;;  %2093 = vmatprep.subr.bf16.mxu0 %v3100_v37  ;;  %v3204_v3 = vcombine.high %v161_v60, %v165_v61  ;;  %v25_v4 = vld [vmem:[%s4799_s1 + $0x10] sm:$0xff]  ;;  %v3203_v53 = vcombine.low %v161_v60, %v165_v61 }
  0xa2   :  { %2134 = vmatprep.subr.bf16.mxu1 %v3228_v38  ;;  %v29_v5 = vld [vmem:[%s4799_s1 + $0x30] sm:$0xff] }
  0xa3   :  { %v153_v6 = vld [vmem:[%s4799_s1 + $0x410] sm:$0xff]  ;;  %v3068_v10 = vcombine.high %v25_v4, %v29_v5  ;;  %v3067_v17 = vcombine.low %v25_v4, %v29_v5 }
  0xa4   :  { %2094 = vmatpush1.bf16.msra.mxu0 %v3099_v44  ;;  %v157_v7 = vld [vmem:[%s4799_s1 + $0x430] sm:$0xff] }
  0xa5   :  { %2135 = vmatpush1.bf16.msra.mxu1 %v3227_v46  ;;  %2095 = vmatprep.subr.bf16.mxu0 %v3092_v47  ;;  %v3196_v11 = vcombine.high %v153_v6, %v157_v7  ;;  %v145_v12 = vld [vmem:[%s4799_s1 + $0x3d0] sm:$0xff]  ;;  %v3195_v18 = vcombine.low %v153_v6, %v157_v7 }
  0xa6   :  { %2136 = vmatprep.subr.bf16.mxu1 %v3220_v48  ;;  %v149_v14 = vld [vmem:[%s4799_s1 + $0x3f0] sm:$0xff] }
  0xa7   :  { %v273_v15 = vld [vmem:[%s4799_s1 + $0x7d0] sm:$0xff]  ;;  %v3188_v19 = vcombine.high %v145_v12, %v149_v14  ;;  %v3187_v26 = vcombine.low %v145_v12, %v149_v14 }
  0xa8   :  { %2096 = vmatpush1.bf16.msra.mxu0 %v3091_v52  ;;  %v277_v16 = vld [vmem:[%s4799_s1 + $0x7f0] sm:$0xff] }
  0xa9   :  { %2137 = vmatpush1.bf16.msra.mxu1 %v3219_v54  ;;  %2097 = vmatprep.subr.bf16.mxu0 %v3084_v55  ;;  %v3316_v21 = vcombine.high %v273_v15, %v277_v16  ;;  %v137_v22 = vld [vmem:[%s4799_s1 + $0x390] sm:$0xff]  ;;  %v3315_v63 = vcombine.low %v273_v15, %v277_v16 }
  0xaa   :  { %2138 = vmatprep.subr.bf16.mxu1 %v3212_v56  ;;  %v141_v23 = vld [vmem:[%s4799_s1 + $0x3b0] sm:$0xff] }
  0xab   :  { %v265_v24 = vld [vmem:[%s4799_s1 + $0x790] sm:$0xff]  ;;  %v3180_v28 = vcombine.high %v137_v22, %v141_v23  ;;  %v3179_v34 = vcombine.low %v137_v22, %v141_v23  ;;  %v82_v23 = vld [vmem:[%s4799_s1 + $0x1d8] sm:$0xff] }
  0xac   :  { %2098 = vmatpush1.bf16.msra.mxu0 %v3083_v62  ;;  %v269_v25 = vld [vmem:[%s4799_s1 + $0x7b0] sm:$0xff] }
  0xad   :  { %2139 = vmatpush1.bf16.msra.mxu1 %v3211_v0  ;;  %2099 = vmatprep.subr.bf16.mxu0 %v3076_v1  ;;  %v3308_v29 = vcombine.high %v265_v24, %v269_v25  ;;  %v129_v30 = vld [vmem:[%s4799_s1 + $0x350] sm:$0xff]  ;;  %v3307_v35 = vcombine.low %v265_v24, %v269_v25  ;;  %v86_v24 = vld [vmem:[%s4799_s1 + $0x1f8] sm:$0xff] }
  0xae   :  { %2140 = vmatprep.subr.bf16.mxu1 %v3204_v3  ;;  %v133_v31 = vld [vmem:[%s4799_s1 + $0x370] sm:$0xff] }
  0xaf   :  { %v257_v32 = vld [vmem:[%s4799_s1 + $0x750] sm:$0xff]  ;;  %v3172_v36 = vcombine.high %v129_v30, %v133_v31  ;;  %v3171_v42 = vcombine.low %v129_v30, %v133_v31  ;;  %v74_v31 = vld [vmem:[%s4799_s1 + $0x198] sm:$0xff] }
  0xb0   :  { %2100 = vmatpush1.bf16.msra.mxu0 %v3075_v8  ;;  %v261_v33 = vld [vmem:[%s4799_s1 + $0x770] sm:$0xff] }
  0xb1   :  { %2141 = vmatpush1.bf16.msra.mxu1 %v3203_v53  ;;  %2101 = vmatprep.subr.bf16.mxu0 %v3068_v10  ;;  %v3300_v37 = vcombine.high %v257_v32, %v261_v33  ;;  %v121_v38 = vld [vmem:[%s4799_s1 + $0x310] sm:$0xff]  ;;  %v3299_v44 = vcombine.low %v257_v32, %v261_v33  ;;  %v78_v32 = vld [vmem:[%s4799_s1 + $0x1b8] sm:$0xff] }
  0xb2   :  { %2142 = vmatprep.subr.bf16.mxu1 %v3196_v11  ;;  %v125_v39 = vld [vmem:[%s4799_s1 + $0x330] sm:$0xff] }
  0xb3   :  { %v249_v40 = vld [vmem:[%s4799_s1 + $0x710] sm:$0xff]  ;;  %v3164_v46 = vcombine.high %v121_v38, %v125_v39  ;;  %v3163_v59 = vcombine.low %v121_v38, %v125_v39  ;;  %v66_v39 = vld [vmem:[%s4799_s1 + $0x158] sm:$0xff] }
  0xb4   :  { %2102 = vmatpush1.bf16.msra.mxu0 %v3067_v17  ;;  %v253_v41 = vld [vmem:[%s4799_s1 + $0x730] sm:$0xff] }
  0xb5   :  { %2143 = vmatpush1.bf16.msra.mxu1 %v3195_v18  ;;  %2103 = vmatprep.subr.bf16.mxu0 %v3188_v19  ;;  %v3292_v47 = vcombine.high %v249_v40, %v253_v41  ;;  %v113_v48 = vld [vmem:[%s4799_s1 + $0x2d0] sm:$0xff]  ;;  %v3291_v52 = vcombine.low %v249_v40, %v253_v41  ;;  %v70_v40 = vld [vmem:[%s4799_s1 + $0x178] sm:$0xff] }
  0xb6   :  { %2144 = vmatprep.subr.bf16.mxu1 %v3316_v21  ;;  %v117_v49 = vld [vmem:[%s4799_s1 + $0x2f0] sm:$0xff] }
  0xb7   :  { %v241_v50 = vld [vmem:[%s4799_s1 + $0x6d0] sm:$0xff]  ;;  %v3156_v54 = vcombine.high %v113_v48, %v117_v49  ;;  %v3155_v61 = vcombine.low %v113_v48, %v117_v49  ;;  %v58_v49 = vld [vmem:[%s4799_s1 + $0x118] sm:$0xff] }
  0xb8   :  { %2104 = vmatpush2.bf16.msra.mxu0 %v3187_v26  ;;  %v245_v51 = vld [vmem:[%s4799_s1 + $0x6f0] sm:$0xff] }
  0xb9   :  { %2145 = vmatpush2.bf16.msra.mxu1 %v3315_v63  ;;  %2105 = vmatprep.subr.bf16.mxu0 %v3180_v28  ;;  %v3284_v55 = vcombine.high %v241_v50, %v245_v51  ;;  %v105_v56 = vld [vmem:[%s4799_s1 + $0x290] sm:$0xff]  ;;  %v3283_v62 = vcombine.low %v241_v50, %v245_v51  ;;  %v3126_v28 = vcombine.high %v82_v23, %v86_v24  ;;  %v62_v50 = vld [vmem:[%s4799_s1 + $0x138] sm:$0xff] }
  0xba   :  { %2146 = vmatprep.subr.bf16.mxu1 %v3308_v29  ;;  %v109_v57 = vld [vmem:[%s4799_s1 + $0x2b0] sm:$0xff] }
  0xbb   :  { %v233_v58 = vld [vmem:[%s4799_s1 + $0x690] sm:$0xff]  ;;  %v3148_v0 = vcombine.high %v105_v56, %v109_v57  ;;  %v3147_v7 = vcombine.low %v105_v56, %v109_v57  ;;  %v214_v56 = vld [vmem:[%s4799_s1 + $0x5f8] sm:$0xff] }
  0xbc   :  { %2106 = vmatpush2.bf16.msra.mxu0 %v3179_v34  ;;  %v237_v60 = vld [vmem:[%s4799_s1 + $0x6b0] sm:$0xff]  ;;  %v3125_v34 = vcombine.low %v82_v23, %v86_v24  ;;  %v54_v57 = vld [vmem:[%s4799_s1 + $0xf8] sm:$0xff] }
  0xbd   :  { %2147 = vmatpush2.bf16.msra.mxu1 %v3307_v35  ;;  %2107 = vmatprep.subr.bf16.mxu0 %v3172_v36  ;;  %v3276_v1 = vcombine.high %v233_v58, %v237_v60  ;;  %v97_v3 = vld [vmem:[%s4799_s1 + $0x250] sm:$0xff]  ;;  %v3275_v8 = vcombine.low %v233_v58, %v237_v60  ;;  %v3118_v36 = vcombine.high %v74_v31, %v78_v32 }
  0xbe   :  { %2148 = vmatprep.subr.bf16.mxu1 %v3300_v37  ;;  %v101_v4 = vld [vmem:[%s4799_s1 + $0x270] sm:$0xff]  ;;  %v3101_v60 = vcombine.low %v58_v49, %v62_v50 }
  0xbf   :  { %v225_v5 = vld [vmem:[%s4799_s1 + $0x650] sm:$0xff]  ;;  %v3140_v53 = vcombine.high %v97_v3, %v101_v4  ;;  %v3139_v16 = vcombine.low %v97_v3, %v101_v4  ;;  %v42_v3 = vld [vmem:[%s4799_s1 + $0x98] sm:$0xff] }
  0xc0   :  { %2108 = vmatpush2.bf16.msra.mxu0 %v3171_v42  ;;  %v229_v6 = vld [vmem:[%s4799_s1 + $0x670] sm:$0xff]  ;;  %v3117_v42 = vcombine.low %v74_v31, %v78_v32  ;;  %v46_v4 = vld [vmem:[%s4799_s1 + $0xb8] sm:$0xff] }
  0xc1   :  { %2149 = vmatpush2.bf16.msra.mxu1 %v3299_v44  ;;  %2109 = vmatprep.subr.bf16.mxu0 %v3164_v46  ;;  %v3268_v10 = vcombine.high %v225_v5, %v229_v6  ;;  %v89_v11 = vld [vmem:[%s4799_s1 + $0x210] sm:$0xff]  ;;  %v3267_v17 = vcombine.low %v225_v5, %v229_v6  ;;  %v3110_v46 = vcombine.high %v66_v39, %v70_v40 }
  0xc2   :  { %2150 = vmatprep.subr.bf16.mxu1 %v3292_v47  ;;  %v93_v12 = vld [vmem:[%s4799_s1 + $0x230] sm:$0xff] }
  0xc3   :  { %v217_v14 = vld [vmem:[%s4799_s1 + $0x610] sm:$0xff]  ;;  %v3132_v18 = vcombine.high %v89_v11, %v93_v12  ;;  %v3131_v25 = vcombine.low %v89_v11, %v93_v12  ;;  %v34_v11 = vld [vmem:[%s4799_s1 + $0x58] sm:$0xff] }
  0xc4   :  { %2110 = vmatpush2.bf16.msra.mxu0 %v3163_v59  ;;  %v221_v15 = vld [vmem:[%s4799_s1 + $0x630] sm:$0xff]  ;;  %v3109_v59 = vcombine.low %v66_v39, %v70_v40  ;;  %v38_v12 = vld [vmem:[%s4799_s1 + $0x78] sm:$0xff] }
  0xc5   :  { %2151 = vmatpush2.bf16.msra.mxu1 %v3291_v52  ;;  %2111 = vmatprep.subr.bf16.mxu0 %v3156_v54  ;;  %v3260_v19 = vcombine.high %v217_v14, %v221_v15  ;;  %v305_v21 = vld [vmem:[%s4799_s1 + $0x8d0] sm:$0xff]  ;;  %v3259_v26 = vcombine.low %v217_v14, %v221_v15  ;;  %v3102_v54 = vcombine.high %v58_v49, %v62_v50 }
  0xc6   :  { %2152 = vmatprep.subr.bf16.mxu1 %v3284_v55  ;;  %v309_v22 = vld [vmem:[%s4799_s1 + $0x8f0] sm:$0xff]  ;;  %v210_v55 = vld [vmem:[%s4799_s1 + $0x5d8] sm:$0xff]  ;;  %v3085_v15 = vcombine.low %v42_v3, %v46_v4  ;;  %v3077_v23 = vcombine.low %v34_v11, %v38_v12 }
  0xc7   :  { %v3348_v63 = vcombine.high %v305_v21, %v309_v22  ;;  %v297_v29 = vld [vmem:[%s4799_s1 + $0x890] sm:$0xff]  ;;  %v3347_v33 = vcombine.low %v305_v21, %v309_v22  ;;  %v3253_v5 = vcombine.low %v210_v55, %v214_v56  ;;  %v26_v21 = vld [vmem:[%s4799_s1 + $0x18] sm:$0xff] }
  0xc8   :  { %2112 = vmatpush2.bf16.msra.mxu0 %v3155_v61  ;;  %v301_v30 = vld [vmem:[%s4799_s1 + $0x8b0] sm:$0xff]  ;;  %v3254_v61 = vcombine.high %v210_v55, %v214_v56  ;;  %v126_v55 = vld [vmem:[%s4799_s1 + $0x338] sm:$0xff] }
  0xc9   :  { %2153 = vmatpush2.bf16.msra.mxu1 %v3283_v62  ;;  %2113 = vmatprep.subr.bf16.mxu0 %v3148_v0  ;;  %v3340_v35 = vcombine.high %v297_v29, %v301_v30  ;;  %v289_v37 = vld [vmem:[%s4799_s1 + $0x850] sm:$0xff]  ;;  %v3339_v41 = vcombine.low %v297_v29, %v301_v30  ;;  %v202_v0 = vld [vmem:[%s4799_s1 + $0x598] sm:$0xff] }
  0xca   :  { %2154 = vmatprep.subr.bf16.mxu1 %v3276_v1  ;;  %v293_v38 = vld [vmem:[%s4799_s1 + $0x870] sm:$0xff]  ;;  %v206_v1 = vld [vmem:[%s4799_s1 + $0x5b8] sm:$0xff] }
  0xcb   :  { %v3332_v44 = vcombine.high %v289_v37, %v293_v38  ;;  %v281_v47 = vld [vmem:[%s4799_s1 + $0x810] sm:$0xff]  ;;  %v3331_v51 = vcombine.low %v289_v37, %v293_v38  ;;  %v3245_v14 = vcombine.low %v202_v0, %v206_v1  ;;  %v150_v29 = vld [vmem:[%s4799_s1 + $0x3f8] sm:$0xff] }
  0xcc   :  { %2114 = vmatpush2.bf16.msra.mxu0 %v3147_v7  ;;  %v285_v48 = vld [vmem:[%s4799_s1 + $0x830] sm:$0xff]  ;;  %v3246_v7 = vcombine.high %v202_v0, %v206_v1  ;;  %v142_v37 = vld [vmem:[%s4799_s1 + $0x3b8] sm:$0xff] }
  0xcd   :  { %2155 = vmatpush2.bf16.msra.mxu1 %v3275_v8  ;;  %2115 = vmatprep.subr.bf16.mxu0 %v3140_v53  ;;  %v3324_v52 = vcombine.high %v281_v47, %v285_v48  ;;  %v3323_v58 = vcombine.low %v281_v47, %v285_v48  ;;  %v3086_v8 = vcombine.high %v42_v3, %v46_v4  ;;  %v194_v53 = vld [vmem:[%s4799_s1 + $0x558] sm:$0xff] }
  0xce   :  { %2156 = vmatprep.subr.bf16.mxu1 %v3268_v10  ;;  %v198_v10 = vld [vmem:[%s4799_s1 + $0x578] sm:$0xff] }
  0xcf   :  { %v3237_v22 = vcombine.low %v194_v53, %v198_v10  ;;  %v134_v47 = vld [vmem:[%s4799_s1 + $0x378] sm:$0xff] }
  0xd0   :  { %2116 = vmatpush2.bf16.msra.mxu0 %v3139_v16  ;;  %v3238_v16 = vcombine.high %v194_v53, %v198_v10  ;;  %v118_v0 = vld [vmem:[%s4799_s1 + $0x2f8] sm:$0xff] }
  0xd1   :  { %2157 = vmatpush2.bf16.msra.mxu1 %v3267_v17  ;;  %2117 = vmatprep.subr.bf16.mxu0 %v3132_v18  ;;  %v3078_v17 = vcombine.high %v34_v11, %v38_v12  ;;  %v186_v18 = vld [vmem:[%s4799_s1 + $0x518] sm:$0xff] }
  0xd2   :  { %2158 = vmatprep.subr.bf16.mxu1 %v3260_v19  ;;  %v190_v19 = vld [vmem:[%s4799_s1 + $0x538] sm:$0xff] }
  0xd3   :  { %v3230_v24 = vcombine.high %v186_v18, %v190_v19  ;;  %v3229_v30 = vcombine.low %v186_v18, %v190_v19  ;;  %v110_v53 = vld [vmem:[%s4799_s1 + $0x2b8] sm:$0xff] }
  0xd4   :  { %2118 = vmatpush2.bf16.msra.mxu0 %v3131_v25  ;;  %v98_v18 = vld [vmem:[%s4799_s1 + $0x258] sm:$0xff] }
  0xd5   :  { %2159 = vmatpush2.bf16.msra.mxu1 %v3259_v26  ;;  %2177 = vmatprep.subr.bf16.mxu0 %v3348_v63  ;;  %v178_v26 = vld [vmem:[%s4799_s1 + $0x4d8] sm:$0xff] }
  0xd6   :  { %2210 = vmatprep.subr.bf16.mxu1 %v3126_v28  ;;  %v182_v63 = vld [vmem:[%s4799_s1 + $0x4f8] sm:$0xff] }
  0xd7   :  { %2120 = vmatmul.mubr.bf16.vlgmr.msra.gmra.mxu0 %v3867_v20  ;;  %v146_v28 = vld [vmem:[%s4799_s1 + $0x3d8] sm:$0xff]  ;;  %v3222_v32 = vcombine.high %v178_v26, %v182_v63  ;;  %v3221_v38 = vcombine.low %v178_v26, %v182_v63 }
  0xd8   :  { %2161 = vmatmul.mubr.bf16.vlgmr.msra.gmra.mxu1 %v3883_v27  ;;  %2178 = vmatpush1.bf16.msra.mxu0 %v3347_v33  ;;  %v3190_v33 = vcombine.high %v146_v28, %v150_v29  ;;  %v3189_v39 = vcombine.low %v146_v28, %v150_v29  ;;  %v102_v19 = vld [vmem:[%s4799_s1 + $0x278] sm:$0xff] }
  0xd9   :  { %2211 = vmatpush1.bf16.msra.mxu1 %v3125_v34  ;;  %2179 = vmatprep.subr.bf16.mxu0 %v3340_v35  ;;  %v170_v34 = vld [vmem:[%s4799_s1 + $0x498] sm:$0xff]  ;;  %v3142_v26 = vcombine.high %v98_v18, %v102_v19 }
  0xda   :  { %2212 = vmatprep.subr.bf16.mxu1 %v3118_v36  ;;  %2201 = vmatprep.mubr.bf16.mxu0 %v3603_v45  ;;  %v174_v35 = vld [vmem:[%s4799_s1 + $0x4b8] sm:$0xff] }
  0xdb   :  { %2242 = vmatprep.mubr.bf16.mxu1 %v3755_v9  ;;  %v50_v9 = vld [vmem:[%s4799_s1 + $0xd8] sm:$0xff]  ;;  %v3214_v40 = vcombine.high %v170_v34, %v174_v35  ;;  %v3213_v48 = vcombine.low %v170_v34, %v174_v35  ;;  %v3141_v35 = vcombine.low %v98_v18, %v102_v19 }
  0xdc   :  { %2180 = vmatpush1.bf16.msra.mxu0 %v3339_v41  ;;  %v3094_v62 = vcombine.high %v50_v9, %v54_v57  ;;  %v3093_v6 = vcombine.low %v50_v9, %v54_v57  ;;  %v138_v36 = vld [vmem:[%s4799_s1 + $0x398] sm:$0xff] }
  0xdd   :  { %2213 = vmatpush1.bf16.msra.mxu1 %v3117_v42  ;;  %2181 = vmatprep.subr.bf16.mxu0 %v3332_v44  ;;  %v3182_v41 = vcombine.high %v138_v36, %v142_v37  ;;  %v162_v42 = vld [vmem:[%s4799_s1 + $0x458] sm:$0xff]  ;;  %v3181_v49 = vcombine.low %v138_v36, %v142_v37 }
  0xde   :  { %2214 = vmatprep.subr.bf16.mxu1 %v3110_v46  ;;  %v166_v44 = vld [vmem:[%s4799_s1 + $0x478] sm:$0xff] }
  0xdf   :  { %v130_v46 = vld [vmem:[%s4799_s1 + $0x358] sm:$0xff]  ;;  %v3206_v50 = vcombine.high %v162_v42, %v166_v44  ;;  %v3205_v56 = vcombine.low %v162_v42, %v166_v44 }
  0xe0   :  { %2182 = vmatpush1.bf16.msra.mxu0 %v3331_v51  ;;  %v3174_v51 = vcombine.high %v130_v46, %v134_v47  ;;  %v3173_v9 = vcombine.low %v130_v46, %v134_v47  ;;  %v250_v63 = vld [vmem:[%s4799_s1 + $0x718] sm:$0xff]  ;;  %v319_v46 = vsub.s32 1, %v3702_v43 }
  0xe1   :  { %2215 = vmatpush1.bf16.msra.mxu1 %v3109_v59  ;;  %2183 = vmatprep.subr.bf16.mxu0 %v3324_v52  ;;  %v154_v59 = vld [vmem:[%s4799_s1 + $0x418] sm:$0xff] }
  0xe2   :  { %2216 = vmatprep.subr.bf16.mxu1 %v3102_v54  ;;  %v158_v52 = vld [vmem:[%s4799_s1 + $0x438] sm:$0xff] }
  0xe3   :  { %v122_v54 = vld [vmem:[%s4799_s1 + $0x318] sm:$0xff]  ;;  %v3198_v57 = vcombine.high %v154_v59, %v158_v52  ;;  %v3197_v1 = vcombine.low %v154_v59, %v158_v52 }
  0xe4   :  { %2184 = vmatpush1.bf16.msra.mxu0 %v3323_v58  ;;  %v3166_v58 = vcombine.high %v122_v54, %v126_v55  ;;  %v3165_v3 = vcombine.low %v122_v54, %v126_v55  ;;  %v254_v28 = vld [vmem:[%s4799_s1 + $0x738] sm:$0xff] }
  0xe5   :  { %2217 = vmatpush1.bf16.msra.mxu1 %v3101_v60  ;;  %2251 = vmatprep.subr.bf16.mxu0 %v3254_v61  ;;  %v274_v60 = vld [vmem:[%s4799_s1 + $0x7d8] sm:$0xff]  ;;  %v3294_v36 = vcombine.high %v250_v63, %v254_v28  ;;  %v3293_v44 = vcombine.low %v250_v63, %v254_v28  ;;  %v3518_v28 = vld [vmem:[%s4801_s3 + $0x70] sm:$0xff]  }
  0xe6   :  { %2218 = vmatprep.subr.bf16.mxu1 %v3094_v62  ;;  %v278_v61 = vld [vmem:[%s4799_s1 + $0x7f8] sm:$0xff] }
  0xe7   :  { %3353 = vmatmul.mubr.msk.bf16.vlgmr.msra.gmra.mxu0 %vm1837_vm0, %v3941_v2  ;;  %v114_v62 = vld [vmem:[%s4799_s1 + $0x2d8] sm:$0xff]  ;;  %v3318_v4 = vcombine.high %v274_v60, %v278_v61  ;;  %v3317_v10 = vcombine.low %v274_v60, %v278_v61 }
  0xe8   :  { %2252 = vmatpush1.bf16.msra.mxu0 %v3253_v5  ;;  %2283 = vmatprep.mubr.bf16.mxu0 %v3766_v13  ;;  %v30_v13 = vld [vmem:[%s4799_s1 + $0x38] sm:$0xff]  ;;  %v3158_v5 = vcombine.high %v114_v62, %v118_v0  ;;  %v3157_v11 = vcombine.low %v114_v62, %v118_v0 }
  0xe9   :  { %2219 = vmatpush1.bf16.msra.mxu1 %v3093_v6  ;;  %2253 = vmatprep.subr.bf16.mxu0 %v3246_v7  ;;  %v3070_v25 = vcombine.high %v26_v21, %v30_v13  ;;  %v3069_v31 = vcombine.low %v26_v21, %v30_v13  ;;  %v266_v6 = vld [vmem:[%s4799_s1 + $0x798] sm:$0xff] }
  0xea   :  { %2220 = vmatprep.subr.bf16.mxu1 %v3086_v8  ;;  %v270_v7 = vld [vmem:[%s4799_s1 + $0x7b8] sm:$0xff] }
  0xeb   :  { %v106_v8 = vld [vmem:[%s4799_s1 + $0x298] sm:$0xff]  ;;  %v3310_v12 = vcombine.high %v266_v6, %v270_v7  ;;  %v3309_v13 = vcombine.low %v266_v6, %v270_v7 }
  0xec   :  { %2254 = vmatpush1.bf16.msra.mxu0 %v3245_v14  ;;  %v3150_v14 = vcombine.high %v106_v8, %v110_v53  ;;  %v310_v42 = vld [vmem:[%s4799_s1 + $0x8f8] sm:$0xff] }
  0xed   :  { %2221 = vmatpush1.bf16.msra.mxu1 %v3085_v15  ;;  %2255 = vmatprep.subr.bf16.mxu0 %v3238_v16  ;;  %v258_v15 = vld [vmem:[%s4799_s1 + $0x758] sm:$0xff] }
  0xee   :  { %2222 = vmatprep.subr.bf16.mxu1 %v3078_v17  ;;  %v262_v16 = vld [vmem:[%s4799_s1 + $0x778] sm:$0xff] }
  0xef   :  { %v238_v59 = vld [vmem:[%s4799_s1 + $0x6b8] sm:$0xff] }
  0xf0   :  { %2256 = vmatpush1.bf16.msra.mxu0 %v3237_v22  ;;  %v298_v52 = vld [vmem:[%s4799_s1 + $0x898] sm:$0xff] }
  0xf1   :  { %2223 = vmatpush1.bf16.msra.mxu1 %v3077_v23  ;;  %2257 = vmatprep.subr.bf16.mxu0 %v3230_v24  ;;  %v3149_v23 = vcombine.low %v106_v8, %v110_v53  ;;  %v3302_v24 = vcombine.high %v258_v15, %v262_v16  ;;  %v302_v54 = vld [vmem:[%s4799_s1 + $0x8b8] sm:$0xff] }
  0xf2   :  { %2224 = vmatprep.subr.bf16.mxu1 %v3070_v25  ;;  %v226_v60 = vld [vmem:[%s4799_s1 + $0x658] sm:$0xff]  ;;  %v3341_v6 = vcombine.low %v298_v52, %v302_v54 }
  0xf3   :  { %v230_v61 = vld [vmem:[%s4799_s1 + $0x678] sm:$0xff] }
  0xf4   :  { %2258 = vmatpush1.bf16.msra.mxu0 %v3229_v30  ;;  %v90_v30 = vld [vmem:[%s4799_s1 + $0x218] sm:$0xff]  ;;  %v3270_v7 = vcombine.high %v226_v60, %v230_v61 }
  0xf5   :  { %2225 = vmatpush1.bf16.msra.mxu1 %v3069_v31  ;;  %2259 = vmatprep.subr.bf16.mxu0 %v3222_v32  ;;  %v94_v31 = vld [vmem:[%s4799_s1 + $0x238] sm:$0xff] }
  0xf6   :  { %2226 = vmatprep.subr.bf16.mxu1 %v3190_v33  ;;  %v3301_v33 = vcombine.low %v258_v15, %v262_v16  ;;  %v3133_v47 = vcombine.low %v90_v30, %v94_v31  ;;  %v290_v0 = vld [vmem:[%s4799_s1 + $0x858] sm:$0xff] }
  0xf7   :  { %v218_v53 = vld [vmem:[%s4799_s1 + $0x618] sm:$0xff] }
  0xf8   :  { %2260 = vmatpush1.bf16.msra.mxu0 %v3221_v38  ;;  %v3134_v38 = vcombine.high %v90_v30, %v94_v31  ;;  %v3517_v63 = vld [vmem:[%s4801_s3 + $0x38] sm:$0xff]   ;;  %v3534_v31 = vld [vmem:[%s4801_s3 + $0xf0] sm:$0xff]  }
  0xf9   :  { %2227 = vmatpush2.bf16.msra.mxu1 %v3189_v39  ;;  %2261 = vmatprep.subr.bf16.mxu0 %v3214_v40  ;;  %v242_v39 = vld [vmem:[%s4799_s1 + $0x6d8] sm:$0xff] }
  0xfa   :  { %2228 = vmatprep.subr.bf16.mxu1 %v3182_v41  ;;  %v246_v40 = vld [vmem:[%s4799_s1 + $0x6f8] sm:$0xff] }
  0xfb   :  { %v306_v41 = vld [vmem:[%s4799_s1 + $0x8d8] sm:$0xff]  ;;  %v3285_v55 = vcombine.low %v242_v39, %v246_v40 }
  0xfc   :  { %2262 = vmatpush1.bf16.msra.mxu0 %v3213_v48  ;;  %v3286_v48 = vcombine.high %v242_v39, %v246_v40  ;;  %v3523_v39 = vld [vmem:[%s4801_s3 + $0x20] sm:$0xff]   ;;  %v3524_v40 = vld [vmem:[%s4801_s3 + $0x58] sm:$0xff]  }
  0xfd   :  { %2229 = vmatpush2.bf16.msra.mxu1 %v3181_v49  ;;  %2263 = vmatprep.subr.bf16.mxu0 %v3206_v50  ;;  %v4534_v49 = vld [vmem:[%s4800_s2] sm:$0xff]  ;;  %v3350_v50 = vcombine.high %v306_v41, %v310_v42 }
  0xfe   :  { %2230 = vmatprep.subr.bf16.mxu1 %v3174_v51  ;;  %v234_v51 = vld [vmem:[%s4799_s1 + $0x698] sm:$0xff] }
 0x100   :  { %2264 = vmatpush1.bf16.msra.mxu0 %v3205_v56  ;;  %v320_v56 = vrot.slane %v4534_v49, %v319_v46  ;;  %v3525_v46 = vld [vmem:[%s4801_s3 + $0x18] sm:$0xff]  }
 0x101   :  { %2231 = vmatpush2.bf16.msra.mxu1 %v3173_v9  ;;  %2265 = vmatprep.subr.bf16.mxu0 %v3198_v57  ;;  %v3349_v9 = vcombine.low %v306_v41, %v310_v42  ;;  %v3278_v57 = vcombine.high %v234_v51, %v238_v59  ;;  %v3539_v41 = vld [vmem:[%s4801_s3 + $0xa0] sm:$0xff]  }
 0x102   :  { %2232 = vmatprep.subr.bf16.mxu1 %v3166_v58  ;;  %v3342_v58 = vcombine.high %v298_v52, %v302_v54  ;;  %v3528_v52 = vld [vmem:[%s4801_s3 + $0x48] sm:$0xff]  }
 0x104   :  { %2266 = vmatpush1.bf16.msra.mxu0 %v3197_v1  ;;  %v294_v1 = vld [vmem:[%s4799_s1 + $0x878] sm:$0xff] }
 0x105   :  { %2233 = vmatpush2.bf16.msra.mxu1 %v3165_v3  ;;  %2267 = vmatprep.subr.bf16.mxu0 %v3318_v4  ;;  %v3277_v3 = vcombine.low %v234_v51, %v238_v59  ;;  %v3334_v8 = vcombine.high %v290_v0, %v294_v1  ;;  %v3333_v18 = vcombine.low %v290_v0, %v294_v1  ;;  %v3542_v51 = vld [vmem:[%s4801_s3 + $0xd0] sm:$0xff]   ;;  %v3547_v0 = vld [vmem:[%s4801_s3 + $0x80] sm:$0xff]   ;;  %v3564_v1 = vld [vmem:[%s4801_s3 + $0x1f8] sm:$0xff]  }
 0x106   :  { %2234 = vmatprep.subr.bf16.mxu1 %v3158_v5  ;;  %v3527_v59 = vld [vmem:[%s4801_s3 + $0x10] sm:$0xff]  }
 0x107   :  { %v4494_v17 = vpop.f32.mrf.mxu0 }
 0x108   :  { %v4502_v21 = vpop.f32.mrf.mxu1  ;;  %2268 = vmatpush2.bf16.msra.mxu0 %v3317_v10  ;;  %v222_v10 = vld [vmem:[%s4799_s1 + $0x638] sm:$0xff] }
 0x109   :  { %2235 = vmatpush2.bf16.msra.mxu1 %v3157_v11  ;;  %v1877_v22 = vpop.f32.mrf.mxu0  ;;  %2269 = vmatprep.subr.bf16.mxu0 %v3310_v12  ;;  %v282_v11 = vld [vmem:[%s4799_s1 + $0x818] sm:$0xff]  ;;  %v3262_v19 = vcombine.high %v218_v53, %v222_v10 }
 0x10a   :  { %v4504_v25 = vpop.f32.mrf.mxu1  ;;  %2236 = vmatprep.subr.bf16.mxu1 %v3150_v14  ;;  %v1878_v4 = vadd.f32 %v1877_v22, %v320_v56  ;;  %v286_v12 = vld [vmem:[%s4799_s1 + $0x838] sm:$0xff]  ;;  %v3269_v14 = vcombine.low %v226_v60, %v230_v61  ;;  %v3261_v22 = vcombine.low %v218_v53, %v222_v10  ;;  %v3529_v56 = vld [vmem:[%s4801_s3 + $0x8] sm:$0xff]   ;;  %v3532_v60 = vld [vmem:[%s4801_s3] sm:$0xff]  }
 0x10b   :  { %v1879_v29 = vpop.f32.mrf.mxu0 }
 0x10c   :  { %v1920_v32 = vpop.f32.mrf.mxu1  ;;  %2270 = vmatpush2.bf16.msra.mxu0 %v3309_v13  ;;  %v1919_v15 = vadd.f32 %v4504_v25, %v1878_v4  ;;  %v3531_v25 = vld [vmem:[%s4801_s3 + $0xf8] sm:$0xff]  }
 0x10d   :  { %2237 = vmatpush2.bf16.msra.mxu1 %v3149_v23  ;;  %v1880_v34 = vpop.f32.mrf.mxu0  ;;  %2271 = vmatprep.subr.bf16.mxu0 %v3302_v24  ;;  %v3325_v23 = vcombine.low %v282_v11, %v286_v12  ;;  %v3516_v24 = vld [vmem:[%s4801_s3 + $0x78] sm:$0xff]   ;;  %v3519_v32 = vld [vmem:[%s4801_s3 + $0x30] sm:$0xff]  }
 0x10e   :  { %v1921_v37 = vpop.f32.mrf.mxu1  ;;  %2238 = vmatprep.subr.bf16.mxu1 %v3142_v26  ;;  %v3533_v29 = vld [vmem:[%s4801_s3 + $0xb8] sm:$0xff]   ;;  %v3521_v34 = vld [vmem:[%s4801_s3 + $0x28] sm:$0xff]  }
 0x10f   :  { %v315_v37 = vsub.s32 0, %v3702_v43 }
 0x110   :  { %2272 = vmatpush2.bf16.msra.mxu0 %v3301_v33  ;;  %v3520_v33 = vld [vmem:[%s4801_s3 + $0x68] sm:$0xff]  }
 0x111   :  { %2239 = vmatpush2.bf16.msra.mxu1 %v3141_v35  ;;  %2273 = vmatprep.subr.bf16.mxu0 %v3294_v36  ;;  %v3522_v35 = vld [vmem:[%s4801_s3 + $0x60] sm:$0xff]   ;;  %v3537_v36 = vld [vmem:[%s4801_s3 + $0xa8] sm:$0xff]   ;;  %v316_v42 = vrot.slane %v4534_v49, %v315_v37 }
 0x112   :  { %2240 = vmatprep.subr.bf16.mxu1 %v3134_v38  ;;  %v3538_v38 = vld [vmem:[%s4801_s3 + $0xe0] sm:$0xff]  }
 0x114   :  { %2274 = vmatpush2.bf16.msra.mxu0 %v3293_v44  ;;  %v3540_v44 = vld [vmem:[%s4801_s3 + $0xd8] sm:$0xff]  }
 0x115   :  { %2241 = vmatpush2.bf16.msra.mxu1 %v3133_v47  ;;  %2275 = vmatprep.subr.bf16.mxu0 %v3286_v48  ;;  %v3526_v47 = vld [vmem:[%s4801_s3 + $0x50] sm:$0xff]   ;;  %v3541_v48 = vld [vmem:[%s4801_s3 + $0x98] sm:$0xff]  }
 0x116   :  { %2300 = vmatprep.subr.bf16.mxu1 %v3350_v50  ;;  %v1876_v50 = vadd.f32 %v4494_v17, %v316_v42  ;;  %v3543_v17 = vld [vmem:[%s4801_s3 + $0x90] sm:$0xff]   ;;  %v3563_v42 = vld [vmem:[%s4801_s3 + $0x100] sm:$0xff]  }
 0x117   :  { %v4555_v62 = vpop.f32.mrf.mxu0 }
 0x118   :  { %2243 = vmatmul.mubr.bf16.vlgmr.msra.gmra.mxu1 %v3867_v20  ;;  %2276 = vmatpush2.bf16.msra.mxu0 %v3285_v55  ;;  %v1917_v54 = vadd.f32 %v4502_v21, %v1876_v50  ;;  %v3544_v55 = vld [vmem:[%s4801_s3 + $0xc8] sm:$0xff]  }
 0x119   :  { %2301 = vmatpush1.bf16.msra.mxu1 %v3349_v9  ;;  %v1959_v5 = vpop.f32.mrf.mxu0  ;;  %2277 = vmatprep.subr.bf16.mxu0 %v3278_v57  ;;  %v3530_v57 = vld [vmem:[%s4801_s3 + $0x40] sm:$0xff]   ;;  %v3545_v21 = vld [vmem:[%s4801_s3 + $0x88] sm:$0xff]  }
 0x11a   :  { %2302 = vmatprep.subr.bf16.mxu1 %v3342_v58  ;;  %2324 = vmatprep.mubr.bf16.mxu1 %v3603_v45  ;;  %v3326_v45 = vcombine.high %v282_v11, %v286_v12  ;;  %v1960_v13 = vadd.f32 %v1959_v5, %v1919_v15  ;;  %v1958_v9 = vadd.f32 %v4555_v62, %v1917_v54  ;;  %v3546_v58 = vld [vmem:[%s4801_s3 + $0xc0] sm:$0xff]   ;;  %v3548_v62 = vld [vmem:[%s4801_s3 + $0x178] sm:$0xff]   ;;  %v3550_v5 = vld [vmem:[%s4801_s3 + $0x170] sm:$0xff]   ;;  %v323_v12 = vsub.s32 2, %v3702_v43 }
 0x11b   :  { %v1961_v20 = vpop.f32.mrf.mxu0  ;;  %v3554_v11 = vld [vmem:[%s4801_s3 + $0x160] sm:$0xff]   ;;  %v327_v15 = vsub.s32 3, %v3702_v43  ;;  %v3568_v50 = vld [vmem:[%s4801_s3 + $0x1e8] sm:$0xff]   ;;  %v3573_v54 = vld [vmem:[%s4801_s3 + $0x198] sm:$0xff]  }
 0x11c   :  { %2278 = vmatpush2.bf16.msra.mxu0 %v3277_v3  ;;  %v2334_v26 = vmax.f32 %v1960_v13, 0.0  ;;  %v2333_v61 = vmax.f32 %v1958_v9, 0.0  ;;  %v3549_v3 = vld [vmem:[%s4801_s3 + $0x138] sm:$0xff]   ;;  %v3553_v20 = vld [vmem:[%s4801_s3 + $0x128] sm:$0xff]  }
 0x11d   :  { %2303 = vmatpush1.bf16.msra.mxu1 %v3341_v6  ;;  %v1962_v16 = vpop.f32.mrf.mxu0  ;;  %2279 = vmatprep.subr.bf16.mxu0 %v3270_v7  ;;  %v3551_v7 = vld [vmem:[%s4801_s3 + $0x130] sm:$0xff]   ;;  %v3557_v13 = vld [vmem:[%s4801_s3 + $0x118] sm:$0xff]   ;;  %v3576_v9 = vld [vmem:[%s4801_s3 + $0x1c8] sm:$0xff]  }
 0x11e   :  { %2304 = vmatprep.subr.bf16.mxu1 %v3334_v8  ;;  %v2342_v30 = vpack.c.bf16 %v2334_v26, %v2334_v26  ;;  %v2341_v4 = vpack.c.bf16 %v2333_v61, %v2333_v61  ;;  %v3552_v8 = vld [vmem:[%s4801_s3 + $0x168] sm:$0xff]   ;;  %v3555_v16 = vld [vmem:[%s4801_s3 + $0x120] sm:$0xff]  }
 0x120   :  { %2280 = vmatpush2.bf16.msra.mxu0 %v3269_v14 }
 0x121   :  { %2305 = vmatpush1.bf16.msra.mxu1 %v3333_v18  ;;  %2281 = vmatprep.subr.bf16.mxu0 %v3262_v19  ;;  %v3556_v18 = vld [vmem:[%s4801_s3 + $0x158] sm:$0xff]   ;;  %v324_v19 = vrot.slane %v4534_v49, %v323_v12 }
 0x122   :  { %2306 = vmatprep.subr.bf16.mxu1 %v3326_v45  ;;  %v328_v45 = vrot.slane %v4534_v49, %v327_v15 }
 0x124   :  { %2282 = vmatpush2.bf16.msra.mxu0 %v3261_v22  ;;  %v3558_v22 = vld [vmem:[%s4801_s3 + $0x150] sm:$0xff]  }
 0x125   :  { %2307 = vmatpush1.bf16.msra.mxu1 %v3325_v23  ;;  %3420 = vmatprep.subr.bf16.mxu0 %v3516_v24 }
 0x126   :  { %3442 = vmatprep.subr.bf16.mxu1 %v3531_v25 }
 0x127   :  { %2284 = vmatmul.mubr.bf16.vlgmr.msra.gmra.mxu0 %v3883_v27  ;;  %v3535_v27 = vld [vmem:[%s4801_s3 + $0xb0] sm:$0xff]  }
 0x128   :  { %3354 = vmatmul.mubr.msk.bf16.vlgmr.msra.gmra.mxu1 %vm1837_vm0, %v3941_v2  ;;  %3421 = vmatpush3.bf16.msra.mxu0 %v3517_v63  ;;  %v3536_v2 = vld [vmem:[%s4801_s3 + $0xe8] sm:$0xff]  }
 0x129   :  { %2900 = vmatprep.mubr.bf16.mxu0 %v2342_v30  ;;  %3422 = vmatprep.subr.bf16.mxu0 %v3518_v28  ;;  %v3559_v28 = vld [vmem:[%s4801_s3 + $0x110] sm:$0xff]   ;;  %v3560_v30 = vld [vmem:[%s4801_s3 + $0x148] sm:$0xff]  }
 0x12a   :  { %3443 = vmatpush3.bf16.msra.mxu1 %v3533_v29 }
 0x12b   :  { %3444 = vmatprep.subr.bf16.mxu1 %v3534_v31 }
 0x12c   :  { %3423 = vmatpush3.bf16.msra.mxu0 %v3519_v32 }
 0x12d   :  { %3424 = vmatprep.subr.bf16.mxu0 %v3520_v33 }
 0x12e   :  { %3445 = vmatpush3.bf16.msra.mxu1 %v3535_v27 }
 0x12f   :  { %3446 = vmatprep.subr.bf16.mxu1 %v3536_v2 }
 0x130   :  { %3425 = vmatpush3.bf16.msra.mxu0 %v3521_v34 }
 0x131   :  { %3426 = vmatprep.subr.bf16.mxu0 %v3522_v35  ;;  %v3561_v35 = vld [vmem:[%s4801_s3 + $0x108] sm:$0xff]  }
 0x132   :  { %3447 = vmatpush3.bf16.msra.mxu1 %v3537_v36 }
 0x133   :  { %3448 = vmatprep.subr.bf16.mxu1 %v3538_v38  ;;  %v3562_v38 = vld [vmem:[%s4801_s3 + $0x140] sm:$0xff]  }
 0x134   :  { %3427 = vmatpush3.bf16.msra.mxu0 %v3523_v39 }
 0x135   :  { %3428 = vmatprep.subr.bf16.mxu0 %v3524_v40 }
 0x136   :  { %3449 = vmatpush3.bf16.msra.mxu1 %v3539_v41 }
 0x137   :  { %3450 = vmatprep.subr.bf16.mxu1 %v3540_v44  ;;  %v3565_v44 = vld [vmem:[%s4801_s3 + $0x1b8] sm:$0xff]  }
 0x138   :  { %3429 = vmatpush3.bf16.msra.mxu0 %v3525_v46 }
 0x139   :  { %3430 = vmatprep.subr.bf16.mxu0 %v3526_v47  ;;  %v3566_v47 = vld [vmem:[%s4801_s3 + $0x1f0] sm:$0xff]  }
 0x13a   :  { %3451 = vmatpush3.bf16.msra.mxu1 %v3541_v48  ;;  %v3567_v48 = vld [vmem:[%s4801_s3 + $0x1b0] sm:$0xff]  }
 0x13b   :  { %3452 = vmatprep.subr.bf16.mxu1 %v3542_v51  ;;  %v3569_v51 = vld [vmem:[%s4801_s3 + $0x1a8] sm:$0xff]  }
 0x13c   :  { %3431 = vmatpush3.bf16.msra.mxu0 %v3527_v59  ;;  %v3570_v59 = vld [vmem:[%s4801_s3 + $0x1e0] sm:$0xff]  }
 0x13d   :  { %3432 = vmatprep.subr.bf16.mxu0 %v3528_v52  ;;  %v3571_v52 = vld [vmem:[%s4801_s3 + $0x1a0] sm:$0xff]  }
 0x13e   :  { %3453 = vmatpush3.bf16.msra.mxu1 %v3543_v17  ;;  %v3572_v17 = vld [vmem:[%s4801_s3 + $0x1d8] sm:$0xff]  }
 0x13f   :  { %3454 = vmatprep.subr.bf16.mxu1 %v3544_v55  ;;  %v3574_v55 = vld [vmem:[%s4801_s3 + $0x1d0] sm:$0xff]  }
 0x140   :  { %3433 = vmatpush3.bf16.msra.mxu0 %v3529_v56  ;;  %v3575_v56 = vld [vmem:[%s4801_s3 + $0x190] sm:$0xff]  }
 0x141   :  { %3434 = vmatprep.subr.bf16.mxu0 %v3530_v57  ;;  %v3577_v57 = vld [vmem:[%s4801_s3 + $0x188] sm:$0xff]  }
 0x142   :  { %3455 = vmatpush3.bf16.msra.mxu1 %v3545_v21  ;;  %v3578_v21 = vld [vmem:[%s4801_s3 + $0x1c0] sm:$0xff]  }
 0x143   :  { %3456 = vmatprep.subr.bf16.mxu1 %v3546_v58  ;;  %v3579_v58 = vld [vmem:[%s4801_s3 + $0x180] sm:$0xff]  }
 0x144   :  { %3435 = vmatpush3.bf16.msra.mxu0 %v3532_v60 }
 0x145   :  { %3464 = vmatprep.subr.bf16.mxu0 %v3548_v62 }
 0x146   :  { %3457 = vmatpush3.bf16.msra.mxu1 %v3547_v0  ;;  %v331_v0 = vsub.s32 4, %v3702_v43 }
 0x147   :  { %2901 = vmatmul.mubr.bf16.vlgmr.msra.gmra.mxu0 %v2341_v4  ;;  %3486 = vmatprep.subr.bf16.mxu1 %v3564_v1  ;;  %v335_v4 = vsub.s32 5, %v3702_v43 }
 0x148   :  { %v1998_v6 = vpop.f32.mrf.mxu1  ;;  %3465 = vmatpush3.bf16.msra.mxu0 %v3549_v3 }
 0x149   :  { %3466 = vmatprep.subr.bf16.mxu0 %v3550_v5  ;;  %v1999_v23 = vadd.f32 %v1998_v6, %v324_v19 }
 0x14a   :  { %v2000_v53 = vpop.f32.mrf.mxu1 }
 0x14b   :  { %v2001_v25 = vadd.f32 %v2000_v53, %v328_v45  ;;  %v336_v53 = vrot.slane %v4534_v49, %v335_v4 }
 0x14c   :  { %v2002_v10 = vpop.f32.mrf.mxu1  ;;  %3467 = vmatpush3.bf16.msra.mxu0 %v3551_v7  ;;  %v332_v7 = vrot.slane %v4534_v49, %v331_v0 }
 0x14d   :  { %3468 = vmatprep.subr.bf16.mxu0 %v3552_v8 }
 0x14e   :  { %v2003_v14 = vpop.f32.mrf.mxu1 }
 0x150   :  { %3469 = vmatpush3.bf16.msra.mxu0 %v3553_v20 }
 0x151   :  { %3470 = vmatprep.subr.bf16.mxu0 %v3554_v11 }
 0x154   :  { %3471 = vmatpush3.bf16.msra.mxu0 %v3555_v16 }
 0x155   :  { %3472 = vmatprep.subr.bf16.mxu0 %v3556_v18 }
 0x157   :  { %v2039_v24 = vpop.f32.mrf.mxu0 }
 0x158   :  { %v2040_v26 = vadd.f32 %v2039_v24, %v1999_v23  ;;  %v2080_v63 = vpop.f32.mrf.mxu1  ;;  %3473 = vmatpush3.bf16.msra.mxu0 %v3557_v13 }
 0x159   :  { %v2041_v29 = vpop.f32.mrf.mxu0  ;;  %3474 = vmatprep.subr.bf16.mxu0 %v3558_v22 }
 0x15a   :  { %v2081_v31 = vadd.f32 %v2080_v63, %v2040_v26  ;;  %v2042_v32 = vadd.f32 %v2041_v29, %v2001_v25  ;;  %v2082_v33 = vpop.f32.mrf.mxu1 }
 0x15b   :  { %v2043_v27 = vpop.f32.mrf.mxu0 }
 0x15c   :  { %v2083_v2 = vadd.f32 %v2082_v33, %v2042_v32  ;;  %v2084_v34 = vpop.f32.mrf.mxu1  ;;  %3475 = vmatpush3.bf16.msra.mxu0 %v3559_v28  ;;  %v2335_v36 = vmax.f32 %v2081_v31, 0.0  ;;  %v339_v28 = vsub.s32 6, %v3702_v43 }
 0x15d   :  { %v2044_v37 = vpop.f32.mrf.mxu0  ;;  %3476 = vmatprep.subr.bf16.mxu0 %v3560_v30  ;;  %v343_v30 = vsub.s32 7, %v3702_v43 }
 0x15e   :  { %v2336_v39 = vmax.f32 %v2083_v2, 0.0  ;;  %v2085_v40 = vpop.f32.mrf.mxu1  ;;  %v2343_v46 = vpack.c.bf16 %v2335_v36, %v2335_v36  ;;  %v340_v31 = vrot.slane %v4534_v49, %v339_v28 }
 0x15f   :  { %v344_v32 = vrot.slane %v4534_v49, %v343_v30 }
 0x160   :  { %v2344_v41 = vpack.c.bf16 %v2336_v39, %v2336_v39  ;;  %3477 = vmatpush3.bf16.msra.mxu0 %v3561_v35 }
 0x161   :  { %3478 = vmatprep.subr.bf16.mxu0 %v3562_v38 }
 0x162   :  { %2940 = vmatprep.mubr.bf16.mxu1 %v2344_v41 }
 0x163   :  { %2941 = vmatmul.mubr.bf16.vlgmr.msra.gmra.mxu1 %v2343_v46 }
 0x164   :  { %3479 = vmatpush3.bf16.msra.mxu0 %v3563_v42  ;;  %3487 = vmatpush3.bf16.msra.mxu1 %v3565_v44 }
 0x165   :  { %3488 = vmatprep.subr.bf16.mxu1 %v3566_v47 }
 0x168   :  { %3489 = vmatpush3.bf16.msra.mxu1 %v3567_v48 }
 0x169   :  { %3490 = vmatprep.subr.bf16.mxu1 %v3568_v50 }
 0x16c   :  { %3491 = vmatpush3.bf16.msra.mxu1 %v3569_v51 }
 0x16d   :  { %3492 = vmatprep.subr.bf16.mxu1 %v3570_v59 }
 0x170   :  { %3493 = vmatpush3.bf16.msra.mxu1 %v3571_v52 }
 0x171   :  { %3494 = vmatprep.subr.bf16.mxu1 %v3572_v17 }
 0x174   :  { %3495 = vmatpush3.bf16.msra.mxu1 %v3573_v54  ;;  %v3355_v54 = vld [vmem:[%s4802_s4] ss:$0 sm:$0xff] }
 0x175   :  { %3496 = vmatprep.subr.bf16.mxu1 %v3574_v55 }
 0x178   :  { %3497 = vmatpush3.bf16.msra.mxu1 %v3575_v56 }
 0x179   :  { %3498 = vmatprep.subr.bf16.mxu1 %v3576_v9 }
 0x17c   :  { %3499 = vmatpush3.bf16.msra.mxu1 %v3577_v57 }
 0x17d   :  { %3500 = vmatprep.subr.bf16.mxu1 %v3578_v21 }
 0x180   :  { %3501 = vmatpush3.bf16.msra.mxu1 %v3579_v58 }
 0x197   :  { %v2121_v60 = vpop.f32.mrf.mxu0 }
 0x198   :  { %v2162_v61 = vpop.f32.mrf.mxu1  ;;  %v2122_v10 = vadd.f32 %v2121_v60, %v332_v7 }
 0x199   :  { %v2123_v62 = vpop.f32.mrf.mxu0 }
 0x19a   :  { %v2164_v1 = vpop.f32.mrf.mxu1  ;;  %v2124_v20 = vadd.f32 %v2123_v62, %v336_v53  ;;  %v2163_v11 = vadd.f32 %v2162_v61, %v2122_v10  ;;  %v3604_v61 = vmov 6  }
 0x19b   :  { %v2125_v3 = vpop.f32.mrf.mxu0  ;;  %3514 = vset.pattern.permute.xlu0 %v3604_v61 }
 0x19c   :  { %v2166_v5 = vpop.f32.mrf.mxu1  ;;  %v2165_v14 = vadd.f32 %v2164_v1, %v2124_v20 }
 0x19d   :  { %v2126_v6 = vpop.f32.mrf.mxu0 }
 0x19e   :  { %v2167_v8 = vpop.f32.mrf.mxu1 }
 0x1a7   :  { %v2203_v12 = vpop.f32.mrf.mxu0 }
 0x1a8   :  { %v2204_v15 = vadd.f32 %v2203_v12, %v2163_v11 }
 0x1a9   :  { %v2205_v16 = vpop.f32.mrf.mxu0 }
 0x1aa   :  { %v2206_v18 = vadd.f32 %v2205_v16, %v2165_v14  ;;  %v2337_v19 = vmax.f32 %v2204_v15, 0.0 }
 0x1ab   :  { %v2207_v45 = vpop.f32.mrf.mxu0 }
 0x1ac   :  { %v2338_v13 = vmax.f32 %v2206_v18, 0.0  ;;  %v2345_v24 = vpack.c.bf16 %v2337_v19, %v2337_v19 }
 0x1ad   :  { %v2208_v22 = vpop.f32.mrf.mxu0 }
 0x1ae   :  { %v2346_v23 = vpack.c.bf16 %v2338_v13, %v2338_v13 }
 0x1b0   :  { %2980 = vmatprep.mubr.bf16.mxu0 %v2346_v23 }
 0x1b1   :  { %2981 = vmatmul.mubr.bf16.vlgmr.msra.gmra.mxu0 %v2345_v24 }
 0x1d8   :  { %v2244_v25 = vpop.f32.mrf.mxu1 }
 0x1d9   :  { %v2245_v33 = vadd.f32 %v2244_v25, %v340_v31 }
 0x1da   :  { %v2246_v26 = vpop.f32.mrf.mxu1 }
 0x1db   :  { %v2247_v2 = vadd.f32 %v2246_v26, %v344_v32 }
 0x1dc   :  { %v2248_v63 = vpop.f32.mrf.mxu1 }
 0x1de   :  { %v2249_v29 = vpop.f32.mrf.mxu1 }
 0x1e7   :  { %v2285_v27 = vpop.f32.mrf.mxu0 }
 0x1e8   :  { %v2286_v34 = vadd.f32 %v2285_v27, %v2245_v33  ;;  %v2326_v35 = vpop.f32.mrf.mxu1 }
 0x1e9   :  { %v2287_v36 = vpop.f32.mrf.mxu0 }
 0x1ea   :  { %v2327_v37 = vadd.f32 %v2326_v35, %v2286_v34  ;;  %v2288_v38 = vadd.f32 %v2287_v36, %v2247_v2  ;;  %v2328_v39 = vpop.f32.mrf.mxu1 }
 0x1eb   :  { %v2289_v40 = vpop.f32.mrf.mxu0 }
 0x1ec   :  { %v2329_v41 = vadd.f32 %v2328_v39, %v2288_v38  ;;  %v2330_v42 = vpop.f32.mrf.mxu1  ;;  %v2339_v44 = vmax.f32 %v2327_v37, 0.0 }
 0x1ed   :  { %v2290_v46 = vpop.f32.mrf.mxu0 }
 0x1ee   :  { %v2340_v47 = vmax.f32 %v2329_v41, 0.0  ;;  %v2331_v43 = vpop.f32.mrf.mxu1  ;;  %v2347_v50 = vpack.c.bf16 %v2339_v44, %v2339_v44 }
 0x1f0   :  { %v2348_v48 = vpack.c.bf16 %v2340_v47, %v2340_v47 }
 0x1f2   :  { %3020 = vmatprep.mubr.bf16.mxu1 %v2348_v48 }
 0x1f3   :  { %3021 = vmatmul.mubr.bf16.vlgmr.msra.gmra.mxu1 %v2347_v50 }
 0x207   :  { %v3436_v49 = vpop.f32.mrf.mxu0 }
 0x209   :  { %v3437_v51 = vpop.f32.mrf.mxu0 }
 0x20a   :  { %v3438_v59 = vadd.f32 %v3437_v51, %v3436_v49 }
 0x20b   :  { %v3439_v52 = vpop.f32.mrf.mxu0 }
 0x20c   :  { %v2903_v9 = vadd.f32 %v3438_v59, %v3355_v54 }
 0x20d   :  { %v3440_v17 = vpop.f32.mrf.mxu0 }
 0x223   :  { %v3458_v55 = vpop.f32.mrf.mxu1 }
 0x225   :  { %v3459_v56 = vpop.f32.mrf.mxu1 }
 0x226   :  { %v3460_v57 = vadd.f32 %v3459_v56, %v3458_v55 }
 0x227   :  { %v3461_v21 = vpop.f32.mrf.mxu1 }
 0x228   :  { %v2943_v58 = vadd.f32 %v3460_v57, %v2903_v9 }
 0x229   :  { %v3462_v60 = vpop.f32.mrf.mxu1 }
 0x271   :  { %v3480_v62 = vpop.f32.mrf.mxu0 }
 0x273   :  { %v3481_v0 = vpop.f32.mrf.mxu0 }
 0x274   :  { %v3482_v1 = vadd.f32 %v3481_v0, %v3480_v62 }
 0x275   :  { %v3483_v3 = vpop.f32.mrf.mxu0 }
 0x276   :  { %v2983_v4 = vadd.f32 %v3482_v1, %v2943_v58 }
 0x277   :  { %v3484_v5 = vpop.f32.mrf.mxu0 }
 0x2b3   :  { %v3502_v6 = vpop.f32.mrf.mxu1 }
 0x2b5   :  { %v3503_v7 = vpop.f32.mrf.mxu1 }
 0x2b6   :  { %v3504_v8 = vadd.f32 %v3503_v7, %v3502_v6 }
 0x2b7   :  { %v3505_v53 = vpop.f32.mrf.mxu1 }
 0x2b8   :  { %v3023_v10 = vadd.f32 %v3504_v8, %v2983_v4 }
 0x2b9   :  { %v3506_v20 = vpop.f32.mrf.mxu1 }
 0x2ba   :  { %v3029_v11 = vsel %vm3028_vm1, %v3023_v10, 0.0 }
 0x2bb   :  { %3030 = vadd.xlane.f32.xlu0 %v3029_v11 }
 0x2d1   :  { %3042 = vperm.xlu0 %3514, %v3023_v10  }
 0x344   :  { %v3031_v12 = vpop.xlane.xlu0 %3030 }
 0x345   :  { %v3032_v14 = vrot.slane %v3031_v12, 4 }
 0x347   :  { %v3033_v15 = vadd.f32 %v3032_v14, %v3031_v12 }
 0x349   :  { %v3034_v16 = vrot.slane %v3033_v15, 2 }
 0x34b   :  { %v3035_v18 = vadd.f32 %v3034_v16, %v3033_v15 }
 0x34c   :  { %v3043_v13 = vpop.permute.xlu0 %3042 }
 0x34d   :  { %v3036_v19 = vrot.slane %v3035_v18, 1  ;;  %v3045_v22 = vadd.f32 %v3043_v13, %v3023_v10 }
 0x34f   :  { %v3037_v45 = vadd.f32 %v3036_v19, %v3035_v18 }
 0x351   :  { %3508 = vpush %v3037_v45 }
 0x382   :  { %s3509_s4 = spop %3508 }
 0x383   :  { %s3039_s16 = smul.f32 0.083333336, %s3509_s4 }
 0x385   :  { %v3046_v23 = vstv %s3039_s16 }
 0x386   :  { %v3047_v24 = vsub.f32 %v3045_v22, %v3046_v23 }
 0x388   :  { %3048 = vst.msk [vmem:[#allocation2] sm:$0x3] %vm3028_vm1, %v3047_v24 }
 0x389   :  { %3591 = shalt.err (!%p3588_p4)
}
 0x38a   :  { %3058 = dma.vmem_to_hbm [thread:$0]  %s3056_s18, 32, %s4803_s5, [#allocation3]  }
 0x38b   :  { %3600 = dma.done.wait [#allocation3], 32  }
 0x38c   :  { %3601 = vsyncadd [#allocation3], 4294967264 }
 0x38d   :  { %3062 = vsyncpa [#allocation3], 1 }

</bundles_post_ra>
